<compile_context>
chip_gen: v7x
topology: tpu7x:2x2x1
jax: 0.10.0
libtpu: 0.0.40
codegen_flags: <defaults>
</compile_context>

<pallas_src>
import math
from functools import partial

import jax
import jax.numpy as jnp
from jax.experimental import pallas as pl
from jax.experimental.pallas import tpu as pltpu


def _round_up(x, m):
    return (x + m - 1) // m * m


def _gelu_tanh(x):
    # "gelu_pytorch_tanh" activation used by SigLIP configs; runs in x.dtype.
    c = math.sqrt(2.0 / math.pi)
    return 0.5 * x * (1.0 + jnp.tanh(c * (x + 0.044715 * (x * x * x))))


# ---------------------------------------------------------------------------
# Kernel
# ---------------------------------------------------------------------------

def siglip_mlp_kernel(x_ref, w1_ref, b1_ref, w2_ref, b2_ref, o_ref, acc_ref,
                      *, chunk_bounds, gelu_bf16):
    """One token tile of the fused MLP.

    x_ref:   (tm, H)      input tile (f32 or bf16)
    w1_ref:  (H, I_pad)   bf16 fc1 weight, pre-transposed to (in, out), resident
    b1_ref:  (1, I_pad)   f32
    w2_ref:  (I_pad, H)   bf16 fc2 weight, pre-transposed to (in, out), resident
    b2_ref:  (1, H)       f32
    o_ref:   (tm, H)      output tile (same dtype as input)
    acc_ref: (tm, H) f32  scratch accumulator

    The intermediate dim is walked in static chunks so the GELU temporaries stay
    at (tm, ic) instead of (tm, I_pad).
    """
    x = x_ref[...]
    x16 = x if x.dtype == jnp.bfloat16 else x.astype(jnp.bfloat16)

    first = True
    for lo, sz in chunk_bounds:                 # static, fully unrolled
        w1c = w1_ref[:, lo:lo + sz]             # (H, sz)  bf16
        b1c = b1_ref[:, lo:lo + sz]             # (1, sz)  f32
        w2c = w2_ref[lo:lo + sz, :]             # (sz, H)  bf16

        h = jnp.dot(x16, w1c, preferred_element_type=jnp.float32) + b1c
        if gelu_bf16:
            a = _gelu_tanh(h.astype(jnp.bfloat16))       # bf16 VPU/EUP (v6e/v7x)
        else:
            a = _gelu_tanh(h).astype(jnp.bfloat16)       # f32 VPU/EUP (v5e)
        contrib = jnp.dot(a, w2c, preferred_element_type=jnp.float32)
        if first:
            acc_ref[...] = contrib
            first = False
        else:
            acc_ref[...] += contrib

    o_ref[...] = (acc_ref[...] + b2_ref[...]).astype(o_ref.dtype)


# ---------------------------------------------------------------------------
# Wrapper helpers
# ---------------------------------------------------------------------------

_BUFFERED1_SUPPORTED = None


def _probe_kernel(a_ref, o_ref):
    o_ref[...] = a_ref[...] + 1.0


def _buffered1_supported():
    """Probe once (eagerly, on a tiny kernel) whether pipeline_mode=pl.Buffered(1)
    is supported.  Done outside the real pallas_call so no try/except wraps the
    main (possibly jitted) path; the result is cached."""
    global _BUFFERED1_SUPPORTED
    if _BUFFERED1_SUPPORTED is None:
        try:
            fn = pl.pallas_call(
                _probe_kernel,
                out_shape=jax.ShapeDtypeStruct((16, 128), jnp.float32),
                grid=(2,),
                in_specs=[pl.BlockSpec((8, 128), lambda i: (0, 0),
                                       pipeline_mode=pl.Buffered(1))],
                out_specs=pl.BlockSpec((8, 128), lambda i: (i, 0)),
            )
            jax.block_until_ready(fn(jnp.zeros((8, 128), jnp.float32)))
            _BUFFERED1_SUPPORTED = True
        except Exception:
            _BUFFERED1_SUPPORTED = False
    return _BUFFERED1_SUPPORTED


def _vmem_capacity_bytes():
    try:
        return int(pltpu.get_tpu_info().vmem_capacity_bytes)
    except Exception:
        return 64 * 1024 * 1024          # conservative: v7x physical VMEM per core


def _gelu_in_bf16_default():
    # v6e/v7x VPU+EUP have bf16 paths; v5e (and older) do not -> keep f32 there.
    try:
        kind = jax.devices()[0].device_kind.lower()
    except Exception:
        return False
    return ("v6" in kind) or ("v7" in kind)


def _vmem_need_bytes(tm, H, I_pad, ic, io_itemsize, weight_buffers):
    weights = 2 * H * I_pad * 2 * weight_buffers          # W1^T + W2^T, bf16
    biases = (I_pad + H) * 4 * weight_buffers              # f32
    io = 2 * (tm * H * io_itemsize) * 2                    # x + out tiles, double-buffered
    acc = tm * H * 4                                        # f32 scratch accumulator
    tmp = tm * ic * (4 + 2)                                 # per-chunk h (f32) + a (bf16)
    return weights + biases + io + acc + tmp


# ---------------------------------------------------------------------------
# Wrapper
# ---------------------------------------------------------------------------

def siglip_mlp(hidden_states, w1, b1, w2, b2, *, tm=256, ic=512,
               gelu_bf16=None, vmem_limit_bytes=None):
    """Fused SigLipMLP forward.

    hidden_states: (B, S, H) float32 or bfloat16.
    w1: (I, H), b1: (I,)   -- fc1 as stored by nn.Linear (out_features, in_features)
    w2: (H, I), b2: (H,)   -- fc2
    """
    B, S, H = hidden_states.shape
    I = w1.shape[0]
    assert w1.shape == (I, H) and w2.shape == (H, I)
    T = B * S
    x = hidden_states.reshape(T, H)
    io_itemsize = jnp.dtype(hidden_states.dtype).itemsize

    if gelu_bf16 is None:
        gelu_bf16 = _gelu_in_bf16_default()

    # --- intermediate-dim chunking (static) --------------------------------
    # Pad I to a multiple of 256 (no ragged MXU/lane remainder) and split into
    # lane-aligned chunks so the GELU temporaries stay small.
    I_pad = _round_up(max(I, 256), 256)
    ic = _round_up(max(256, min(ic, I_pad)), 256)
    chunk_bounds = []
    off = 0
    while off < I_pad:
        sz = min(ic, I_pad - off)
        chunk_bounds.append((off, sz))
        off += sz

    # --- VMEM plan / per-generation sizing ----------------------------------
    weight_buffers = 1 if _buffered1_supported() else 2
    tm = max(8, _round_up(tm, 8))
    budget = int(_vmem_capacity_bytes() * 0.9)
    while tm > 64 and _vmem_need_bytes(tm, H, I_pad, ic, io_itemsize, weight_buffers) > budget:
        tm //= 2
    need = _vmem_need_bytes(tm, H, I_pad, ic, io_itemsize, weight_buffers)
    if vmem_limit_bytes is None:
        vmem_limit_bytes = min(budget, max(int(need * 1.25) + (4 << 20), 16 << 20))

    grid_m = pl.cdiv(T, tm)
    # NOTE: no jnp.pad of the token axis.  Pallas masks the writeback of the partial
    # last output block; rows are independent, so garbage rows of the last input tile
    # never reach valid outputs.  If a cross-row reduction is ever added here, masking
    # of the tail rows must be re-added.
    # NOTE(v7x): for small batches consider picking tm so grid_m is even, since the
    # single "parallel" axis is sharded across the 2 TensorCores.

    # --- weight glue (in a real model this is folded into weight loading) ---
    w1_t = w1.T.astype(jnp.bfloat16)                 # (H, I)
    w2_t = w2.T.astype(jnp.bfloat16)                 # (I, H)
    b1_2d = b1.reshape(1, I).astype(jnp.float32)
    b2_2d = b2.reshape(1, H).astype(jnp.float32)
    if I_pad != I:
        w1_t = jnp.pad(w1_t, ((0, 0), (0, I_pad - I)))
        w2_t = jnp.pad(w2_t, ((0, I_pad - I), (0, 0)))
        b1_2d = jnp.pad(b1_2d, ((0, 0), (0, I_pad - I)))

    def resident(shape):
        # Constant index_map -> resident in VMEM across the whole grid; single-buffer
        # when supported so resident weights don't pay the double-buffer tax.
        if weight_buffers == 1:
            return pl.BlockSpec(shape, lambda i: (0, 0), pipeline_mode=pl.Buffered(1))
        return pl.BlockSpec(shape, lambda i: (0, 0))

    cost = pl.CostEstimate(
        flops=4 * T * H * I_pad,
        transcendentals=T * I_pad,
        bytes_accessed=2 * T * H * io_itemsize + 2 * H * I_pad * 2 + (I_pad + H) * 4,
    )

    kernel = partial(siglip_mlp_kernel,
                     chunk_bounds=tuple(chunk_bounds),
                     gelu_bf16=bool(gelu_bf16))

    out = pl.pallas_call(
        kernel,
        out_shape=jax.ShapeDtypeStruct((T, H), hidden_states.dtype),
        grid_spec=pltpu.PrefetchScalarGridSpec(
            num_scalar_prefetch=0,
            grid=(grid_m,),
            in_specs=[
                pl.BlockSpec((tm, H), lambda i: (i, 0)),     # x tile (pipelined)
                resident((H, I_pad)),                        # W1^T
                resident((1, I_pad)),                        # b1
                resident((I_pad, H)),                        # W2^T
                resident((1, H)),                            # b2
            ],
            out_specs=pl.BlockSpec((tm, H), lambda i: (i, 0)),
            scratch_shapes=[pltpu.VMEM((tm, H), jnp.float32)],
        ),
        compiler_params=pltpu.CompilerParams(
            dimension_semantics=("parallel",),               # independent token tiles
            vmem_limit_bytes=int(vmem_limit_bytes),
        ),
        cost_estimate=cost,
    )(x, w1_t, b1_2d, w2_t, b2_2d)

    return out.reshape(B, S, H)


# ---------------- references for the self-test ----------------

def siglip_mlp_ref_f32(x, w1, b1, w2, b2):
    h = x @ w1.T + b1
    return _gelu_tanh(h) @ w2.T + b2


def siglip_mlp_ref_matched(x, w1, b1, w2, b2, *, gelu_bf16=False):
    # Matches kernel precision: bf16 MXU operands, f32 accumulation, GELU dtype matched.
    xb = x.reshape(-1, x.shape[-1]).astype(jnp.bfloat16)
    h = jnp.dot(xb, w1.T.astype(jnp.bfloat16), preferred_element_type=jnp.float32) + b1
    a = _gelu_tanh(h.astype(jnp.bfloat16)) if gelu_bf16 else _gelu_tanh(h).astype(jnp.bfloat16)
    y = jnp.dot(a, w2.T.astype(jnp.bfloat16), preferred_element_type=jnp.float32) + b2
    return y.reshape(x.shape)


if __name__ == "__main__":
    # Small config consistent with the module: 729 patches per image (384/14 -> 27x27),
    # reduced hidden/intermediate sizes (real SigLIP: 1152 / 4304).  I=640 exercises both
    # the I-padding (640 -> 768) and the multi-chunk path; T=1458 exercises the masked
    # partial last token tile (no wrapper-side padding).
    B, S, H, I = 2, 729, 256, 640

    key = jax.random.PRNGKey(0)
    kx, k1, k2, k3, k4 = jax.random.split(key, 5)

    x = jax.random.normal(kx, (B, S, H), dtype=jnp.float32)
    # Deterministic synthetic parameters (nn.Linear shapes: (out, in) and (out,)).
    w1 = jax.random.normal(k1, (I, H), dtype=jnp.float32) * 0.02
    b1 = jax.random.normal(k2, (I,), dtype=jnp.float32) * 0.02
    w2 = jax.random.normal(k3, (H, I), dtype=jnp.float32) * 0.02
    b2 = jax.random.normal(k4, (H,), dtype=jnp.float32) * 0.02

    out = jax.block_until_ready(siglip_mlp(x, w1, b1, w2, b2))
    assert out.shape == (B, S, H)

    # Tight check against a matched-precision reference (same bf16/f32 split as the kernel).
    gelu_bf16 = _gelu_in_bf16_default()
    ref_m = siglip_mlp_ref_matched(x, w1, b1, w2, b2, gelu_bf16=gelu_bf16)
    assert jnp.allclose(out, ref_m, atol=2e-3, rtol=2e-3), "mismatch vs matched-precision ref"

    # Loose sanity check against the full-f32 reference (bf16 casts cost some precision).
    ref_f = siglip_mlp_ref_f32(x, w1, b1, w2, b2)
    assert jnp.allclose(out, ref_f, atol=5e-2, rtol=5e-2), "mismatch vs f32 ref"

    print("KERNEL_OK")
</pallas_src>

<mosaic_0001>
module attributes {stable_mosaic.version = 11 : i64} {
  func.func @_probe_kernel(%arg0: i32, %arg1: memref<8x128xf32, #tpu.memory_space<vmem>>, %arg2: memref<8x128xf32, #tpu.memory_space<vmem>>) attributes {dimension_semantics = [#tpu.dimension_semantics<arbitrary>], iteration_bounds = array<i64: 2>, scalar_prefetch = 0 : i64, scratch_operands = 0 : i64, tpu.core_type = #tpu.core_type<tc>, window_params = [{pipeline_mode = #tpu.pipeline_mode<synchronous>, transform_indices = @transform_0, window_bounds = array<i64: 8, 128>}, {transform_indices = @transform_1, window_bounds = array<i64: 8, 128>}]} {
    %c0 = arith.constant 0 : index
    %c0_0 = arith.constant 0 : index
    %0 = vector.load %arg1[%c0, %c0_0] : memref<8x128xf32, #tpu.memory_space<vmem>>, vector<8x128xf32>
    %cst = arith.constant 1.000000e+00 : f32
    %1 = vector.broadcast %cst : f32 to vector<8x128xf32>
    %2 = arith.addf %0, %1 : vector<8x128xf32>
    %c0_1 = arith.constant 0 : index
    %c0_2 = arith.constant 0 : index
    %3 = vector.load %arg2[%c0_1, %c0_2] : memref<8x128xf32, #tpu.memory_space<vmem>>, vector<8x128xf32>
    tpu.vector_store %arg2[%c0_1, %c0_2], %2 {strides = array<i32>} : memref<8x128xf32, #tpu.memory_space<vmem>>, vector<8x128xf32>,
    return
  }
  func.func @transform_0(%arg0: i32) -> (i32, i32) {
    %c0_i32 = arith.constant 0 : i32
    %c0_i32_0 = arith.constant 0 : i32
    %c0_i32_1 = arith.constant 0 : i32
    return %c0_i32, %c0_i32_0 : i32, i32
  }
  func.func @transform_1(%arg0: i32) -> (i32, i32) {
    %c0_i32 = arith.constant 0 : i32
    %c0_i32_0 = arith.constant 0 : i32
    return %arg0, %c0_i32 : i32, i32
  }
}

module attributes {stable_mosaic.version = 11 : i64} {
  func.func @siglip_mlp_kernel(%arg0: i32, %arg1: memref<256x256xf32, #tpu.memory_space<vmem>>, %arg2: memref<256x768xbf16, #tpu.memory_space<vmem>>, %arg3: memref<1x768xf32, #tpu.memory_space<vmem>>, %arg4: memref<768x256xbf16, #tpu.memory_space<vmem>>, %arg5: memref<1x256xf32, #tpu.memory_space<vmem>>, %arg6: memref<256x256xf32, #tpu.memory_space<vmem>>, %arg7: memref<256x256xf32, #tpu.memory_space<vmem>>) attributes {dimension_semantics = [#tpu.dimension_semantics<parallel>], iteration_bounds = array<i64: 6>, scalar_prefetch = 0 : i64, scratch_operands = 1 : i64, tpu.core_type = #tpu.core_type<tc>, window_params = [{transform_indices = @transform_0, window_bounds = array<i64: 256, 256>}, {pipeline_mode = #tpu.pipeline_mode<synchronous>, transform_indices = @transform_1, window_bounds = array<i64: 256, 768>}, {pipeline_mode = #tpu.pipeline_mode<synchronous>, transform_indices = @transform_2, window_bounds = array<i64: 1, 768>}, {pipeline_mode = #tpu.pipeline_mode<synchronous>, transform_indices = @transform_3, window_bounds = array<i64: 768, 256>}, {pipeline_mode = #tpu.pipeline_mode<synchronous>, transform_indices = @transform_4, window_bounds = array<i64: 1, 256>}, {transform_indices = @transform_5, window_bounds = array<i64: 256, 256>}]} {
    %c0 = arith.constant 0 : index
    %c0_0 = arith.constant 0 : index
    %0 = vector.load %arg1[%c0, %c0_0] : memref<256x256xf32, #tpu.memory_space<vmem>>, vector<256x256xf32>
    %1 = arith.truncf %0 : vector<256x256xf32> to vector<256x256xbf16>
    %c0_1 = arith.constant 0 : index
    %c0_2 = arith.constant 0 : index
    %2 = vector.load %arg2[%c0_1, %c0_2] : memref<256x768xbf16, #tpu.memory_space<vmem>>, vector<256x512xbf16>
    %c0_3 = arith.constant 0 : index
    %c0_4 = arith.constant 0 : index
    %3 = vector.load %arg3[%c0_3, %c0_4] : memref<1x768xf32, #tpu.memory_space<vmem>>, vector<1x512xf32>
    %c0_5 = arith.constant 0 : index
    %c0_6 = arith.constant 0 : index
    %4 = vector.load %arg4[%c0_5, %c0_6] : memref<768x256xbf16, #tpu.memory_space<vmem>>, vector<512x256xbf16>
    %cst = arith.constant dense<0.000000e+00> : vector<256x512xf32>
    %5 = tpu.matmul %1, %2, %cst {dimension_numbers = #tpu.dot_dimension_numbers<[1], [0], [0], [1], [0, 0, 1, 1], [], []>} : vector<256x256xbf16>, vector<256x512xbf16>, vector<256x512xf32> -> vector<256x512xf32>
    %6 = vector.broadcast %3 : vector<1x512xf32> to vector<256x512xf32>
    %7 = arith.addf %5, %6 : vector<256x512xf32>
    %cst_7 = arith.constant 5.000000e-01 : f32
    %8 = vector.broadcast %cst_7 : f32 to vector<256x512xf32>
    %9 = arith.mulf %8, %7 : vector<256x512xf32>
    %10 = arith.mulf %7, %7 : vector<256x512xf32>
    %11 = arith.mulf %10, %7 : vector<256x512xf32>
    %cst_8 = arith.constant 4.471500e-02 : f32
    %12 = vector.broadcast %cst_8 : f32 to vector<256x512xf32>
    %13 = arith.mulf %12, %11 : vector<256x512xf32>
    %14 = arith.addf %7, %13 : vector<256x512xf32>
    %cst_9 = arith.constant 0.797884583 : f32
    %15 = vector.broadcast %cst_9 : f32 to vector<256x512xf32>
    %16 = arith.mulf %15, %14 : vector<256x512xf32>
    %17 = math.tanh %16 : vector<256x512xf32>
    %cst_10 = arith.constant 1.000000e+00 : f32
    %18 = vector.broadcast %cst_10 : f32 to vector<256x512xf32>
    %19 = arith.addf %18, %17 : vector<256x512xf32>
    %20 = arith.mulf %9, %19 : vector<256x512xf32>
    %21 = arith.truncf %20 : vector<256x512xf32> to vector<256x512xbf16>
    %cst_11 = arith.constant dense<0.000000e+00> : vector<256x256xf32>
    %22 = tpu.matmul %21, %4, %cst_11 {dimension_numbers = #tpu.dot_dimension_numbers<[1], [0], [0], [1], [0, 0, 1, 1], [], []>} : vector<256x512xbf16>, vector<512x256xbf16>, vector<256x256xf32> -> vector<256x256xf32>
    %c0_12 = arith.constant 0 : index
    %c0_13 = arith.constant 0 : index
    %23 = vector.load %arg7[%c0_12, %c0_13] : memref<256x256xf32, #tpu.memory_space<vmem>>, vector<256x256xf32>
    tpu.vector_store %arg7[%c0_12, %c0_13], %22 {strides = array<i32>} : memref<256x256xf32, #tpu.memory_space<vmem>>, vector<256x256xf32>,
    %c0_14 = arith.constant 0 : index
    %c512 = arith.constant 512 : index
    %24 = vector.load %arg2[%c0_14, %c512] : memref<256x768xbf16, #tpu.memory_space<vmem>>, vector<256x256xbf16>
    %c0_15 = arith.constant 0 : index
    %c512_16 = arith.constant 512 : index
    %25 = vector.load %arg3[%c0_15, %c512_16] : memref<1x768xf32, #tpu.memory_space<vmem>>, vector<1x256xf32>
    %c512_17 = arith.constant 512 : index
    %c0_18 = arith.constant 0 : index
    %26 = vector.load %arg4[%c512_17, %c0_18] : memref<768x256xbf16, #tpu.memory_space<vmem>>, vector<256x256xbf16>
    %cst_19 = arith.constant dense<0.000000e+00> : vector<256x256xf32>
    %27 = tpu.matmul %1, %24, %cst_19 {dimension_numbers = #tpu.dot_dimension_numbers<[1], [0], [0], [1], [0, 0, 1, 1], [], []>} : vector<256x256xbf16>, vector<256x256xbf16>, vector<256x256xf32> -> vector<256x256xf32>
    %28 = vector.broadcast %25 : vector<1x256xf32> to vector<256x256xf32>
    %29 = arith.addf %27, %28 : vector<256x256xf32>
    %cst_20 = arith.constant 5.000000e-01 : f32
    %30 = vector.broadcast %cst_20 : f32 to vector<256x256xf32>
    %31 = arith.mulf %30, %29 : vector<256x256xf32>
    %32 = arith.mulf %29, %29 : vector<256x256xf32>
    %33 = arith.mulf %32, %29 : vector<256x256xf32>
    %cst_21 = arith.constant 4.471500e-02 : f32
    %34 = vector.broadcast %cst_21 : f32 to vector<256x256xf32>
    %35 = arith.mulf %34, %33 : vector<256x256xf32>
    %36 = arith.addf %29, %35 : vector<256x256xf32>
    %cst_22 = arith.constant 0.797884583 : f32
    %37 = vector.broadcast %cst_22 : f32 to vector<256x256xf32>
    %38 = arith.mulf %37, %36 : vector<256x256xf32>
    %39 = math.tanh %38 : vector<256x256xf32>
    %cst_23 = arith.constant 1.000000e+00 : f32
    %40 = vector.broadcast %cst_23 : f32 to vector<256x256xf32>
    %41 = arith.addf %40, %39 : vector<256x256xf32>
    %42 = arith.mulf %31, %41 : vector<256x256xf32>
    %43 = arith.truncf %42 : vector<256x256xf32> to vector<256x256xbf16>
    %cst_24 = arith.constant dense<0.000000e+00> : vector<256x256xf32>
    %44 = tpu.matmul %43, %26, %cst_24 {dimension_numbers = #tpu.dot_dimension_numbers<[1], [0], [0], [1], [0, 0, 1, 1], [], []>} : vector<256x256xbf16>, vector<256x256xbf16>, vector<256x256xf32> -> vector<256x256xf32>
    %c0_25 = arith.constant 0 : index
    %c0_26 = arith.constant 0 : index
    %45 = vector.load %arg7[%c0_25, %c0_26] : memref<256x256xf32, #tpu.memory_space<vmem>>, vector<256x256xf32>
    %46 = arith.addf %45, %44 : vector<256x256xf32>
    %c0_27 = arith.constant 0 : index
    %c0_28 = arith.constant 0 : index
    %47 = vector.load %arg7[%c0_27, %c0_28] : memref<256x256xf32, #tpu.memory_space<vmem>>, vector<256x256xf32>
    tpu.vector_store %arg7[%c0_27, %c0_28], %46 {strides = array<i32>} : memref<256x256xf32, #tpu.memory_space<vmem>>, vector<256x256xf32>,
    %c0_29 = arith.constant 0 : index
    %c0_30 = arith.constant 0 : index
    %48 = vector.load %arg7[%c0_29, %c0_30] : memref<256x256xf32, #tpu.memory_space<vmem>>, vector<256x256xf32>
    %c0_31 = arith.constant 0 : index
    %c0_32 = arith.constant 0 : index
    %49 = vector.load %arg5[%c0_31, %c0_32] : memref<1x256xf32, #tpu.memory_space<vmem>>, vector<1x256xf32>
    %50 = vector.broadcast %49 : vector<1x256xf32> to vector<256x256xf32>
    %51 = arith.addf %48, %50 : vector<256x256xf32>
    %c0_33 = arith.constant 0 : index
    %c0_34 = arith.constant 0 : index
    %52 = vector.load %arg6[%c0_33, %c0_34] : memref<256x256xf32, #tpu.memory_space<vmem>>, vector<256x256xf32>
    tpu.vector_store %arg6[%c0_33, %c0_34], %51 {strides = array<i32>} : memref<256x256xf32, #tpu.memory_space<vmem>>, vector<256x256xf32>,
    return
  }
  func.func @transform_0(%arg0: i32) -> (i32, i32) {
    %c0_i32 = arith.constant 0 : i32
    %c0_i32_0 = arith.constant 0 : i32
    return %arg0, %c0_i32 : i32, i32
  }
  func.func @transform_1(%arg0: i32) -> (i32, i32) {
    %c0_i32 = arith.constant 0 : i32
    %c0_i32_0 = arith.constant 0 : i32
    %c0_i32_1 = arith.constant 0 : i32
    return %c0_i32, %c0_i32_0 : i32, i32
  }
  func.func @transform_2(%arg0: i32) -> (i32, i32) {
    %c0_i32 = arith.constant 0 : i32
    %c0_i32_0 = arith.constant 0 : i32
    %c0_i32_1 = arith.constant 0 : i32
    return %c0_i32, %c0_i32_0 : i32, i32
  }
  func.func @transform_3(%arg0: i32) -> (i32, i32) {
    %c0_i32 = arith.constant 0 : i32
    %c0_i32_0 = arith.constant 0 : i32
    %c0_i32_1 = arith.constant 0 : i32
    return %c0_i32, %c0_i32_0 : i32, i32
  }
  func.func @transform_4(%arg0: i32) -> (i32, i32) {
    %c0_i32 = arith.constant 0 : i32
    %c0_i32_0 = arith.constant 0 : i32
    %c0_i32_1 = arith.constant 0 : i32
    return %c0_i32, %c0_i32_0 : i32, i32
  }
  func.func @transform_5(%arg0: i32) -> (i32, i32) {
    %c0_i32 = arith.constant 0 : i32
    %c0_i32_0 = arith.constant 0 : i32
    return %arg0, %c0_i32 : i32, i32
  }
}

</mosaic_0001>

<bundles_post_ra>
// kernel: tpu_custom_call.1
= control target key start
LH: loop header
LB: loop body
LE: loop exit
PB: predicated region body
PF: predicated region fallthrough
CT: control target
= control target key end

     0   :  { %6 = vsyncpa [#allocation3], 0  ;;  %s482_s0 = inlined_call_operand.hbm [shape: f32[8,128], index: 0, kind: input, shape index: {}]   ;;  %s483_s1 = inlined_call_operand.hbm [shape: f32[16,128], index: 1, kind: output, shape index: {}]  }
   0x1   :  { %7 = vsyncpa [#allocation4], 0 }
   0x2   :  { %9 = vsyncpa [#allocation4 + $0x1], 0  ;;  %s352_s6 = smov 0   ;;  %s354_s7 = smov 0  }
   0x3   :  { %s356_s8 = smov 0   ;;  %s358_s9 = smov 0  }
   0x4 LB: > { %s373_s10 = sadd.s32 4294967295, %s338_s9   ;;  %s184_s11 = sadd.s32 4294967294, %s338_s9   ;;  %s338_s9 = sphi %s358_s9, %s499_s9   ;;  %s334_s8 = sphi %s356_s8, %s498_s8   ;;  %s330_s7 = sphi %s354_s7, %s497_s7   ;;  %s326_s6 = sphi %s352_s6, %s496_s6  }
   0x5   : > { %s377_s12 = sadd.s32 1, %s338_s9   ;;  %s43_s13 = sadd.s32 1, %s334_s8 }
   0x6   : > { %s40_s14 = ssub.s32 %s338_s9, %s377_s12  ;;  %p53_p0 = scmp.ne.s32.totalorder %s334_s8, %s330_s7 }
   0x7   : > { %p41_p1 = scmp.eq.s32.totalorder %s40_s14, 0  ;;  %p54_p2 = scmp.eq.s32.totalorder %s373_s10, 1 }
   0x8   : > { %p59_p3 = scmp.ne.s32.totalorder %s330_s7, %s326_s6  ;;  %p60_p4 = scmp.eq.s32.totalorder %s184_s11, 1 }
   0x9   : > { %s388_s15 = scalar_select %p41_p1, %s334_s8, %s43_s13  }
   0xa   : > { %p390_p5 = por %p54_p2, %p53_p0  ;;  %p394_p6 = por %p60_p4, %p59_p3 }
   0xb   : > { %p185_p7 = scmp.ge.s32.totalorder %s338_s9, 1  ;;  %p67_p8 = scmp.lt.s32.totalorder %s338_s9, 3 }
   0xc   : > { %s487_s16 = scalar_select %p390_p5, 1, 0 }
   0xd   : > { %s488_s17 = scalar_select %p394_p6, 1, 0 }
   0xe   : > { %p484_p9 = scmp.eq.s32.totalorder %s373_s10, 0  ;;  %p401_p10 = pnand %p185_p7, %p67_p8 }
   0xf   : > { %s340_s19 = smov [#allocation2]   ;;  %s244_s24 = scalar_lea.hbm %s482_s0, 128 }
  0x10   : > { %s489_s18 = scalar_select %p401_p10, 1, 0 }
  0x11   : > { %s80_s20 = sshll.u32 %s340_s19, 4  ;;  %p200_p11 = pneg %p401_p10  ;;  %s81_s20 = int_to_ptr.vmem [resolvable:$true] %s80_s20 }
  0x12   : > { %p245_p13 = scmp.ne.s32.totalorder %s482_s0, %s244_s24  ;;  %p251_p3 = scmp.lt.u32.totalorder %s244_s24, %s482_s0 }
  0x13   : > { %p409_p12 = pnand %p484_p9, %p200_p11 }
  0x15   : > { %p246_p0 = pneg %p409_p12 }
  0x17   : > { %p247_p1 = pnand %p246_p0, %p245_p13 }
  0x19   : > { %p248_p2 = pneg %p247_p1 }
  0x1b   : > { %p253_p4 = pnand %p251_p3, %p248_p2 }
  0x1d   : > { %256 = shalt.err (!%p253_p4)
}
  0x1e   : > { %s257_s29 = scalar_lea.vmem %s81_s20, 128  ;;  %p265_p9 = scmp.lt.s32.totalorder %s81_s20, %s81_s20 }
  0x1f   : > { %p258_p7 = scmp.ne.s32.totalorder %s81_s20, %s257_s29  ;;  %p266_p6 = scmp.lt.s32.totalorder %s257_s29, %s257_s29 }
  0x21   : > { %p260_p8 = pnand %p258_p7, %p246_p0  ;;  %p267_p5 = por %p266_p6, %p265_p9 }
  0x23   : > { %p261_p11 = pneg %p260_p8 }
  0x25   : > { %p268_p10 = pnand %p267_p5, %p261_p11 }
  0x27   : > { %271 = shalt.err (!%p268_p10)
}
  0x28   : > { %203 = dma.hbm_to_vmem [thread:$0]  (!%p409_p12), %s482_s0, 128, %s81_s20, [#allocation3]  }
  0x29   : > { %p491_p13 = scmp.ne.s32.totalorder %s489_s18, 0 }
  0x2a   : > { %p492_p1 = scmp.eq.s32.totalorder (!%p491_p13), %s373_s10, 0 }
  0x2b   : > { %93 = sbr.rel (%p491_p13) target bundleno = 77 (0x4d), region = 24 }
  0x32   : > { %317 = dma.done.wait (%p492_p1), [#allocation3], 128   ;;  %p493_p0 = pmov %p492_p1 }
  0x33   : > { %s105_s3 = sand.u32 1, %s330_s7   ;;  %s191_s13 = sshll.u32 %s373_s10, 7  ;;  %v108_v0 = vld [vmem:[#allocation2] sm:$0xff] }
  0x34   : > { %319 = vsyncadd (%p493_p0), [#allocation3], 4294967168  ;;  %s189_s4 = sshll.u32 %s105_s3, 3  ;;  %v109_v1 = vadd.f32 1.0, %v108_v0  ;;  %s442_s19 = scalar_lea.hbm %s483_s1, %s191_s13 }
  0x35   : > { %s107_s5 = scalar_lea.vmem [#allocation5], %s189_s4  ;;  %s112_s20 = scalar_lea.sflag [#allocation4], %s105_s3 }
  0x36   : > { %s125_s11 = sshll.u32 %s107_s5, 4  ;;  %110 = vst [vmem:[%s107_s5] sm:$0xff] %v109_v1  ;;  %p494_p6 = scmp.ne.s32.totalorder %s487_s16, 0  ;;  %s437_s11 = int_to_ptr.vmem [resolvable:$true] %s125_s11 }
  0x37   : > { %s272_s21 = scalar_lea.vmem %s437_s11, 128  ;;  %s341_s10 = smov [#allocation5]  }
  0x38   : > { %p273_p5 = scmp.ne.s32.totalorder %s437_s11, %s272_s21  ;;  %s276_s22 = sshll.u32 %s341_s10, 4  ;;  %s277_s22 = int_to_ptr.vmem [resolvable:$false] %s276_s22 }
  0x39   : > { %s278_s23 = scalar_lea.vmem %s277_s22, 256  ;;  %p279_p12 = scmp.lt.s32.totalorder %s437_s11, %s277_s22 }
  0x3a   : > { %p274_p9 = pnand %p273_p5, %p494_p6  ;;  %p280_p2 = scmp.lt.s32.totalorder %s278_s23, %s272_s21 }
  0x3c   : > { %p275_p10 = pneg %p274_p9  ;;  %p281_p3 = por %p280_p2, %p279_p12 }
  0x3e   : > { %p282_p4 = pnand %p281_p3, %p275_p10 }
  0x40   : > { %285 = shalt.err (!%p282_p4)
}
  0x41   : > { %s286_s24 = scalar_lea.hbm %s442_s19, 128  ;;  %s290_s27 = scalar_lea.hbm %s483_s1, 256 }
  0x42   : > { %p287_p7 = scmp.ne.s32.totalorder %s442_s19, %s286_s24  ;;  %p291_p13 = scmp.lt.u32.totalorder %s442_s19, %s483_s1 }
  0x43   : > { %p292_p1 = scmp.lt.u32.totalorder %s290_s27, %s286_s24  ;;  %p294_p5 = scmp.lt.u32.totalorder %s286_s24, %s442_s19 }
  0x44   : > { %p288_p8 = pnand %p287_p7, %p494_p6 }
  0x45   : > { %p293_p0 = por %p292_p1, %p291_p13 }
  0x46   : > { %p289_p11 = pneg %p288_p8 }
  0x47   : > { %p295_p9 = por %p294_p5, %p293_p0 }
  0x49   : > { %p296_p10 = pnand %p295_p9, %p289_p11 }
  0x4b   : > { %299 = shalt.err (!%p296_p10)
}
  0x4c   : > { %198 = dma.vmem_to_hbm [thread:$0]  (%p494_p6), %s437_s11, 128, %s442_s19, %s112_s20  }
  0x4d PF: > { %p210_p12 = scmp.ge.s32.totalorder %s338_s9, 2  ;;  %s137_s30 = sand.u32 1, %s326_s6  }
  0x4e   : > { %p495_p2 = scmp.ne.s32.totalorder %s488_s17, 0  ;;  %s138_s2 = scalar_lea.sflag [#allocation4], %s137_s30 }
  0x50   : > { %p205_p3 = pnand %p210_p12, %p495_p2 }
  0x52   : > { %321 = dma.done.wait (!%p205_p3), %s138_s2, 128  }
  0x53   : > { %323 = vsyncadd (!%p205_p3), %s138_s2, 4294967168  ;;  %p12_p4 = scmp.ge.s32.totalorder %s377_s12, 4   ;;  %s496_s6 = smov %s330_s7 }
  0x54   : > { %s497_s7 = smov %s334_s8  ;;  %s498_s8 = smov %s388_s15 }
  0x55   : > { %s499_s9 = smov %s377_s12  ;;  %14 = sbr.rel (!%p12_p4) target bundleno = 4 (0x4), region = 61 }
  0x5c   :  { %143 = vsyncpa [#allocation3], 1 }
  0x5d   :  { %145 = vsyncpa [#allocation3 + $0x1], 1 }
  0x5e   :  { %146 = vsyncpa [#allocation4], 1 }
  0x5f   :  { %148 = vsyncpa [#allocation4 + $0x1], 1 }

// kernel: tpu_custom_call.1
= control target key start
LH: loop header
LB: loop body
LE: loop exit
PB: predicated region body
PF: predicated region fallthrough
CT: control target
= control target key end

     0   :  { %s9710_s0 = inlined_call_operand.hbm [shape: f32[1458,256], index: 0, kind: input, shape index: {}]   ;;  %s9711_s1 = inlined_call_operand.hbm [shape: bf16[256,768], index: 1, kind: input, shape index: {}]   ;;  %s9712_s2 = inlined_call_operand.hbm [shape: f32[1,768], index: 2, kind: input, shape index: {}]   ;;  %s9713_s3 = inlined_call_operand.hbm [shape: bf16[768,256], index: 3, kind: input, shape index: {}]   ;;  %s9714_s4 = inlined_call_operand.hbm [shape: f32[1,256], index: 4, kind: input, shape index: {}]   ;;  %s9715_s5 = inlined_call_operand.hbm [shape: f32[1458,256], index: 5, kind: output, shape index: {}]  }
   0x1   :  { %9744 = sst [smem:[#allocation48_spill]] %s9711_s1 }
   0x2   :  { %10 = vsyncpa [#allocation4], 0 }
   0x3   :  { %12 = vsyncpa [#allocation4 + $0x1], 0 }
   0x4   :  { %13 = vsyncpa [#allocation7], 0 }
   0x5   :  { %14 = vsyncpa [#allocation10], 0 }
   0x6   :  { %15 = vsyncpa [#allocation5], 0 }
   0x7   :  { %17 = vsyncpa [#allocation5 + $0x1], 0  ;;  %s6555_s18 = smov 0   ;;  %s6557_s19 = smov 0  }
   0x8   :  { %s6559_s20 = smov 0   ;;  %s6561_s21 = smov 0  }
   0x9 LB: > { %9745 = sst [smem:[#allocation17_spill]] %s6497_s18  ;;  %s6576_s22 = sadd.s32 4294967295, %s6509_s21   ;;  %s6509_s21 = sphi %s6561_s21, %s9904_s21   ;;  %s6505_s20 = sphi %s6559_s20, %s9908_s20   ;;  %s6501_s19 = sphi %s6557_s19, %s9907_s19   ;;  %s6497_s18 = sphi %s6555_s18, %s9906_s18  }
   0xa   : > { %s5174_s23 = sadd.s32 4294967294, %s6509_s21   ;;  %s6580_s24 = sadd.s32 1, %s6509_s21  }
   0xb   : > { %9746 = sst [smem:[#allocation18_spill]] %s6580_s24  ;;  %s30_s25 = sadd.s32 1, %s6505_s20 }
   0xc   : > { %s27_s26 = ssub.s32 %s6509_s21, %s6580_s24  ;;  %p37_p0 = scmp.ne.s32.totalorder %s6505_s20, %s6501_s19 }
   0xd   : > { %p28_p1 = scmp.eq.s32.totalorder %s27_s26, 0  ;;  %p38_p2 = scmp.eq.s32.totalorder %s6509_s21, 0 }
   0xe   : > { %p43_p3 = scmp.ne.s32.totalorder %s6501_s19, %s6497_s18  ;;  %p9716_p4 = scmp.eq.s32.totalorder %s6576_s22, 0 }
   0xf   : > { %s6592_s27 = scalar_select %p28_p1, %s6505_s20, %s30_s25  }
  0x10   : > { %p6594_p5 = por %p38_p2, %p37_p0  ;;  %p6600_p6 = por %p9716_p4, %p43_p3 }
  0x11   : > { %9747 = sst [smem:[#allocation19_spill]] %s6592_s27  ;;  %p151_p7 = scmp.eq.s32.totalorder %s6576_s22, 5 }
  0x12   : > { %s9748_s28 = scalar_select %p6594_p5, 1, 0 }
  0x13   : > { %s9749_s29 = scalar_select %p6600_p6, 1, 0 }
  0x14   : > { %p157_p8 = scmp.eq.s32.totalorder %s5174_s23, 5  ;;  %p5175_p9 = scmp.ge.s32.totalorder %s6509_s21, 1 }
  0x15   : > { %p164_p10 = scmp.lt.s32.totalorder %s6509_s21, 7  ;;  %p6607_p11 = por %p151_p7, %p37_p0 }
  0x16   : > { %p6611_p12 = por %p157_p8, %p43_p3  ;;  %s6511_s8 = smov [#allocation6]  }
  0x17   : > { %s9750_s30 = scalar_select %p6607_p11, 1, 0 }
  0x18   : > { %s9751_s6 = scalar_select %p6611_p12, 1, 0 }
  0x19   : > { %p6615_p13 = pnand %p5175_p9, %p164_p10  ;;  %s176_s9 = sshll.u32 %s6511_s8, 4  ;;  %s177_s9 = int_to_ptr.vmem [resolvable:$true] %s176_s9 }
  0x1a   : > { %9752 = sst [smem:[#allocation20_spill]] %s9751_s6  ;;  %s6512_s11 = smov [#allocation9]  }
  0x1b   : > { %s9753_s7 = scalar_select %p6615_p13, 1, 0 }
  0x1c   : > { %p5552_p1 = pneg %p6615_p13  ;;  %s200_s12 = sshll.u32 %s6512_s11, 4  ;;  %s6627_s12 = int_to_ptr.vmem [resolvable:$true] %s200_s12 }
  0x1d   : > { %s9755_s1 = sld [smem:[#allocation48_spill]] }
  0x1e   : > { %p6623_p2 = pnand %p5552_p1, %p9716_p4 }
  0x20   : > { %p6637_p3 = pneg %p6623_p2 }
  0x23   : > { %s6295_s15 = scalar_lea.hbm %s9755_s1, 12288 }
  0x24   : > { %p6296_p0 = scmp.ne.s32.totalorder %s9755_s1, %s6295_s15  ;;  %p6302_p9 = scmp.lt.u32.totalorder %s6295_s15, %s9755_s1 }
  0x26   : > { %p6298_p7 = pnand %p6637_p3, %p6296_p0 }
  0x28   : > { %p6299_p8 = pneg %p6298_p7 }
  0x2a   : > { %p6304_p10 = pnand %p6302_p9, %p6299_p8 }
  0x2c   : > { %6307 = shalt.err (!%p6304_p10)
}
  0x2d   : > { %s6308_s8 = scalar_lea.vmem %s177_s9, 12288  ;;  %p6316_p11 = scmp.lt.s32.totalorder %s177_s9, %s177_s9 }
  0x2e   : > { %p6309_p1 = scmp.ne.s32.totalorder %s177_s9, %s6308_s8  ;;  %p6317_p6 = scmp.lt.s32.totalorder %s6308_s8, %s6308_s8 }
  0x30   : > { %p6311_p4 = pnand %p6309_p1, %p6637_p3  ;;  %p6318_p13 = por %p6317_p6, %p6316_p11 }
  0x32   : > { %p6312_p12 = pneg %p6311_p4 }
  0x34   : > { %p6319_p5 = pnand %p6318_p13, %p6312_p12 }
  0x36   : > { %6322 = shalt.err (!%p6319_p5)
}
  0x37   : > { %s6513_s11 = smov 384   ;;  %s6514_s13 = smov 24  }
  0x38   : > { %5555 = dma.hbm_to_vmem [thread:$0]  (!%p6623_p2), %s9755_s1, 12288, %s177_s9, [#allocation7], %s6513_s11, %s6513_s11, %s6514_s13  }
  0x39   : > { %s6323_s25 = scalar_lea.hbm %s9713_s3, 12288 }
  0x3a   : > { %p6324_p4 = scmp.ne.s32.totalorder %s9713_s3, %s6323_s25  ;;  %p6330_p11 = scmp.lt.u32.totalorder %s6323_s25, %s9713_s3 }
  0x3c   : > { %p6326_p6 = pnand %p6324_p4, %p6637_p3 }
  0x3e   : > { %p6327_p5 = pneg %p6326_p6 }
  0x40   : > { %p6332_p12 = pnand %p6330_p11, %p6327_p5 }
  0x42   : > { %6335 = shalt.err (!%p6332_p12)
}
  0x43   : > { %s6336_s9 = scalar_lea.vmem %s6627_s12, 12288  ;;  %p6344_p8 = scmp.lt.s32.totalorder %s6627_s12, %s6627_s12 }
  0x44   : > { %p6337_p13 = scmp.ne.s32.totalorder %s6627_s12, %s6336_s9  ;;  %p6345_p9 = scmp.lt.s32.totalorder %s6336_s9, %s6336_s9 }
  0x46   : > { %p6339_p0 = pnand %p6337_p13, %p6637_p3  ;;  %p6346_p10 = por %p6345_p9, %p6344_p8 }
  0x48   : > { %p6340_p7 = pneg %p6339_p0 }
  0x4a   : > { %p6347_p1 = pnand %p6346_p10, %p6340_p7 }
  0x4c   : > { %6350 = shalt.err (!%p6347_p1)
}
  0x4d   : > { %s6515_s27 = smov 128   ;;  %s6516_s24 = smov 8  }
  0x4e   : > { %5561 = dma.hbm_to_vmem [thread:$0]  (!%p6623_p2), %s9713_s3, 12288, %s6627_s12, [#allocation10], %s6515_s27, %s6515_s27, %s6516_s24  }
  0x4f   : > { %s6517_s14 = smov [#allocation8]   ;;  %s6518_s16 = smov [#allocation11]  }
  0x50   : > { %s190_s15 = sshll.u32 %s6517_s14, 4  ;;  %s214_s17 = sshll.u32 %s6518_s16, 4  ;;  %s191_s15 = int_to_ptr.vmem [resolvable:$true] %s190_s15  ;;  %s215_s17 = int_to_ptr.vmem [resolvable:$true] %s214_s17 }
  0x51   : > { %s6351_s8 = scalar_lea.hbm %s9712_s2, 96 }
  0x52   : > { %p6352_p4 = scmp.ne.s32.totalorder %s9712_s2, %s6351_s8  ;;  %p6358_p11 = scmp.lt.u32.totalorder %s6351_s8, %s9712_s2 }
  0x54   : > { %p6354_p6 = pnand %p6352_p4, %p6637_p3 }
  0x56   : > { %p6355_p5 = pneg %p6354_p6 }
  0x58   : > { %p6360_p12 = pnand %p6358_p11, %p6355_p5 }
  0x5a   : > { %6363 = shalt.err (!%p6360_p12)
}
  0x5b   : > { %s6364_s12 = scalar_lea.vmem %s191_s15, 96  ;;  %p6372_p8 = scmp.lt.s32.totalorder %s191_s15, %s191_s15 }
  0x5c   : > { %p6365_p13 = scmp.ne.s32.totalorder %s191_s15, %s6364_s12  ;;  %p6373_p9 = scmp.lt.s32.totalorder %s6364_s12, %s6364_s12 }
  0x5e   : > { %p6367_p0 = pnand %p6365_p13, %p6637_p3  ;;  %p6374_p10 = por %p6373_p9, %p6372_p8 }
  0x60   : > { %p6368_p7 = pneg %p6367_p0 }
  0x62   : > { %p6375_p1 = pnand %p6374_p10, %p6368_p7 }
  0x64   : > { %6378 = shalt.err (!%p6375_p1)
}
  0x65   : > { %5558 = dma.hbm_to_vmem [thread:$0]  (!%p6623_p2), %s9712_s2, 96, %s191_s15, [#allocation7]  }
  0x66   : > { %s6379_s24 = scalar_lea.hbm %s9714_s4, 32 }
  0x67   : > { %p6380_p4 = scmp.ne.s32.totalorder %s9714_s4, %s6379_s24  ;;  %p6386_p11 = scmp.lt.u32.totalorder %s6379_s24, %s9714_s4 }
  0x69   : > { %p6382_p6 = pnand %p6380_p4, %p6637_p3 }
  0x6b   : > { %p6383_p5 = pneg %p6382_p6 }
  0x6d   : > { %p6388_p12 = pnand %p6386_p11, %p6383_p5 }
  0x6f   : > { %6391 = shalt.err (!%p6388_p12)
}
  0x70   : > { %s6392_s25 = scalar_lea.vmem %s215_s17, 32  ;;  %p6400_p8 = scmp.lt.s32.totalorder %s215_s17, %s215_s17 }
  0x71   : > { %p6393_p13 = scmp.ne.s32.totalorder %s215_s17, %s6392_s25  ;;  %p6401_p9 = scmp.lt.s32.totalorder %s6392_s25, %s6392_s25 }
  0x73   : > { %p6395_p0 = pnand %p6393_p13, %p6637_p3  ;;  %p6402_p10 = por %p6401_p9, %p6400_p8 }
  0x75   : > { %p6396_p7 = pneg %p6395_p0 }
  0x77   : > { %p6403_p1 = pnand %p6402_p10, %p6396_p7 }
  0x79   : > { %6406 = shalt.err (!%p6403_p1)
}
  0x7a   : > { %5564 = dma.hbm_to_vmem [thread:$0]  (!%p6623_p2), %s9714_s4, 32, %s215_s17, [#allocation10]  }
  0x7b   : > { %p5180_p4 = scmp.ge.s32.totalorder %s6509_s21, 6 }
  0x7c   : > { %p9757_p6 = scmp.ne.s32.totalorder (!%p5180_p4), %s9748_s28, 0 }
  0x7d   : > { %221 = sbr.rel (%p5180_p4) target bundleno = 167 (0xa7), region = 32 }
  0x84   : > { %224 = sbr.rel (!%p9757_p6) target bundleno = 167 (0xa7), region = 36  ;;  %s225_s23 = sand.u32 (%p9757_p6), 1, %s6505_s20  }
  0x85   : > { %s5182_s8 = sshll.u32 (%p9757_p6), %s6509_s21, 5  ;;  %s5181_s9 = sshll.u32 (%p9757_p6), %s225_s23, 9 }
  0x86   : > { %s231_s12 = ssub.s32 (%p9757_p6), 183, %s5182_s8  ;;  %s6720_s27 = scalar_lea.sflag (%p9757_p6), [#allocation4], %s225_s23 }
  0x87   : > { %p232_p3 = scmp.lt.s32.totalorder (%p9757_p6), %s231_s12, 32  ;;  %s229_s17 = scalar_lea.vmem (%p9757_p6), [#allocation3], %s5181_s9 }
  0x8b   : > { %s9910_s12 = smov (!%p232_p3, %s231_s12), 32 }
  0x8c   : > { %s6717_s1 = sshll.u32 %s9910_s12, 8 }
  0x8d   : > { %s237_s10 = ssub.s32 8192, %s6717_s1 }
  0x8e   : > { %238 = vsyncadd %s6720_s27, %s237_s10  ;;  %p5185_p2 = scmp.ne.s32.totalorder %s6717_s1, 0  ;;  %s5402_s28 = sshll.u32 %s6509_s21, 13 }
  0x8f   : > { %s6728_s24 = scalar_lea.hbm %s9710_s0, %s5402_s28  ;;  %s244_s11 = sshll.u32 %s229_s17, 4  ;;  %s6730_s11 = int_to_ptr.vmem [resolvable:$true] %s244_s11 }
  0x90   : > { %s6407_s13 = scalar_lea.hbm %s6728_s24, %s6717_s1  ;;  %s6411_s25 = scalar_lea.hbm %s9710_s0, 46848 }
  0x91   : > { %p6408_p5 = scmp.ne.s32.totalorder %s6728_s24, %s6407_s13  ;;  %p6412_p13 = scmp.lt.u32.totalorder %s6728_s24, %s9710_s0 }
  0x92   : > { %p6413_p0 = scmp.lt.u32.totalorder %s6411_s25, %s6407_s13  ;;  %p6415_p8 = scmp.lt.u32.totalorder %s6407_s13, %s6728_s24 }
  0x93   : > { %p6409_p11 = pnand %p6408_p5, %p5185_p2 }
  0x94   : > { %p6414_p7 = por %p6413_p0, %p6412_p13 }
  0x95   : > { %p6410_p12 = pneg %p6409_p11 }
  0x96   : > { %p6416_p9 = por %p6415_p8, %p6414_p7 }
  0x98   : > { %p6417_p10 = pnand %p6416_p9, %p6410_p12 }
  0x9a   : > { %6420 = shalt.err (!%p6417_p10)
}
  0x9b   : > { %s6421_s23 = scalar_lea.vmem %s6730_s11, %s6717_s1  ;;  %s6519_s8 = smov [#allocation3]  }
  0x9c   : > { %p6422_p1 = scmp.ne.s32.totalorder %s6730_s11, %s6421_s23  ;;  %s6425_s9 = sshll.u32 %s6519_s8, 4  ;;  %s6426_s9 = int_to_ptr.vmem [resolvable:$false] %s6425_s9 }
  0x9d   : > { %s6427_s12 = scalar_lea.vmem %s6426_s9, 16384  ;;  %p6428_p3 = scmp.lt.s32.totalorder %s6730_s11, %s6426_s9 }
  0x9e   : > { %p6423_p4 = pnand %p6422_p1, %p5185_p2  ;;  %p6429_p5 = scmp.lt.s32.totalorder %s6427_s12, %s6421_s23 }
  0xa0   : > { %p6424_p6 = pneg %p6423_p4  ;;  %p6430_p11 = por %p6429_p5, %p6428_p3 }
  0xa2   : > { %p6431_p13 = pnand %p6430_p11, %p6424_p6 }
  0xa4   : > { %6434 = shalt.err (!%p6431_p13)
}
  0xa5   : > { %s6520_s10 = smov 256   ;;  %s6521_s17 = smov 16  }
  0xa6   : > { %250 = dma.hbm_to_vmem [thread:$0]  (%p5185_p2), %s6728_s24, %s6717_s1, %s6730_s11, %s6720_s27, %s6520_s10, %s6520_s10, %s6521_s17  }
  0xa7 PF: > { %p9758_p12 = scmp.ne.s32.totalorder %s9753_s7, 0 }
  0xa9   : > { %256 = sbr.rel (%p9758_p12) target bundleno = 1236 (0x4d4), region = 40 }
  0xb0   : > { %s6760_s28 = sand.u32 1, %s6501_s19   ;;  %p9759_p0 = scmp.ne.s32.totalorder %s9749_s29, 0 }
  0xb1   : > { %s5191_s18 = sshll.u32 %s6760_s28, 9  ;;  %s259_s6 = scalar_lea.sflag [#allocation4], %s6760_s28 }
  0xb2   : > { %s6766_s13 = scalar_lea.vmem [#allocation3], %s5191_s18 }
  0xb3   : > { %6480 = dma.done.wait (%p9759_p0), %s259_s6, 8192  }
  0xb4   : > { %6482 = vsyncadd (%p9759_p0), %s259_s6, 4294959104  ;;  %p9760_p2 = scmp.eq.s32.totalorder %s6576_s22, 0 }
  0xb6   : > { %6484 = dma.done.wait (%p9760_p2), [#allocation7], 12384   ;;  %p9761_p7 = pmov %p9760_p2 }
  0xb7   : > { %p9762_p8 = pmov %p9760_p2 }
  0xb8   : > { %6486 = vsyncadd (%p9761_p7), [#allocation7], 4294954912 }
  0xb9   : > { %6488 = dma.done.wait (%p9762_p8), [#allocation10], 12320   ;;  %p9763_p9 = pmov %p9760_p2 }
  0xba   : > { %v5622_v0 = vld [vmem:[#allocation6 + $0x4] ss:$24 sps:$4 sm:$0xff]   ;;  %v5624_v1 = vld [vmem:[#allocation6] ss:$24 sps:$4 sm:$0xff]   ;;  %v5625_v2 = vld [vmem:[#allocation6 + $0x34] ss:$24 sps:$4 sm:$0xff]  }
  0xbb   : > { %6490 = vsyncadd (%p9763_p9), [#allocation10], 4294954976  ;;  %883 = vmatprep.subr.bf16.mxu1 %v5622_v0  ;;  %v5627_v3 = vld [vmem:[#allocation6 + $0x30] ss:$24 sps:$4 sm:$0xff]   ;;  %v5628_v4 = vld [vmem:[#allocation6 + $0x64] ss:$24 sps:$4 sm:$0xff]  }
  0xbc   : > { %884 = vmatpush1.bf16.msra.mxu1 %v5624_v1  ;;  %v5630_v5 = vld [vmem:[#allocation6 + $0x60] ss:$24 sps:$4 sm:$0xff]   ;;  %v5631_v6 = vld [vmem:[#allocation6 + $0x94] ss:$24 sps:$4 sm:$0xff]   ;;  %v5633_v7 = vld [vmem:[#allocation6 + $0x90] ss:$24 sps:$4 sm:$0xff]  }
  0xbd   : > { %885 = vmatprep.subr.bf16.mxu1 %v5625_v2  ;;  %v5634_v8 = vld [vmem:[#allocation6 + $0xc4] ss:$24 sps:$4 sm:$0xff]   ;;  %v5636_v9 = vld [vmem:[#allocation6 + $0xc0] ss:$24 sps:$4 sm:$0xff]   ;;  %v5637_v10 = vld [vmem:[#allocation6 + $0xf4] ss:$24 sps:$4 sm:$0xff]  }
  0xbe   : > { %v5639_v11 = vld [vmem:[#allocation6 + $0xf0] ss:$24 sps:$4 sm:$0xff]   ;;  %v5640_v12 = vld [vmem:[#allocation6 + $0x124] ss:$24 sps:$4 sm:$0xff]   ;;  %v5642_v16 = vld [vmem:[#allocation6 + $0x120] ss:$24 sps:$4 sm:$0xff]  }
  0xbf   : > { %v318_v13 = vld [vmem:[%s6766_s13 + $0x8] sm:$0xff]  ;;  %v320_v14 = vld [vmem:[%s6766_s13 + $0x18] sm:$0xff]  ;;  %v317_v35 = vld [vmem:[%s6766_s13] sm:$0xff]  ;;  %s9520_s29 = scalar_lea.vmem [#allocation12], %s5191_s18  ;;  %s5042_s7 = scalar_lea.sflag [#allocation5], %s6760_s28 }
  0xc0   : > { %886 = vmatpush1.bf16.msra.mxu1 %v5627_v3  ;;  %v6782_v15 = vpack.c.bf16 %v320_v14, %v318_v13  ;;  %v5643_v17 = vld [vmem:[#allocation6 + $0x154] ss:$24 sps:$4 sm:$0xff]   ;;  %v5645_v18 = vld [vmem:[#allocation6 + $0x150] ss:$24 sps:$4 sm:$0xff]   ;;  %v5646_v19 = vld [vmem:[#allocation6 + $0x184] ss:$24 sps:$4 sm:$0xff]  }
  0xc1   : > { %887 = vmatprep.subr.bf16.mxu1 %v5628_v4  ;;  %v5648_v20 = vld [vmem:[#allocation6 + $0x180] ss:$24 sps:$4 sm:$0xff]   ;;  %v5649_v21 = vld [vmem:[#allocation6 + $0x1b4] ss:$24 sps:$4 sm:$0xff]   ;;  %v5651_v22 = vld [vmem:[#allocation6 + $0x1b0] ss:$24 sps:$4 sm:$0xff]  }
  0xc2   : > { %915 = vmatprep.mubr.bf16.mxu1 %v6782_v15  ;;  %v5652_v23 = vld [vmem:[#allocation6 + $0x1e4] ss:$24 sps:$4 sm:$0xff]   ;;  %v5654_v24 = vld [vmem:[#allocation6 + $0x1e0] ss:$24 sps:$4 sm:$0xff]   ;;  %v5655_v25 = vld [vmem:[#allocation6 + $0x214] ss:$24 sps:$4 sm:$0xff]  }
  0xc3   : > { %v5657_v26 = vld [vmem:[#allocation6 + $0x210] ss:$24 sps:$4 sm:$0xff]   ;;  %v5658_v27 = vld [vmem:[#allocation6 + $0x244] ss:$24 sps:$4 sm:$0xff]   ;;  %v5660_v28 = vld [vmem:[#allocation6 + $0x240] ss:$24 sps:$4 sm:$0xff]  }
  0xc4   : > { %888 = vmatpush1.bf16.msra.mxu1 %v5630_v5  ;;  %v5661_v29 = vld [vmem:[#allocation6 + $0x274] ss:$24 sps:$4 sm:$0xff]   ;;  %v5663_v30 = vld [vmem:[#allocation6 + $0x270] ss:$24 sps:$4 sm:$0xff]   ;;  %v5664_v31 = vld [vmem:[#allocation6 + $0x2a4] ss:$24 sps:$4 sm:$0xff]  }
  0xc5   : > { %889 = vmatprep.subr.bf16.mxu1 %v5631_v6  ;;  %v5666_v32 = vld [vmem:[#allocation6 + $0x2a0] ss:$24 sps:$4 sm:$0xff]   ;;  %v5667_v33 = vld [vmem:[#allocation6 + $0x2d4] ss:$24 sps:$4 sm:$0xff]   ;;  %v5669_v34 = vld [vmem:[#allocation6 + $0x2d0] ss:$24 sps:$4 sm:$0xff]  }
  0xc6   : > { %v319_v36 = vld [vmem:[%s6766_s13 + $0x10] sm:$0xff]  ;;  %v5672_v37 = vld [vmem:[#allocation6 + $0xc] ss:$24 sps:$4 sm:$0xff]   ;;  %v324_v39 = vld [vmem:[%s6766_s13 + $0x38] sm:$0xff]  ;;  %p9900_p10 = scmp.ne.s32.totalorder %s9750_s30, 0 }
  0xc7   : > { %v322_v38 = vld [vmem:[%s6766_s13 + $0x28] sm:$0xff]  ;;  %v6789_v40 = vpack.c.bf16 %v319_v36, %v317_v35  ;;  %v5675_v43 = vld [vmem:[#allocation6 + $0x3c] ss:$24 sps:$4 sm:$0xff]   ;;  %v321_v44 = vld [vmem:[%s6766_s13 + $0x20] sm:$0xff]  ;;  %s5390_s1 = sshll.u32 (%p9900_p10), %s6576_s22, 5 }
  0xc8   : > { %890 = vmatpush1.bf16.msra.mxu1 %v5633_v7  ;;  %v5670_v41 = vld [vmem:[#allocation6 + $0x8] ss:$24 sps:$4 sm:$0xff]   ;;  %v6791_v42 = vpack.c.bf16 %v324_v39, %v322_v38  ;;  %v323_v45 = vld [vmem:[%s6766_s13 + $0x30] sm:$0xff]  ;;  %v328_v48 = vld [vmem:[%s6766_s13 + $0x58] sm:$0xff]  ;;  %s5050_s27 = ssub.s32 (%p9900_p10), 183, %s5390_s1 }
  0xc9   : > { %891 = vmatprep.subr.bf16.mxu1 %v5634_v8  ;;  %v5673_v46 = vld [vmem:[#allocation6 + $0x38] ss:$24 sps:$4 sm:$0xff]   ;;  %v326_v47 = vld [vmem:[%s6766_s13 + $0x48] sm:$0xff]  ;;  %v6799_v51 = vpack.c.bf16 %v323_v45, %v321_v44  ;;  %v5681_v52 = vld [vmem:[#allocation6 + $0x9c] ss:$24 sps:$4 sm:$0xff]   ;;  %p5051_p1 = scmp.lt.s32.totalorder (%p9900_p10), %s5050_s27, 32 }
  0xca   : > { %v5678_v49 = vld [vmem:[#allocation6 + $0x6c] ss:$24 sps:$4 sm:$0xff]   ;;  %v5676_v50 = vld [vmem:[#allocation6 + $0x68] ss:$24 sps:$4 sm:$0xff]   ;;  %v6801_v53 = vpack.c.bf16 %v328_v48, %v326_v47  ;;  %v327_v55 = vld [vmem:[%s6766_s13 + $0x50] sm:$0xff] }
  0xcb   : > { %v325_v54 = vld [vmem:[%s6766_s13 + $0x40] sm:$0xff]  ;;  %v330_v56 = vld [vmem:[%s6766_s13 + $0x68] sm:$0xff]  ;;  %v332_v57 = vld [vmem:[%s6766_s13 + $0x78] sm:$0xff] }
  0xcc   : > { %892 = vmatpush1.bf16.msra.mxu1 %v5636_v9  ;;  %v5679_v58 = vld [vmem:[#allocation6 + $0x98] ss:$24 sps:$4 sm:$0xff]   ;;  %v5684_v59 = vld [vmem:[#allocation6 + $0xcc] ss:$24 sps:$4 sm:$0xff]   ;;  %v5682_v60 = vld [vmem:[#allocation6 + $0xc8] ss:$24 sps:$4 sm:$0xff]   ;;  %v6809_v61 = vpack.c.bf16 %v327_v55, %v325_v54  ;;  %v6811_v63 = vpack.c.bf16 %v332_v57, %v330_v56 }
  0xcd   : > { %893 = vmatprep.subr.bf16.mxu1 %v5637_v10  ;;  %v5687_v62 = vld [vmem:[#allocation6 + $0xfc] ss:$24 sps:$4 sm:$0xff]   ;;  %v329_v0 = vld [vmem:[%s6766_s13 + $0x60] sm:$0xff]  ;;  %v334_v2 = vld [vmem:[%s6766_s13 + $0x88] sm:$0xff] }
  0xce   : > { %v331_v1 = vld [vmem:[%s6766_s13 + $0x70] sm:$0xff]  ;;  %v336_v3 = vld [vmem:[%s6766_s13 + $0x98] sm:$0xff]  ;;  %v5690_v5 = vld [vmem:[#allocation6 + $0x12c] ss:$24 sps:$4 sm:$0xff]  }
  0xcf   : > { %v5685_v4 = vld [vmem:[#allocation6 + $0xf8] ss:$24 sps:$4 sm:$0xff]   ;;  %v5688_v6 = vld [vmem:[#allocation6 + $0x128] ss:$24 sps:$4 sm:$0xff]   ;;  %v6819_v7 = vpack.c.bf16 %v331_v1, %v329_v0  ;;  %v5693_v8 = vld [vmem:[#allocation6 + $0x15c] ss:$24 sps:$4 sm:$0xff]   ;;  %v6821_v9 = vpack.c.bf16 %v336_v3, %v334_v2 }
  0xd0   : > { %894 = vmatpush1.bf16.msra.mxu1 %v5639_v11  ;;  %v333_v10 = vld [vmem:[%s6766_s13 + $0x80] sm:$0xff]  ;;  %v335_v11 = vld [vmem:[%s6766_s13 + $0x90] sm:$0xff]  ;;  %v340_v13 = vld [vmem:[%s6766_s13 + $0xb8] sm:$0xff] }
  0xd1   : > { %895 = vmatprep.subr.bf16.mxu1 %v5640_v12  ;;  %v338_v12 = vld [vmem:[%s6766_s13 + $0xa8] sm:$0xff]  ;;  %v5691_v14 = vld [vmem:[#allocation6 + $0x158] ss:$24 sps:$4 sm:$0xff]   ;;  %v5717_v56 = vld [vmem:[#allocation6 + $0x2dc] ss:$24 sps:$4 sm:$0xff]  }
  0xd2   : > { %v5703_v35 = vld [vmem:[#allocation6 + $0x218] ss:$24 sps:$4 sm:$0xff]   ;;  %v5708_v36 = vld [vmem:[#allocation6 + $0x24c] ss:$24 sps:$4 sm:$0xff]   ;;  %v5706_v39 = vld [vmem:[#allocation6 + $0x248] ss:$24 sps:$4 sm:$0xff]  }
  0xd3   : > { %v5739_v44 = vld [vmem:[#allocation9 + $0x4] ss:$8 sps:$4 sm:$0xff]   ;;  %v5741_v47 = vld [vmem:[#allocation9] ss:$8 sps:$4 sm:$0xff]   ;;  %v5745_v57 = vld [vmem:[#allocation9 + $0x14] ss:$8 sps:$4 sm:$0xff]  }
  0xd4   : > { %896 = vmatpush1.bf16.msra.mxu1 %v5642_v16  ;;  %v5696_v16 = vld [vmem:[#allocation6 + $0x18c] ss:$24 sps:$4 sm:$0xff]   ;;  %v347_v45 = vld [vmem:[%s6766_s13 + $0xf0] sm:$0xff]  ;;  %2805 = vmatprep.subr.bf16.mxu0 %v5739_v44  ;;  %v5712_v55 = vld [vmem:[#allocation6 + $0x2a8] ss:$24 sps:$4 sm:$0xff]  }
  0xd5   : > { %897 = vmatprep.subr.bf16.mxu1 %v5643_v17  ;;  %v5694_v17 = vld [vmem:[#allocation6 + $0x188] ss:$24 sps:$4 sm:$0xff]   ;;  %2806 = vmatpush1.bf16.msra.mxu0 %v5741_v47  ;;  %v356_v2 = vld [vmem:[%s6766_s13 + $0x138] sm:$0xff]  ;;  %v5720_v3 = vld [vmem:[#allocation6 + $0x14] ss:$24 sps:$4 sm:$0xff]  }
  0xd6   : > { %v350_v48 = vld [vmem:[%s6766_s13 + $0x108] sm:$0xff]  ;;  %2807 = vmatprep.subr.bf16.mxu0 %v5745_v57  ;;  %v372_v57 = vld [vmem:[%s6766_s13 + $0x1b8] sm:$0xff] }
  0xd7   : > { %v5748_v0 = vld [vmem:[#allocation9 + $0x24] ss:$8 sps:$4 sm:$0xff]  }
  0xd8   : > { %898 = vmatpush1.bf16.msra.mxu1 %v5645_v18  ;;  %v6829_v18 = vpack.c.bf16 %v335_v11, %v333_v10  ;;  %v354_v1 = vld [vmem:[%s6766_s13 + $0x128] sm:$0xff]  ;;  %v5756_v10 = vld [vmem:[#allocation9 + $0x30] ss:$8 sps:$4 sm:$0xff]  }
  0xd9   : > { %899 = vmatprep.subr.bf16.mxu1 %v5646_v19  ;;  %v5699_v19 = vld [vmem:[#allocation6 + $0x1bc] ss:$24 sps:$4 sm:$0xff]   ;;  %v353_v11 = vld [vmem:[%s6766_s13 + $0x120] sm:$0xff] }
  0xda   : > { %v5775_v44 = vld [vmem:[#allocation9 + $0x84] ss:$8 sps:$4 sm:$0xff]  }
  0xdc   : > { %900 = vmatpush1.bf16.msra.mxu1 %v5648_v20  ;;  %v6831_v20 = vpack.c.bf16 %v340_v13, %v338_v12  ;;  %v355_v12 = vld [vmem:[%s6766_s13 + $0x130] sm:$0xff] }
  0xdd   : > { %901 = vmatprep.subr.bf16.mxu1 %v5649_v21  ;;  %v337_v21 = vld [vmem:[%s6766_s13 + $0xa0] sm:$0xff]  ;;  %v5757_v13 = vld [vmem:[#allocation9 + $0x44] ss:$8 sps:$4 sm:$0xff]  }
  0xe0   : > { %902 = vmatpush1.bf16.msra.mxu1 %v5651_v22  ;;  %v339_v22 = vld [vmem:[%s6766_s13 + $0xb0] sm:$0xff] }
  0xe1   : > { %903 = vmatprep.subr.bf16.mxu1 %v5652_v23  ;;  %v342_v23 = vld [vmem:[%s6766_s13 + $0xc8] sm:$0xff] }
  0xe4   : > { %904 = vmatpush1.bf16.msra.mxu1 %v5654_v24  ;;  %v344_v24 = vld [vmem:[%s6766_s13 + $0xd8] sm:$0xff] }
  0xe5   : > { %905 = vmatprep.subr.bf16.mxu1 %v5655_v25  ;;  %v5697_v25 = vld [vmem:[#allocation6 + $0x1b8] ss:$24 sps:$4 sm:$0xff]  }
  0xe8   : > { %906 = vmatpush1.bf16.msra.mxu1 %v5657_v26  ;;  %v5702_v26 = vld [vmem:[#allocation6 + $0x1ec] ss:$24 sps:$4 sm:$0xff]  }
  0xe9   : > { %907 = vmatprep.subr.bf16.mxu1 %v5658_v27  ;;  %v5700_v27 = vld [vmem:[#allocation6 + $0x1e8] ss:$24 sps:$4 sm:$0xff]  }
  0xec   : > { %908 = vmatpush1.bf16.msra.mxu1 %v5660_v28  ;;  %v6839_v28 = vpack.c.bf16 %v339_v22, %v337_v21  ;;  %v5763_v22 = vld [vmem:[#allocation9 + $0x54] ss:$8 sps:$4 sm:$0xff]  }
  0xed   : > { %909 = vmatprep.subr.bf16.mxu1 %v5661_v29  ;;  %v5705_v29 = vld [vmem:[#allocation6 + $0x21c] ss:$24 sps:$4 sm:$0xff]  }
  0xf0   : > { %910 = vmatpush1.bf16.msra.mxu1 %v5663_v30  ;;  %v6841_v30 = vpack.c.bf16 %v344_v24, %v342_v23  ;;  %v5765_v23 = vld [vmem:[#allocation9 + $0x50] ss:$8 sps:$4 sm:$0xff]  }
  0xf1   : > { %911 = vmatprep.subr.bf16.mxu1 %v5664_v31  ;;  %v341_v31 = vld [vmem:[%s6766_s13 + $0xc0] sm:$0xff] }
  0xf2   : > { %v357_v24 = vld [vmem:[%s6766_s13 + $0x140] sm:$0xff] }
  0xf4   : > { %912 = vmatpush1.bf16.msra.mxu1 %v5666_v32  ;;  %v343_v32 = vld [vmem:[%s6766_s13 + $0xd0] sm:$0xff] }
  0xf5   : > { %913 = vmatprep.subr.bf16.mxu1 %v5667_v33  ;;  %v346_v33 = vld [vmem:[%s6766_s13 + $0xe8] sm:$0xff] }
  0xf8   : > { %914 = vmatpush1.bf16.msra.mxu1 %v5669_v34  ;;  %v348_v34 = vld [vmem:[%s6766_s13 + $0xf8] sm:$0xff] }
  0xf9   : > { %1076 = vmatprep.subr.bf16.mxu1 %v5672_v37  ;;  %v6849_v37 = vpack.c.bf16 %v343_v32, %v341_v31  ;;  %v6851_v38 = vpack.c.bf16 %v348_v34, %v346_v33  ;;  %v5768_v31 = vld [vmem:[#allocation9 + $0x60] ss:$8 sps:$4 sm:$0xff]   ;;  %v5772_v34 = vld [vmem:[#allocation9 + $0x74] ss:$8 sps:$4 sm:$0xff]  }
  0xfb   : > { %916 = vmatmul.mubr.bf16.vlgmr.msra.gmra.mrb[0].mxu1 %v6789_v40 }
  0xfc   : > { %1077 = vmatpush1.bf16.msra.mxu1 %v5670_v41  ;;  %925 = vmatprep.mubr.bf16.mxu1 %v6791_v42  ;;  %v5711_v41 = vld [vmem:[#allocation6 + $0x27c] ss:$24 sps:$4 sm:$0xff]  }
  0xfd   : > { %1078 = vmatprep.subr.bf16.mxu1 %v5675_v43  ;;  %v345_v43 = vld [vmem:[%s6766_s13 + $0xe0] sm:$0xff] }
 0x100   : > { %1079 = vmatpush1.bf16.msra.mxu1 %v5673_v46  ;;  %v5709_v46 = vld [vmem:[#allocation6 + $0x278] ss:$24 sps:$4 sm:$0xff]  }
 0x101   : > { %1080 = vmatprep.subr.bf16.mxu1 %v5678_v49  ;;  %v352_v49 = vld [vmem:[%s6766_s13 + $0x118] sm:$0xff] }
 0x102   : > { %v6861_v54 = vpack.c.bf16 %v352_v49, %v350_v48  ;;  %v5781_v48 = vld [vmem:[#allocation9 + $0x94] ss:$8 sps:$4 sm:$0xff]   ;;  %v5783_v49 = vld [vmem:[#allocation9 + $0x90] ss:$8 sps:$4 sm:$0xff]  }
 0x103   : > { %926 = vmatmul.mubr.bf16.gmra.mrb[4].mxu1 %v6799_v51 }
 0x104   : > { %935 = vmatprep.mubr.bf16.mxu1 %v6801_v53  ;;  %1081 = vmatpush1.bf16.msra.mxu1 %v5676_v50  ;;  %v5714_v50 = vld [vmem:[#allocation6 + $0x2ac] ss:$24 sps:$4 sm:$0xff]  }
 0x105   : > { %1082 = vmatprep.subr.bf16.mxu1 %v5681_v52  ;;  %v6859_v52 = vpack.c.bf16 %v347_v45, %v345_v43  ;;  %v368_v43 = vld [vmem:[%s6766_s13 + $0x198] sm:$0xff] }
 0x108   : > { %1083 = vmatpush1.bf16.msra.mxu1 %v5679_v58  ;;  %v349_v58 = vld [vmem:[%s6766_s13 + $0x100] sm:$0xff] }
 0x109   : > { %1084 = vmatprep.subr.bf16.mxu1 %v5684_v59  ;;  %v5747_v59 = vld [vmem:[#allocation9 + $0x10] ss:$8 sps:$4 sm:$0xff]  }
 0x10a   : > { %2808 = vmatpush1.bf16.msra.mxu0 %v5747_v59 }
 0x10b   : > { %936 = vmatmul.mubr.bf16.gmra.mrb[8].mxu1 %v6809_v61  ;;  %2809 = vmatprep.subr.bf16.mxu0 %v5748_v0  ;;  %v5790_v0 = vld [vmem:[#allocation9 + $0xb4] ss:$8 sps:$4 sm:$0xff]  }
 0x10c   : > { %945 = vmatprep.mubr.bf16.mxu1 %v6811_v63  ;;  %1085 = vmatpush1.bf16.msra.mxu1 %v5682_v60  ;;  %v351_v60 = vld [vmem:[%s6766_s13 + $0x110] sm:$0xff] }
 0x10d   : > { %1086 = vmatprep.subr.bf16.mxu1 %v5687_v62  ;;  %v5715_v62 = vld [vmem:[#allocation6 + $0x2d8] ss:$24 sps:$4 sm:$0xff]  }
 0x110   : > { %1087 = vmatpush1.bf16.msra.mxu1 %v5685_v4  ;;  %v5750_v4 = vld [vmem:[#allocation9 + $0x20] ss:$8 sps:$4 sm:$0xff]  }
 0x111   : > { %1088 = vmatprep.subr.bf16.mxu1 %v5690_v5  ;;  %v6869_v5 = vpack.c.bf16 %v351_v60, %v349_v58  ;;  %2810 = vmatpush1.bf16.msra.mxu0 %v5750_v4  ;;  %v5784_v58 = vld [vmem:[#allocation9 + $0xa4] ss:$8 sps:$4 sm:$0xff]   ;;  %v5786_v60 = vld [vmem:[#allocation9 + $0xa0] ss:$8 sps:$4 sm:$0xff]  }
 0x112   : > { %v374_v4 = vld [vmem:[%s6766_s13 + $0x1c8] sm:$0xff] }
 0x113   : > { %946 = vmatmul.mubr.bf16.gmra.mrb[12].mxu1 %v6819_v7  ;;  %9764 = vst [vmem:[#allocation21_spill] sm:$0xff] %v6869_v5 }
 0x114   : > { %955 = vmatprep.mubr.bf16.mxu1 %v6821_v9  ;;  %1089 = vmatpush1.bf16.msra.mxu1 %v5688_v6  ;;  %v6871_v6 = vpack.c.bf16 %v356_v2, %v354_v1  ;;  %v5792_v1 = vld [vmem:[#allocation9 + $0xb0] ss:$8 sps:$4 sm:$0xff]  }
 0x115   : > { %1090 = vmatprep.subr.bf16.mxu1 %v5693_v8  ;;  %v5754_v8 = vld [vmem:[#allocation9 + $0x34] ss:$8 sps:$4 sm:$0xff]  }
 0x116   : > { %9765 = vst [vmem:[#allocation22_spill] sm:$0xff] %v6871_v6  ;;  %2811 = vmatprep.subr.bf16.mxu0 %v5754_v8  ;;  %v369_v2 = vld [vmem:[%s6766_s13 + $0x1a0] sm:$0xff]  ;;  %v376_v8 = vld [vmem:[%s6766_s13 + $0x1d8] sm:$0xff] }
 0x117   : > { %2812 = vmatpush1.bf16.msra.mxu0 %v5756_v10  ;;  %v5793_v10 = vld [vmem:[#allocation9 + $0xc4] ss:$8 sps:$4 sm:$0xff]  }
 0x118   : > { %1091 = vmatpush1.bf16.msra.mxu1 %v5691_v14  ;;  %v358_v14 = vld [vmem:[%s6766_s13 + $0x148] sm:$0xff]  ;;  %2813 = vmatprep.subr.bf16.mxu0 %v5757_v13  ;;  %v6921_v13 = vpack.c.bf16 %v376_v8, %v374_v4 }
 0x119   : > { %1092 = vmatprep.subr.bf16.mxu1 %v5696_v16  ;;  %v360_v16 = vld [vmem:[%s6766_s13 + $0x158] sm:$0xff]  ;;  %v5753_v4 = vld [vmem:[#allocation6 + $0x194] ss:$24 sps:$4 sm:$0xff]   ;;  %v5751_v8 = vld [vmem:[#allocation6 + $0x190] ss:$24 sps:$4 sm:$0xff]  }
 0x11a   : > { %v6881_v21 = vpack.c.bf16 %v360_v16, %v358_v14  ;;  %9775 = vst [vmem:[#allocation32_spill] sm:$0xff] %v6921_v13  ;;  %v5799_v14 = vld [vmem:[#allocation9 + $0xd4] ss:$8 sps:$4 sm:$0xff]   ;;  %v5801_v16 = vld [vmem:[#allocation9 + $0xd0] ss:$8 sps:$4 sm:$0xff]  }
 0x11b   : > { %956 = vmatmul.mubr.bf16.gmra.mrb[16].mxu1 %v6829_v18 }
 0x11c   : > { %965 = vmatprep.mubr.bf16.mxu1 %v6831_v20  ;;  %1093 = vmatpush1.bf16.msra.mxu1 %v5694_v17  ;;  %v5759_v17 = vld [vmem:[#allocation9 + $0x40] ss:$8 sps:$4 sm:$0xff]   ;;  %9767 = vst [vmem:[#allocation24_spill] sm:$0xff] %v6881_v21 }
 0x11d   : > { %1094 = vmatprep.subr.bf16.mxu1 %v5699_v19  ;;  %v6879_v19 = vpack.c.bf16 %v355_v12, %v353_v11  ;;  %2814 = vmatpush1.bf16.msra.mxu0 %v5759_v17  ;;  %v5795_v12 = vld [vmem:[#allocation9 + $0xc0] ss:$8 sps:$4 sm:$0xff]  }
 0x11e   : > { %2815 = vmatprep.subr.bf16.mxu0 %v5763_v22  ;;  %v373_v17 = vld [vmem:[%s6766_s13 + $0x1c0] sm:$0xff]  ;;  %v375_v22 = vld [vmem:[%s6766_s13 + $0x1d0] sm:$0xff] }
 0x11f   : > { %9766 = vst [vmem:[#allocation23_spill] sm:$0xff] %v6879_v19 }
 0x120   : > { %1095 = vmatpush1.bf16.msra.mxu1 %v5697_v25  ;;  %v359_v25 = vld [vmem:[%s6766_s13 + $0x150] sm:$0xff] }
 0x121   : > { %1096 = vmatprep.subr.bf16.mxu1 %v5702_v26  ;;  %v5766_v26 = vld [vmem:[#allocation9 + $0x64] ss:$8 sps:$4 sm:$0xff]   ;;  %2816 = vmatpush1.bf16.msra.mxu0 %v5765_v23  ;;  %v6889_v32 = vpack.c.bf16 %v359_v25, %v357_v24  ;;  %v380_v24 = vld [vmem:[%s6766_s13 + $0x1f8] sm:$0xff] }
 0x122   : > { %2817 = vmatprep.subr.bf16.mxu0 %v5766_v26  ;;  %v378_v23 = vld [vmem:[%s6766_s13 + $0x1e8] sm:$0xff]  ;;  %v6929_v26 = vpack.c.bf16 %v375_v22, %v373_v17  ;;  %v5780_v17 = vld [vmem:[#allocation6 + $0x224] ss:$24 sps:$4 sm:$0xff]   ;;  %v5778_v22 = vld [vmem:[#allocation6 + $0x220] ss:$24 sps:$4 sm:$0xff]  }
 0x123   : > { %966 = vmatmul.mubr.bf16.gmra.mrb[20].mxu1 %v6839_v28  ;;  %9768 = vst [vmem:[#allocation25_spill] sm:$0xff] %v6889_v32  ;;  %v5802_v25 = vld [vmem:[#allocation9 + $0xe4] ss:$8 sps:$4 sm:$0xff]  }
 0x124   : > { %975 = vmatprep.mubr.bf16.mxu1 %v6841_v30  ;;  %1097 = vmatpush1.bf16.msra.mxu1 %v5700_v27  ;;  %v362_v27 = vld [vmem:[%s6766_s13 + $0x168] sm:$0xff]  ;;  %9776 = vst [vmem:[#allocation33_spill] sm:$0xff] %v6929_v26 }
 0x125   : > { %1098 = vmatprep.subr.bf16.mxu1 %v5705_v29  ;;  %v364_v29 = vld [vmem:[%s6766_s13 + $0x178] sm:$0xff]  ;;  %2818 = vmatpush1.bf16.msra.mxu0 %v5768_v31 }
 0x126   : > { %v6891_v33 = vpack.c.bf16 %v364_v29, %v362_v27  ;;  %2819 = vmatprep.subr.bf16.mxu0 %v5772_v34  ;;  %v5804_v27 = vld [vmem:[#allocation9 + $0xe0] ss:$8 sps:$4 sm:$0xff]   ;;  %v6931_v29 = vpack.c.bf16 %v380_v24, %v378_v23  ;;  %v5808_v31 = vld [vmem:[#allocation9 + $0xf4] ss:$8 sps:$4 sm:$0xff]   ;;  %v5810_v34 = vld [vmem:[#allocation9 + $0xf0] ss:$8 sps:$4 sm:$0xff]  }
 0x127   : > { %v5789_v23 = vld [vmem:[#allocation6 + $0x254] ss:$24 sps:$4 sm:$0xff]   ;;  %v5787_v24 = vld [vmem:[#allocation6 + $0x250] ss:$24 sps:$4 sm:$0xff]  }
 0x128   : > { %1099 = vmatpush1.bf16.msra.mxu1 %v5703_v35  ;;  %9769 = vst [vmem:[#allocation26_spill] sm:$0xff] %v6891_v33  ;;  %v5774_v35 = vld [vmem:[#allocation9 + $0x70] ss:$8 sps:$4 sm:$0xff]   ;;  %9777 = vst [vmem:[#allocation34_spill] sm:$0xff] %v6931_v29 }
 0x129   : > { %1100 = vmatprep.subr.bf16.mxu1 %v5708_v36  ;;  %v361_v36 = vld [vmem:[%s6766_s13 + $0x160] sm:$0xff]  ;;  %2820 = vmatpush1.bf16.msra.mxu0 %v5774_v35 }
 0x12a   : > { %2821 = vmatprep.subr.bf16.mxu0 %v5775_v44  ;;  %v377_v35 = vld [vmem:[%s6766_s13 + $0x1e0] sm:$0xff] }
 0x12b   : > { %976 = vmatmul.mubr.bf16.gmra.mrb[24].mxu1 %v6849_v37  ;;  %v5721_v44 = vld [vmem:[#allocation6 + $0x40] ss:$24 sps:$4 sm:$0xff]  }
 0x12c   : > { %985 = vmatprep.mubr.bf16.mxu1 %v6851_v38  ;;  %1101 = vmatpush1.bf16.msra.mxu1 %v5706_v39  ;;  %v363_v39 = vld [vmem:[%s6766_s13 + $0x170] sm:$0xff] }
 0x12d   : > { %1102 = vmatprep.subr.bf16.mxu1 %v5711_v41  ;;  %v366_v41 = vld [vmem:[%s6766_s13 + $0x188] sm:$0xff]  ;;  %v6899_v45 = vpack.c.bf16 %v363_v39, %v361_v36  ;;  %v379_v36 = vld [vmem:[%s6766_s13 + $0x1f0] sm:$0xff] }
 0x12e   : > { %v6901_v47 = vpack.c.bf16 %v368_v43, %v366_v41  ;;  %v6937_v39 = vpack.c.bf16 %v379_v36, %v377_v35  ;;  %v5718_v41 = vld [vmem:[#allocation6 + $0x10] ss:$24 sps:$4 sm:$0xff]   ;;  %v5723_v43 = vld [vmem:[#allocation6 + $0x44] ss:$24 sps:$4 sm:$0xff]   ;;  %v5814_v36 = vld [vmem:[#allocation6 + $0x2e0] ss:$24 sps:$4 sm:$0xff]  }
 0x12f   : > { %9770 = vst [vmem:[#allocation27_spill] sm:$0xff] %v6899_v45  ;;  %v5816_v35 = vld [vmem:[#allocation6 + $0x2e4] ss:$24 sps:$4 sm:$0xff]  }
 0x130   : > { %1103 = vmatpush1.bf16.msra.mxu1 %v5709_v46  ;;  %v5777_v46 = vld [vmem:[#allocation9 + $0x80] ss:$8 sps:$4 sm:$0xff]   ;;  %9771 = vst [vmem:[#allocation28_spill] sm:$0xff] %v6901_v47  ;;  %9778 = vst [vmem:[#allocation35_spill] sm:$0xff] %v6937_v39 }
 0x131   : > { %1104 = vmatprep.subr.bf16.mxu1 %v5714_v50  ;;  %2822 = vmatpush1.bf16.msra.mxu0 %v5777_v46  ;;  %v365_v50 = vld [vmem:[%s6766_s13 + $0x180] sm:$0xff]  ;;  %v5726_v46 = vld [vmem:[#allocation6 + $0x74] ss:$24 sps:$4 sm:$0xff]  }
 0x132   : > { %2823 = vmatprep.subr.bf16.mxu0 %v5781_v48  ;;  %v5813_v48 = vld [vmem:[#allocation9 + $0x104] ss:$8 sps:$4 sm:$0xff]  }
 0x133   : > { %986 = vmatmul.mubr.bf16.gmra.mrb[28].mxu1 %v6859_v52 }
 0x134   : > { %995 = vmatprep.mubr.bf16.mxu1 %v6861_v54  ;;  %1105 = vmatpush1.bf16.msra.mxu1 %v5712_v55  ;;  %v367_v55 = vld [vmem:[%s6766_s13 + $0x190] sm:$0xff] }
 0x135   : > { %1106 = vmatprep.subr.bf16.mxu1 %v5717_v56  ;;  %v370_v56 = vld [vmem:[%s6766_s13 + $0x1a8] sm:$0xff]  ;;  %2824 = vmatpush1.bf16.msra.mxu0 %v5783_v49  ;;  %v6909_v59 = vpack.c.bf16 %v367_v55, %v365_v50  ;;  %v5729_v50 = vld [vmem:[#allocation6 + $0xa4] ss:$24 sps:$4 sm:$0xff]   ;;  %v5727_v55 = vld [vmem:[#allocation6 + $0xa0] ss:$24 sps:$4 sm:$0xff]  }
 0x136   : > { %2825 = vmatprep.subr.bf16.mxu0 %v5784_v58  ;;  %v5724_v49 = vld [vmem:[#allocation6 + $0x70] ss:$24 sps:$4 sm:$0xff]   ;;  %v5735_v58 = vld [vmem:[#allocation6 + $0x104] ss:$24 sps:$4 sm:$0xff]  }
 0x137   : > { %9772 = vst [vmem:[#allocation29_spill] sm:$0xff] %v6909_v59 }
 0x138   : > { %1107 = vmatpush1.bf16.msra.mxu1 %v5715_v62  ;;  %v6911_v62 = vpack.c.bf16 %v372_v57, %v370_v56  ;;  %v5732_v56 = vld [vmem:[#allocation6 + $0xd4] ss:$24 sps:$4 sm:$0xff]   ;;  %v5730_v57 = vld [vmem:[#allocation6 + $0xd0] ss:$24 sps:$4 sm:$0xff]  }
 0x139   : > { %3491 = vmatprep.subr.bf16.mxu1 %v5720_v3  ;;  %2826 = vmatpush1.bf16.msra.mxu0 %v5786_v60  ;;  %v371_v3 = vld [vmem:[%s6766_s13 + $0x1b0] sm:$0xff]  ;;  %v5733_v60 = vld [vmem:[#allocation6 + $0x100] ss:$24 sps:$4 sm:$0xff]  }
 0x13a   : > { %9773 = vst [vmem:[#allocation30_spill] sm:$0xff] %v6911_v62  ;;  %2827 = vmatprep.subr.bf16.mxu0 %v5790_v0  ;;  %v6919_v11 = vpack.c.bf16 %v371_v3, %v369_v2  ;;  %v5738_v0 = vld [vmem:[#allocation6 + $0x134] ss:$24 sps:$4 sm:$0xff]   ;;  %v5744_v2 = vld [vmem:[#allocation6 + $0x164] ss:$24 sps:$4 sm:$0xff]  }
 0x13b   : > { %996 = vmatmul.mubr.bf16.gmra.mrb[32].mxu1 %v6869_v5  ;;  %v5742_v3 = vld [vmem:[#allocation6 + $0x160] ss:$24 sps:$4 sm:$0xff]  }
 0x13c   : > { %1005 = vmatprep.mubr.bf16.mxu1 %v6871_v6  ;;  %9774 = vst [vmem:[#allocation31_spill] sm:$0xff] %v6919_v11 }
 0x13d   : > { %2828 = vmatpush1.bf16.msra.mxu0 %v5792_v1  ;;  %v5736_v1 = vld [vmem:[#allocation6 + $0x130] ss:$24 sps:$4 sm:$0xff]  }
 0x13e   : > { %2829 = vmatprep.subr.bf16.mxu0 %v5793_v10  ;;  %v5762_v10 = vld [vmem:[#allocation6 + $0x1c4] ss:$24 sps:$4 sm:$0xff]  }
 0x141   : > { %2830 = vmatpush1.bf16.msra.mxu0 %v5795_v12  ;;  %v5760_v12 = vld [vmem:[#allocation6 + $0x1c0] ss:$24 sps:$4 sm:$0xff]  }
 0x142   : > { %2831 = vmatprep.subr.bf16.mxu0 %v5799_v14  ;;  %v5771_v14 = vld [vmem:[#allocation6 + $0x1f4] ss:$24 sps:$4 sm:$0xff]  }
 0x143   : > { %1006 = vmatmul.mubr.bf16.gmra.mrb[36].mxu1 %v6879_v19 }
 0x144   : > { %1015 = vmatprep.mubr.bf16.mxu1 %v6881_v21 }
 0x145   : > { %2832 = vmatpush1.bf16.msra.mxu0 %v5801_v16  ;;  %v5769_v16 = vld [vmem:[#allocation6 + $0x1f0] ss:$24 sps:$4 sm:$0xff]  }
 0x146   : > { %2833 = vmatprep.subr.bf16.mxu0 %v5802_v25  ;;  %v5798_v25 = vld [vmem:[#allocation6 + $0x284] ss:$24 sps:$4 sm:$0xff]  }
 0x149   : > { %2834 = vmatpush1.bf16.msra.mxu0 %v5804_v27  ;;  %v5796_v27 = vld [vmem:[#allocation6 + $0x280] ss:$24 sps:$4 sm:$0xff]  }
 0x14a   : > { %2835 = vmatprep.subr.bf16.mxu0 %v5808_v31  ;;  %v5807_v31 = vld [vmem:[#allocation6 + $0x2b4] ss:$24 sps:$4 sm:$0xff]  }
 0x14b   : > { %1016 = vmatmul.mubr.bf16.gmra.mrb[40].mxu1 %v6889_v32 }
 0x14c   : > { %1025 = vmatprep.mubr.bf16.mxu1 %v6891_v33 }
 0x14d   : > { %2836 = vmatpush1.bf16.msra.mxu0 %v5810_v34  ;;  %v5805_v34 = vld [vmem:[#allocation6 + $0x2b0] ss:$24 sps:$4 sm:$0xff]  }
 0x14e   : > { %2998 = vmatprep.subr.bf16.mxu0 %v5813_v48 }
 0x153   : > { %1026 = vmatmul.mubr.bf16.gmra.mrb[44].mxu1 %v6899_v45 }
 0x154   : > { %1035 = vmatprep.mubr.bf16.mxu1 %v6901_v47 }
 0x15b   : > { %1036 = vmatmul.mubr.bf16.gmra.mrb[48].mxu1 %v6909_v59 }
 0x15c   : > { %1045 = vmatprep.mubr.bf16.mxu1 %v6911_v62 }
 0x163   : > { %1046 = vmatmul.mubr.bf16.gmra.mrb[52].mxu1 %v6919_v11 }
 0x164   : > { %1055 = vmatprep.mubr.bf16.mxu1 %v6921_v13 }
 0x16b   : > { %1056 = vmatmul.mubr.bf16.gmra.mrb[56].mxu1 %v6929_v26 }
 0x16c   : > { %1065 = vmatprep.mubr.bf16.mxu1 %v6931_v29 }
 0x173   : > { %1066 = vmatmul.mubr.bf16.gmra.mrb[60].mxu1 %v6937_v39 }
 0x174   : > { %1108 = vmatprep.mubr.bf16.mxu1 %v6782_v15 }
 0x17b   : > { %1109 = vmatmul.mubr.bf16.vlgmr.msra.gmra.mrb[64].mxu1 %v6789_v40 }
 0x17c   : > { %3492 = vmatpush1.bf16.msra.mxu1 %v5718_v41  ;;  %1118 = vmatprep.mubr.bf16.mxu1 %v6791_v42  ;;  %v543_v41 = vlaneseq }
 0x17d   : > { %3493 = vmatprep.subr.bf16.mxu1 %v5723_v43 }
 0x17e   : > { %v6960_v43 = vshrl.u32 %v543_v41, 7 }
 0x180   : > { %3494 = vmatpush1.bf16.msra.mxu1 %v5721_v44  ;;  %9779 = vst [vmem:[#allocation36_spill] sm:$0xff] %v6960_v43  ;;  %v6964_v44 = vsub.s32 0, %v6960_v43  ;;  %v6967_v48 = vsub.s32 1, %v6960_v43 }
 0x181   : > { %3495 = vmatprep.subr.bf16.mxu1 %v5726_v46  ;;  %v477_v46 = vld [vmem:[#allocation8] sm:$0xf] }
 0x182   : > { %9780 = vst [vmem:[#allocation37_spill] sm:$0xff] %v6964_v44  ;;  %9781 = vst [vmem:[#allocation38_spill] sm:$0xff] %v6967_v48 }
 0x183   : > { %1119 = vmatmul.mubr.bf16.gmra.mrb[68].mxu1 %v6799_v51 }
 0x184   : > { %1128 = vmatprep.mubr.bf16.mxu1 %v6801_v53  ;;  %3496 = vmatpush1.bf16.msra.mxu1 %v5724_v49  ;;  %v6971_v49 = vrot.slane %v477_v46, %v6964_v44 }
 0x185   : > { %3497 = vmatprep.subr.bf16.mxu1 %v5729_v50  ;;  %v6974_v50 = vrot.slane %v477_v46, %v6967_v48 }
 0x188   : > { %3498 = vmatpush1.bf16.msra.mxu1 %v5727_v55 }
 0x189   : > { %3499 = vmatprep.subr.bf16.mxu1 %v5732_v56 }
 0x18b   : > { %1129 = vmatmul.mubr.bf16.gmra.mrb[72].mxu1 %v6809_v61 }
 0x18c   : > { %1138 = vmatprep.mubr.bf16.mxu1 %v6811_v63  ;;  %3500 = vmatpush1.bf16.msra.mxu1 %v5730_v57 }
 0x18d   : > { %3501 = vmatprep.subr.bf16.mxu1 %v5735_v58 }
 0x190   : > { %3502 = vmatpush1.bf16.msra.mxu1 %v5733_v60 }
 0x191   : > { %3503 = vmatprep.subr.bf16.mxu1 %v5738_v0 }
 0x193   : > { %1139 = vmatmul.mubr.bf16.gmra.mrb[76].mxu1 %v6819_v7 }
 0x194   : > { %1148 = vmatprep.mubr.bf16.mxu1 %v6821_v9  ;;  %3504 = vmatpush1.bf16.msra.mxu1 %v5736_v1 }
 0x195   : > { %3505 = vmatprep.subr.bf16.mxu1 %v5744_v2 }
 0x198   : > { %3506 = vmatpush1.bf16.msra.mxu1 %v5742_v3 }
 0x199   : > { %3507 = vmatprep.subr.bf16.mxu1 %v5753_v4 }
 0x19b   : > { %1149 = vmatmul.mubr.bf16.gmra.mrb[80].mxu1 %v6829_v18 }
 0x19c   : > { %1158 = vmatprep.mubr.bf16.mxu1 %v6831_v20  ;;  %3508 = vmatpush1.bf16.msra.mxu1 %v5751_v8 }
 0x19d   : > { %3509 = vmatprep.subr.bf16.mxu1 %v5762_v10 }
 0x1a0   : > { %3510 = vmatpush1.bf16.msra.mxu1 %v5760_v12 }
 0x1a1   : > { %3511 = vmatprep.subr.bf16.mxu1 %v5771_v14 }
 0x1a3   : > { %1159 = vmatmul.mubr.bf16.gmra.mrb[84].mxu1 %v6839_v28 }
 0x1a4   : > { %1168 = vmatprep.mubr.bf16.mxu1 %v6841_v30  ;;  %3512 = vmatpush1.bf16.msra.mxu1 %v5769_v16 }
 0x1a5   : > { %3513 = vmatprep.subr.bf16.mxu1 %v5780_v17 }
 0x1a8   : > { %3514 = vmatpush1.bf16.msra.mxu1 %v5778_v22 }
 0x1a9   : > { %3515 = vmatprep.subr.bf16.mxu1 %v5789_v23 }
 0x1ab   : > { %1169 = vmatmul.mubr.bf16.gmra.mrb[88].mxu1 %v6849_v37 }
 0x1ac   : > { %1178 = vmatprep.mubr.bf16.mxu1 %v6851_v38  ;;  %3516 = vmatpush1.bf16.msra.mxu1 %v5787_v24 }
 0x1ad   : > { %3517 = vmatprep.subr.bf16.mxu1 %v5798_v25 }
 0x1b0   : > { %3518 = vmatpush1.bf16.msra.mxu1 %v5796_v27 }
 0x1b1   : > { %3519 = vmatprep.subr.bf16.mxu1 %v5807_v31 }
 0x1b3   : > { %1179 = vmatmul.mubr.bf16.gmra.mrb[92].mxu1 %v6859_v52 }
 0x1b4   : > { %1188 = vmatprep.mubr.bf16.mxu1 %v6861_v54  ;;  %3520 = vmatpush1.bf16.msra.mxu1 %v5805_v34 }
 0x1b5   : > { %3521 = vmatprep.subr.bf16.mxu1 %v5816_v35 }
 0x1b8   : > { %3522 = vmatpush1.bf16.msra.mxu1 %v5814_v36 }
 0x1bb   : > { %1189 = vmatmul.mubr.bf16.gmra.mrb[96].mxu1 %v6869_v5 }
 0x1bc   : > { %1198 = vmatprep.mubr.bf16.mxu1 %v6871_v6 }
 0x1c3   : > { %1199 = vmatmul.mubr.bf16.gmra.mrb[100].mxu1 %v6879_v19 }
 0x1c4   : > { %1208 = vmatprep.mubr.bf16.mxu1 %v6881_v21 }
 0x1cb   : > { %1209 = vmatmul.mubr.bf16.gmra.mrb[104].mxu1 %v6889_v32 }
 0x1cc   : > { %1218 = vmatprep.mubr.bf16.mxu1 %v6891_v33 }
 0x1ce   : > { %v917_v55 = vpop.f32.mrb[0].mxu1 }
 0x1cf   : > { %v918_v56 = vadd.f32 %v917_v55, %v6971_v49  ;;  %v919_v57 = vpop.f32.mrb[1].mxu1 }
 0x1d0   : > { %v920_v58 = vadd.f32 %v919_v57, %v6974_v50  ;;  %v921_v60 = vpop.f32.mrb[2].mxu1 }
 0x1d1   : > { %v1397_v0 = vmul.f32 %v918_v56, %v918_v56  ;;  %v922_v1 = vadd.f32 %v921_v60, %v6971_v49  ;;  %v923_v2 = vpop.f32.mrb[3].mxu1  ;;  %v6985_v27 = vmul.f32 0.5, %v918_v56 }
 0x1d2   : > { %v1398_v3 = vmul.f32 %v920_v58, %v920_v58  ;;  %v924_v4 = vadd.f32 %v923_v2, %v6974_v50  ;;  %v6983_v25 = vmul.f32 0.5, %v920_v58 }
 0x1d3   : > { %v1525_v8 = vmul.f32 %v1397_v0, %v918_v56  ;;  %v1401_v10 = vmul.f32 %v922_v1, %v922_v1  ;;  %1219 = vmatmul.mubr.bf16.gmra.mrb[108].mxu1 %v6899_v45  ;;  %v6988_v41 = vmul.f32 0.5, %v922_v1 }
 0x1d4   : > { %v1526_v12 = vmul.f32 %v1398_v3, %v920_v58  ;;  %v1402_v14 = vmul.f32 %v924_v4, %v924_v4  ;;  %1228 = vmatprep.mubr.bf16.mxu1 %v6901_v47  ;;  %v6991_v60 = vmul.f32 0.5, %v924_v4 }
 0x1d5   : > { %v1653_v16 = vmul.f32 0.044715, %v1525_v8  ;;  %v1529_v17 = vmul.f32 %v1401_v10, %v922_v1 }
 0x1d6   : > { %v1654_v22 = vmul.f32 0.044715, %v1526_v12  ;;  %v1530_v23 = vmul.f32 %v1402_v14, %v924_v4  ;;  %v927_v24 = vpop.f32.mrb[4].mxu1 }
 0x1d7   : > { %v1781_v31 = vadd.f32 %v1653_v16, %v918_v56  ;;  %v1657_v34 = vmul.f32 0.044715, %v1529_v17  ;;  %v928_v35 = vadd.f32 %v927_v24, %v6971_v49  ;;  %v929_v36 = vpop.f32.mrb[5].mxu1 }
 0x1d8   : > { %v1658_v46 = vmul.f32 0.044715, %v1530_v23  ;;  %v930_v55 = vadd.f32 %v929_v36, %v6974_v50  ;;  %v931_v57 = vpop.f32.mrb[6].mxu1  ;;  %v1782_v0 = vadd.f32 %v1654_v22, %v920_v58 }
 0x1d9   : > { %v1909_v2 = vmul.f32 0.7978846, %v1781_v31  ;;  %v1785_v3 = vadd.f32 %v1657_v34, %v922_v1  ;;  %v1405_v8 = vmul.f32 %v928_v35, %v928_v35  ;;  %v932_v10 = vadd.f32 %v931_v57, %v6971_v49  ;;  %v933_v12 = vpop.f32.mrb[7].mxu1 }
 0x1da   : > { %v1406_v56 = vmul.f32 %v930_v55, %v930_v55  ;;  %v934_v14 = vadd.f32 %v933_v12, %v6974_v50  ;;  %v1786_v16 = vadd.f32 %v1658_v46, %v924_v4  ;;  %v1910_v17 = vmul.f32 0.7978846, %v1782_v0 }
 0x1db   : > { %5910 = vtanh.f32 %v1909_v2  ;;  %v1913_v24 = vmul.f32 0.7978846, %v1785_v3  ;;  %v1533_v23 = vmul.f32 %v1405_v8, %v928_v35  ;;  %v1409_v48 = vmul.f32 %v932_v10, %v932_v10  ;;  %1229 = vmatmul.mubr.bf16.gmra.mrb[112].mxu1 %v6909_v59 }
 0x1dc   : > { %v1534_v36 = vmul.f32 %v1406_v56, %v930_v55  ;;  %v1410_v44 = vmul.f32 %v934_v14, %v934_v14  ;;  %1238 = vmatprep.mubr.bf16.mxu1 %v6911_v62  ;;  %v1914_v58 = vmul.f32 0.7978846, %v1786_v16  ;;  %5912 = vtanh.f32 %v1910_v17 }
 0x1dd   : > { %5914 = vtanh.f32 %v1913_v24  ;;  %v1661_v1 = vmul.f32 0.044715, %v1533_v23  ;;  %v1537_v22 = vmul.f32 %v1409_v48, %v932_v10  ;;  %v6997_v31 = vmul.f32 0.5, %v930_v55 }
 0x1de   : > { %v1662_v34 = vmul.f32 0.044715, %v1534_v36  ;;  %v1538_v4 = vmul.f32 %v1410_v44, %v934_v14  ;;  %v937_v46 = vpop.f32.mrb[8].mxu1  ;;  %5916 = vtanh.f32 %v1914_v58  ;;  %v6999_v57 = vmul.f32 0.5, %v934_v14 }
 0x1df   : > { %v1789_v0 = vadd.f32 %v1661_v1, %v928_v35  ;;  %v1665_v2 = vmul.f32 0.044715, %v1537_v22  ;;  %v7002_v3 = vadd.f32 %v937_v46, %v6971_v49  ;;  %v939_v8 = vpop.f32.mrb[9].mxu1  ;;  %v7004_v12 = vmul.f32 0.5, %v928_v35 }
 0x1e0   : > { %v1790_v56 = vadd.f32 %v1662_v34, %v930_v55  ;;  %v1666_v16 = vmul.f32 0.044715, %v1538_v4  ;;  %v940_v48 = vadd.f32 %v939_v8, %v6974_v50  ;;  %v941_v17 = vpop.f32.mrb[10].mxu1  ;;  %v7007_v24 = vmul.f32 0.5, %v932_v10 }
 0x1e1   : > { %v1917_v44 = vmul.f32 0.7978846, %v1789_v0  ;;  %v1793_v23 = vadd.f32 %v1665_v2, %v932_v10  ;;  %v1413_v36 = vmul.f32 %v7002_v3, %v7002_v3  ;;  %v7012_v58 = vadd.f32 %v941_v17, %v6971_v49  ;;  %v943_v1 = vpop.f32.mrb[11].mxu1 }
 0x1e2   : > { %v1918_v22 = vmul.f32 0.7978846, %v1790_v56  ;;  %v1794_v46 = vadd.f32 %v1666_v16, %v934_v14  ;;  %v1414_v35 = vmul.f32 %v940_v48, %v940_v48  ;;  %v7015_v55 = vadd.f32 %v943_v1, %v6974_v50 }
 0x1e3   : > { %5918 = vtanh.f32 %v1917_v44  ;;  %v1921_v34 = vmul.f32 0.7978846, %v1793_v23  ;;  %v1541_v4 = vmul.f32 %v1413_v36, %v7002_v3  ;;  %v1417_v10 = vmul.f32 %v7012_v58, %v7012_v58  ;;  %1239 = vmatmul.mubr.bf16.gmra.mrb[116].mxu1 %v6919_v11 }
 0x1e4   : > { %5920 = vtanh.f32 %v1918_v22  ;;  %v1922_v0 = vmul.f32 0.7978846, %v1794_v46  ;;  %v1542_v2 = vmul.f32 %v1414_v35, %v940_v48  ;;  %v1418_v8 = vmul.f32 %v7015_v55, %v7015_v55  ;;  %1248 = vmatprep.mubr.bf16.mxu1 %v6921_v13 }
 0x1e5   : > { %v5911_v14 = vpop.eup %5910  ;;  %5922 = vtanh.f32 %v1921_v34  ;;  %v1669_v56 = vmul.f32 0.044715, %v1541_v4  ;;  %v1545_v16 = vmul.f32 %v1417_v10, %v7012_v58  ;;  %v7025_v17 = vmul.f32 0.5, %v940_v48 }
 0x1e6   : > { %v5913_v44 = vpop.eup %5912  ;;  %5924 = vtanh.f32 %v1922_v0  ;;  %v1670_v23 = vmul.f32 0.044715, %v1542_v2  ;;  %v1546_v36 = vmul.f32 %v1418_v8, %v7015_v55  ;;  %v947_v1 = vpop.f32.mrb[12].mxu1  ;;  %v2165_v22 = vadd.f32 1.0, %v5911_v14 }
 0x1e7   : > { %v5915_v46 = vpop.eup %5914  ;;  %v1797_v35 = vadd.f32 %v1669_v56, %v7002_v3  ;;  %v1673_v43 = vmul.f32 0.044715, %v1545_v16  ;;  %v7030_v13 = vadd.f32 %v947_v1, %v6971_v49  ;;  %v949_v34 = vpop.f32.mrb[13].mxu1  ;;  %v2166_v4 = vadd.f32 1.0, %v5913_v44 }
 0x1e8   : > { %v5917_v11 = vpop.eup %5916  ;;  %v1798_v10 = vadd.f32 %v1670_v23, %v940_v48  ;;  %v1674_v62 = vmul.f32 0.044715, %v1546_v36  ;;  %v7033_v59 = vadd.f32 %v949_v34, %v6974_v50  ;;  %v951_v0 = vpop.f32.mrb[14].mxu1  ;;  %v2169_v2 = vadd.f32 1.0, %v5915_v46 }
 0x1e9   : > { %v1925_v8 = vmul.f32 0.7978846, %v1797_v35  ;;  %v1801_v14 = vadd.f32 %v1673_v43, %v7012_v58  ;;  %v1421_v56 = vmul.f32 %v7030_v13, %v7030_v13  ;;  %v7039_v16 = vadd.f32 %v951_v0, %v6971_v49  ;;  %v953_v1 = vpop.f32.mrb[15].mxu1 }
 0x1ea   : > { %v1926_v47 = vmul.f32 0.7978846, %v1798_v10  ;;  %v1802_v44 = vadd.f32 %v1674_v62, %v7015_v55  ;;  %v1422_v48 = vmul.f32 %v7033_v59, %v7033_v59  ;;  %v7045_v23 = vadd.f32 %v953_v1, %v6974_v50 }
 0x1eb   : > { %5926 = vtanh.f32 %v1925_v8  ;;  %v1929_v36 = vmul.f32 0.7978846, %v1801_v14  ;;  %v1549_v43 = vmul.f32 %v1421_v56, %v7030_v13  ;;  %v1425_v46 = vmul.f32 %v7039_v16, %v7039_v16  ;;  %1249 = vmatmul.mubr.bf16.gmra.mrb[120].mxu1 %v6929_v26 }
 0x1ec   : > { %5928 = vtanh.f32 %v1926_v47  ;;  %v1930_v35 = vmul.f32 0.7978846, %v1802_v44  ;;  %v1550_v34 = vmul.f32 %v1422_v48, %v7033_v59  ;;  %v1426_v62 = vmul.f32 %v7045_v23, %v7045_v23  ;;  %1258 = vmatprep.mubr.bf16.mxu1 %v6931_v29 }
 0x1ed   : > { %v7055_v10 = vpop.eup %5918  ;;  %5930 = vtanh.f32 %v1929_v36  ;;  %v1677_v0 = vmul.f32 0.044715, %v1549_v43  ;;  %v1553_v8 = vmul.f32 %v1425_v46, %v7039_v16  ;;  %v2170_v14 = vadd.f32 1.0, %v5917_v11 }
 0x1ee   : > { %v5921_v56 = vpop.eup %5920  ;;  %5932 = vtanh.f32 %v1930_v35  ;;  %v1678_v1 = vmul.f32 0.044715, %v1550_v34  ;;  %v1554_v47 = vmul.f32 %v1426_v62, %v7045_v23  ;;  %v957_v44 = vpop.f32.mrb[16].mxu1  ;;  %v2294_v48 = vmul.f32 %v2166_v4, %v6983_v25 }
 0x1ef   : > { %v7060_v26 = vpop.eup %5922  ;;  %v1805_v45 = vadd.f32 %v1677_v0, %v7030_v13  ;;  %v1681_v29 = vmul.f32 0.044715, %v1553_v8  ;;  %v7064_v33 = vadd.f32 %v957_v44, %v6971_v49  ;;  %v959_v36 = vpop.f32.mrb[17].mxu1  ;;  %v2298_v43 = vmul.f32 %v2170_v14, %v6991_v60 }
 0x1f0   : > { %v5925_v11 = vpop.eup %5924  ;;  %v1806_v46 = vadd.f32 %v1678_v1, %v7033_v59  ;;  %v1682_v35 = vmul.f32 0.044715, %v1554_v47  ;;  %v7069_v34 = vadd.f32 %v959_v36, %v6974_v50  ;;  %v961_v62 = vpop.f32.mrb[18].mxu1  ;;  %v2293_v25 = vmul.f32 %v2165_v22, %v6985_v27  ;;  %v5811_v36 = vld [vmem:[#allocation9 + $0x100] ss:$8 sps:$4 sm:$0xff]  }
 0x1f1   : > { %v1933_v4 = vmul.f32 0.7978846, %v1805_v45  ;;  %v1809_v0 = vadd.f32 %v1681_v29, %v7039_v16  ;;  %v1429_v8 = vmul.f32 %v7064_v33, %v7064_v33  ;;  %v2422_v44 = vpack.c.bf16 %v2298_v43, %v2294_v48  ;;  %v963_v32 = vpop.f32.mrb[19].mxu1 }
 0x1f2   : > { %v1934_v21 = vmul.f32 0.7978846, %v1806_v46  ;;  %v1810_v60 = vadd.f32 %v1682_v35, %v7045_v23  ;;  %v1430_v14 = vmul.f32 %v7069_v34, %v7069_v34  ;;  %v7079_v1 = vadd.f32 %v961_v62, %v6971_v49 }
 0x1f3   : > { %5934 = vtanh.f32 %v1933_v4  ;;  %v1937_v47 = vmul.f32 0.7978846, %v1809_v0  ;;  %v1557_v45 = vmul.f32 %v1429_v8, %v7064_v33  ;;  %2837 = vmatprep.mubr.bf16.mxu0 %v2422_v44  ;;  %v2297_v29 = vmul.f32 %v2169_v2, %v6988_v41  ;;  %1259 = vmatmul.mubr.bf16.gmra.mrb[124].mxu1 %v6937_v39  ;;  %v5819_v41 = vld [vmem:[#allocation9 + $0x114] ss:$8 sps:$4 sm:$0xff]  }
 0x1f4   : > { %5936 = vtanh.f32 %v1934_v21  ;;  %v1938_v27 = vmul.f32 0.7978846, %v1810_v60  ;;  %v1558_v22 = vmul.f32 %v1430_v14, %v7069_v34  ;;  %v1433_v48 = vmul.f32 %v7079_v1, %v7079_v1  ;;  %3523 = vmatprep.mubr.bf16.mxu1 %v6782_v15 }
 0x1f5   : > { %v7088_v43 = vpop.eup %5926  ;;  %5938 = vtanh.f32 %v1937_v47  ;;  %v1685_v46 = vmul.f32 0.044715, %v1557_v45  ;;  %v2421_v35 = vpack.c.bf16 %v2297_v29, %v2293_v25  ;;  %v7091_v62 = vadd.f32 %v963_v32, %v6974_v50 }
 0x1f6   : > { %v7093_v2 = vpop.eup %5928  ;;  %5940 = vtanh.f32 %v1938_v27  ;;  %v1686_v21 = vmul.f32 0.044715, %v1558_v22  ;;  %v1561_v4 = vmul.f32 %v1433_v48, %v7079_v1  ;;  %v967_v0 = vpop.f32.mrb[20].mxu1  ;;  %v2174_v8 = vadd.f32 1.0, %v5921_v56  ;;  %v5817_v48 = vld [vmem:[#allocation9 + $0x110] ss:$8 sps:$4 sm:$0xff]  }
 0x1f7   : > { %v7096_v44 = vpop.eup %5930  ;;  %v1813_v15 = vadd.f32 %v1685_v46, %v7064_v33  ;;  %2838 = vmatmul.mubr.bf16.vlgmr.msra.gmra.mrb[0].mxu0 %v2421_v35  ;;  %v1434_v25 = vmul.f32 %v7091_v62, %v7091_v62  ;;  %v7102_v32 = vadd.f32 %v967_v0, %v6971_v49  ;;  %v969_v60 = vpop.f32.mrb[21].mxu1  ;;  %v2178_v14 = vadd.f32 1.0, %v5925_v11 }
 0x1f8   : > { %v7104_v47 = vpop.eup %5932  ;;  %v1814_v45 = vadd.f32 %v1686_v21, %v7069_v34  ;;  %v1689_v29 = vmul.f32 0.044715, %v1561_v4  ;;  %2999 = vmatpush1.bf16.msra.mxu0 %v5811_v36  ;;  %v7108_v56 = vadd.f32 %v969_v60, %v6974_v50  ;;  %v2302_v27 = vmul.f32 %v2174_v8, %v6997_v31  ;;  %v971_v22 = vpop.f32.mrb[22].mxu1  ;;  %v5822_v21 = vld [vmem:[#allocation9 + $0x124] ss:$8 sps:$4 sm:$0xff]  }
 0x1f9   : > { %v1941_v46 = vmul.f32 0.7978846, %v1813_v15  ;;  %v1562_v35 = vmul.f32 %v1434_v25, %v7091_v62  ;;  %v1437_v0 = vmul.f32 %v7102_v32, %v7102_v32  ;;  %v2306_v11 = vmul.f32 %v2178_v14, %v6999_v57  ;;  %3000 = vmatprep.subr.bf16.mxu0 %v5819_v41  ;;  %v973_v39 = vpop.f32.mrb[23].mxu1 }
 0x1fa   : > { %v1942_v4 = vmul.f32 0.7978846, %v1814_v45  ;;  %v1817_v36 = vadd.f32 %v1689_v29, %v7079_v1  ;;  %v1438_v60 = vmul.f32 %v7108_v56, %v7108_v56  ;;  %v7119_v31 = vadd.f32 %v971_v22, %v6971_v49  ;;  %v5820_v45 = vld [vmem:[#allocation9 + $0x120] ss:$8 sps:$4 sm:$0xff]  }
 0x1fb   : > { %5942 = vtanh.f32 %v1941_v46  ;;  %v1690_v8 = vmul.f32 0.044715, %v1562_v35  ;;  %v1565_v15 = vmul.f32 %v1437_v0, %v7102_v32  ;;  %v2426_v25 = vpack.c.bf16 %v2306_v11, %v2302_v27  ;;  %3524 = vmatmul.mubr.bf16.vlgmr.msra.gmra.mrb[128].mxu1 %v6789_v40  ;;  %v5825_v35 = vld [vmem:[#allocation9 + $0x134] ss:$8 sps:$4 sm:$0xff]  }
 0x1fc   : > { %5944 = vtanh.f32 %v1942_v4  ;;  %v1945_v57 = vmul.f32 0.7978846, %v1817_v36  ;;  %v1566_v41 = vmul.f32 %v1438_v60, %v7108_v56  ;;  %v1441_v14 = vmul.f32 %v7119_v31, %v7119_v31  ;;  %3001 = vmatpush1.bf16.msra.mxu0 %v5817_v48  ;;  %3533 = vmatprep.mubr.bf16.mxu1 %v6791_v42 }
 0x1fd   : > { %v7127_v29 = vpop.eup %5934  ;;  %v1818_v22 = vadd.f32 %v1690_v8, %v7091_v62  ;;  %v1693_v46 = vmul.f32 0.044715, %v1565_v15  ;;  %2847 = vmatprep.mubr.bf16.mxu0 %v2426_v25  ;;  %v2173_v27 = vadd.f32 1.0, %v7055_v10  ;;  %v2177_v40 = vadd.f32 1.0, %v7060_v26  ;;  %3002 = vmatprep.subr.bf16.mxu0 %v5822_v21 }
 0x1fe   : > { %v7132_v0 = vpop.eup %5936  ;;  %5946 = vtanh.f32 %v1945_v57  ;;  %v1694_v11 = vmul.f32 0.044715, %v1566_v41  ;;  %v1569_v48 = vmul.f32 %v1441_v14, %v7119_v31  ;;  %v7136_v42 = vadd.f32 %v973_v39, %v6974_v50  ;;  %v977_v4 = vpop.f32.mrb[24].mxu1 }
 0x1ff   : > { %v7138_v36 = vpop.eup %5938  ;;  %v1946_v60 = vmul.f32 0.7978846, %v1818_v22  ;;  %v1821_v8 = vadd.f32 %v1693_v46, %v7102_v32  ;;  %v2301_v10 = vmul.f32 %v2173_v27, %v7004_v12  ;;  %v2305_v26 = vmul.f32 %v2177_v40, %v7007_v24  ;;  %v979_v21 = vpop.f32.mrb[25].mxu1  ;;  %v5823_v22 = vld [vmem:[#allocation9 + $0x130] ss:$8 sps:$4 sm:$0xff]  }
 0x200   : > { %v7143_v15 = vpop.eup %5940  ;;  %v1822_v25 = vadd.f32 %v1694_v11, %v7108_v56  ;;  %v1697_v57 = vmul.f32 0.044715, %v1569_v48  ;;  %v1442_v39 = vmul.f32 %v7136_v42, %v7136_v42  ;;  %v7149_v41 = vadd.f32 %v977_v4, %v6971_v49  ;;  %v981_v14 = vpop.f32.mrb[26].mxu1  ;;  %3003 = vmatpush1.bf16.msra.mxu0 %v5820_v45  ;;  %v5828_v40 = vld [vmem:[#allocation9 + $0x144] ss:$8 sps:$4 sm:$0xff]  }
 0x201   : > { %5948 = vtanh.f32 %v1946_v60  ;;  %v1949_v46 = vmul.f32 0.7978846, %v1821_v8  ;;  %v2425_v12 = vpack.c.bf16 %v2305_v26, %v2301_v10  ;;  %v7152_v24 = vadd.f32 %v979_v21, %v6974_v50  ;;  %v983_v27 = vpop.f32.mrb[27].mxu1  ;;  %3004 = vmatprep.subr.bf16.mxu0 %v5825_v35  ;;  %v5826_v21 = vld [vmem:[#allocation9 + $0x140] ss:$8 sps:$4 sm:$0xff]  }
 0x202   : > { %v1950_v11 = vmul.f32 0.7978846, %v1822_v25  ;;  %v1825_v48 = vadd.f32 %v1697_v57, %v7119_v31  ;;  %v1570_v19 = vmul.f32 %v1442_v39, %v7136_v42  ;;  %v1445_v4 = vmul.f32 %v7149_v41, %v7149_v41 }
 0x203   : > { %5950 = vtanh.f32 %v1949_v46  ;;  %2848 = vmatmul.mubr.bf16.gmra.mrb[4].mxu0 %v2425_v12  ;;  %v1446_v45 = vmul.f32 %v7152_v24, %v7152_v24  ;;  %v1290_v60 = vmul.f32 0.5, %v7015_v55  ;;  %v2182_v8 = vadd.f32 1.0, %v7093_v2  ;;  %3534 = vmatmul.mubr.bf16.gmra.mrb[132].mxu1 %v6799_v51  ;;  %v5831_v51 = vld [vmem:[#allocation9 + $0x154] ss:$8 sps:$4 sm:$0xff]  }
 0x204   : > { %5952 = vtanh.f32 %v1950_v11  ;;  %v1953_v35 = vmul.f32 0.7978846, %v1825_v48  ;;  %v1698_v10 = vmul.f32 0.044715, %v1570_v19  ;;  %v1573_v26 = vmul.f32 %v1445_v4, %v7149_v41  ;;  %3005 = vmatpush1.bf16.msra.mxu0 %v5823_v22  ;;  %3543 = vmatprep.mubr.bf16.mxu1 %v6801_v53  ;;  %v5829_v4 = vld [vmem:[#allocation9 + $0x150] ss:$8 sps:$4 sm:$0xff]  }
 0x205   : > { %v7165_v25 = vpop.eup %5942  ;;  %v1574_v57 = vmul.f32 %v1446_v45, %v7152_v24  ;;  %v2186_v39 = vadd.f32 1.0, %v7104_v47  ;;  %v2310_v55 = vmul.f32 %v2182_v8, %v7025_v17  ;;  %v7171_v2 = vadd.f32 %v981_v14, %v6971_v49  ;;  %3006 = vmatprep.subr.bf16.mxu0 %v5828_v40 }
 0x206   : > { %v7173_v19 = vpop.eup %5944  ;;  %5954 = vtanh.f32 %v1953_v35  ;;  %v1826_v22 = vadd.f32 %v1698_v10, %v7136_v42  ;;  %v1701_v53 = vmul.f32 0.044715, %v1573_v26  ;;  %v1285_v46 = vmul.f32 0.5, %v7002_v3  ;;  %v987_v12 = vpop.f32.mrb[28].mxu1 }
 0x207   : > { %v1702_v11 = vmul.f32 0.044715, %v1574_v57  ;;  %v2314_v48 = vmul.f32 %v2186_v39, %v1290_v60  ;;  %v1449_v47 = vmul.f32 %v7171_v2, %v7171_v2  ;;  %v1289_v17 = vmul.f32 0.5, %v7012_v58  ;;  %v989_v14 = vpop.f32.mrb[29].mxu1 }
 0x208   : > { %v7180_v40 = vpop.eup %5946  ;;  %v1954_v45 = vmul.f32 0.7978846, %v1826_v22  ;;  %v1829_v8 = vadd.f32 %v1701_v53, %v7149_v41  ;;  %v2181_v35 = vadd.f32 1.0, %v7088_v43  ;;  %v2185_v10 = vadd.f32 1.0, %v7096_v44  ;;  %v991_v3 = vpop.f32.mrb[30].mxu1  ;;  %3007 = vmatpush1.bf16.msra.mxu0 %v5826_v21 }
 0x209   : > { %v1830_v60 = vadd.f32 %v1702_v11, %v7152_v24  ;;  %v2430_v26 = vpack.c.bf16 %v2314_v48, %v2310_v55  ;;  %v1577_v57 = vmul.f32 %v1449_v47, %v7171_v2  ;;  %v7188_v58 = vadd.f32 %v983_v27, %v6974_v50  ;;  %v7190_v39 = vpop.f32.mrb[31].mxu1  ;;  %3008 = vmatprep.subr.bf16.mxu0 %v5831_v51  ;;  %v5834_v22 = vld [vmem:[#allocation9 + $0x164] ss:$8 sps:$4 sm:$0xff]   ;;  %v5832_v48 = vld [vmem:[#allocation9 + $0x160] ss:$8 sps:$4 sm:$0xff]  }
 0x20a   : > { %5956 = vtanh.f32 %v1954_v45  ;;  %v1957_v53 = vmul.f32 0.7978846, %v1829_v8  ;;  %v2309_v6 = vmul.f32 %v2181_v35, %v1285_v46  ;;  %v2313_v43 = vmul.f32 %v2185_v10, %v1289_v17 }
 0x20b   : > { %v7192_v5 = vpop.eup %5948  ;;  %v1958_v44 = vmul.f32 0.7978846, %v1830_v60  ;;  %2857 = vmatprep.mubr.bf16.mxu0 %v2430_v26  ;;  %v1705_v21 = vmul.f32 0.044715, %v1577_v57  ;;  %v1450_v55 = vmul.f32 %v7188_v58, %v7188_v58  ;;  %v7197_v11 = vadd.f32 %v987_v12, %v6971_v49  ;;  %3544 = vmatmul.mubr.bf16.gmra.mrb[136].mxu1 %v6809_v61 }
 0x20c   : > { %5958 = vtanh.f32 %v1957_v53  ;;  %v2429_v27 = vpack.c.bf16 %v2313_v43, %v2309_v6  ;;  %v7201_v51 = vadd.f32 %v989_v14, %v6974_v50  ;;  %v1294_v46 = vmul.f32 0.5, %v7033_v59  ;;  %3553 = vmatprep.mubr.bf16.mxu1 %v6811_v63  ;;  %3009 = vmatpush1.bf16.msra.mxu0 %v5829_v4  ;;  %v5837_v6 = vld [vmem:[#allocation9 + $0x174] ss:$8 sps:$4 sm:$0xff]  }
 0x20d   : > { %v7205_v47 = vpop.eup %5950  ;;  %5960 = vtanh.f32 %v1958_v44  ;;  %v1833_v17 = vadd.f32 %v1705_v21, %v7171_v2  ;;  %v1578_v12 = vmul.f32 %v1450_v55, %v7188_v58  ;;  %v1453_v61 = vmul.f32 %v7197_v11, %v7197_v11  ;;  %3010 = vmatprep.subr.bf16.mxu0 %v5834_v22 }
 0x20e   : > { %v7211_v14 = vpop.eup %5952  ;;  %2858 = vmatmul.mubr.bf16.gmra.mrb[8].mxu0 %v2429_v27  ;;  %v1454_v63 = vmul.f32 %v7201_v51, %v7201_v51  ;;  %v1298_v59 = vmul.f32 0.5, %v7045_v23  ;;  %v2190_v4 = vadd.f32 1.0, %v7132_v0  ;;  %v2194_v45 = vadd.f32 1.0, %v7143_v15  ;;  %v997_v8 = vpop.f32.mrb[32].mxu1  ;;  %v5835_v27 = vld [vmem:[#allocation9 + $0x170] ss:$8 sps:$4 sm:$0xff]  }
 0x20f   : > { %v1961_v35 = vmul.f32 0.7978846, %v1833_v17  ;;  %v1706_v10 = vmul.f32 0.044715, %v1578_v12  ;;  %v1581_v60 = vmul.f32 %v1453_v61, %v7197_v11  ;;  %v7220_v26 = vadd.f32 %v991_v3, %v6971_v49  ;;  %v999_v57 = vpop.f32.mrb[33].mxu1 }
 0x210   : > { %v7222_v22 = vpop.eup %5954  ;;  %v1582_v53 = vmul.f32 %v1454_v63, %v7201_v51  ;;  %v2318_v43 = vmul.f32 %v2190_v4, %v1294_v46  ;;  %v2322_v44 = vmul.f32 %v2194_v45, %v1298_v59  ;;  %v1293_v23 = vmul.f32 0.5, %v7030_v13  ;;  %v1001_v0 = vpop.f32.mrb[34].mxu1  ;;  %3011 = vmatpush1.bf16.msra.mxu0 %v5832_v48  ;;  %v5840_v13 = vld [vmem:[#allocation9 + $0x184] ss:$8 sps:$4 sm:$0xff]  }
 0x211   : > { %5962 = vtanh.f32 %v1961_v35  ;;  %v1834_v15 = vadd.f32 %v1706_v10, %v7188_v58  ;;  %v1709_v21 = vmul.f32 0.044715, %v1581_v60  ;;  %v1457_v55 = vmul.f32 %v7220_v26, %v7220_v26  ;;  %v7229_v3 = vpop.f32.mrb[35].mxu1  ;;  %3012 = vmatprep.subr.bf16.mxu0 %v5837_v6 }
 0x212   : > { %v1710_v17 = vmul.f32 0.044715, %v1582_v53  ;;  %v2434_v12 = vpack.c.bf16 %v2322_v44, %v2318_v43  ;;  %v1297_v46 = vmul.f32 0.5, %v7039_v16  ;;  %v2189_v61 = vadd.f32 1.0, %v7127_v29 }
 0x213   : > { %v1962_v63 = vmul.f32 0.7978846, %v1834_v15  ;;  %v1837_v48 = vadd.f32 %v1709_v21, %v7197_v11  ;;  %v1585_v59 = vmul.f32 %v1457_v55, %v7220_v26  ;;  %v2193_v4 = vadd.f32 1.0, %v7138_v36  ;;  %3554 = vmatmul.mubr.bf16.gmra.mrb[140].mxu1 %v6819_v7 }
 0x214   : > { %v7237_v45 = vpop.eup %5956  ;;  %v1838_v6 = vadd.f32 %v1710_v17, %v7201_v51  ;;  %2867 = vmatprep.mubr.bf16.mxu0 %v2434_v12  ;;  %v2317_v35 = vmul.f32 %v2189_v61, %v1293_v23  ;;  %v7242_v16 = vadd.f32 %v7190_v39, %v6974_v50  ;;  %v7245_v29 = vadd.f32 %v997_v8, %v6971_v49  ;;  %v5838_v23 = vld [vmem:[#allocation9 + $0x180] ss:$8 sps:$4 sm:$0xff]   ;;  %v5843_v17 = vld [vmem:[#allocation9 + $0x194] ss:$8 sps:$4 sm:$0xff]  }
 0x215   : > { %5964 = vtanh.f32 %v1962_v63  ;;  %v1965_v10 = vmul.f32 0.7978846, %v1837_v48  ;;  %v1713_v60 = vmul.f32 0.044715, %v1585_v59  ;;  %v2321_v53 = vmul.f32 %v2193_v4, %v1297_v46  ;;  %3563 = vmatprep.mubr.bf16.mxu1 %v6821_v9  ;;  %3013 = vmatpush1.bf16.msra.mxu0 %v5835_v27 }
 0x216   : > { %v7248_v7 = vpop.eup %5958  ;;  %v1966_v36 = vmul.f32 0.7978846, %v1838_v6  ;;  %v1458_v43 = vmul.f32 %v7242_v16, %v7242_v16  ;;  %v1461_v39 = vmul.f32 %v7245_v29, %v7245_v29  ;;  %v7255_v44 = vadd.f32 %v999_v57, %v6974_v50  ;;  %v1007_v8 = vpop.f32.mrb[36].mxu1  ;;  %3014 = vmatprep.subr.bf16.mxu0 %v5840_v13 }
 0x217   : > { %v7257_v15 = vpop.eup %5960  ;;  %5966 = vtanh.f32 %v1965_v10  ;;  %v1841_v9 = vadd.f32 %v1713_v60, %v7220_v26  ;;  %v2433_v21 = vpack.c.bf16 %v2321_v53, %v2317_v35  ;;  %v1302_v55 = vmul.f32 0.5, %v7069_v34  ;;  %v1009_v27 = vpop.f32.mrb[37].mxu1  ;;  %v5841_v60 = vld [vmem:[#allocation9 + $0x190] ss:$8 sps:$4 sm:$0xff]  }
 0x218   : > { %5968 = vtanh.f32 %v1966_v36  ;;  %v1586_v12 = vmul.f32 %v1458_v43, %v7242_v16  ;;  %v1589_v46 = vmul.f32 %v1461_v39, %v7245_v29  ;;  %v1462_v57 = vmul.f32 %v7255_v44, %v7255_v44  ;;  %v7265_v61 = vpop.f32.mrb[38].mxu1 }
 0x219   : > { %v1969_v13 = vmul.f32 0.7978846, %v1841_v9  ;;  %2868 = vmatmul.mubr.bf16.gmra.mrb[12].mxu0 %v2433_v21  ;;  %v1306_v63 = vmul.f32 0.5, %v7091_v62  ;;  %v2198_v48 = vadd.f32 1.0, %v7173_v19  ;;  %v2202_v34 = vadd.f32 1.0, %v7192_v5  ;;  %v7270_v59 = vpop.f32.mrb[39].mxu1 }
 0x21a   : > { %v1714_v4 = vmul.f32 0.044715, %v1586_v12  ;;  %v1717_v6 = vmul.f32 0.044715, %v1589_v46  ;;  %v1590_v35 = vmul.f32 %v1462_v57, %v7255_v44  ;;  %v7274_v10 = vadd.f32 %v1001_v0, %v6971_v49  ;;  %3015 = vmatpush1.bf16.msra.mxu0 %v5838_v23  ;;  %v5846_v23 = vld [vmem:[#allocation9 + $0x1a4] ss:$8 sps:$4 sm:$0xff]  }
 0x21b   : > { %v7276_v53 = vpop.eup %5962  ;;  %5970 = vtanh.f32 %v1969_v13  ;;  %v2326_v36 = vmul.f32 %v2198_v48, %v1302_v55  ;;  %v2330_v62 = vmul.f32 %v2202_v34, %v1306_v63  ;;  %v1301_v19 = vmul.f32 0.5, %v7064_v33  ;;  %3564 = vmatmul.mubr.bf16.gmra.mrb[144].mxu1 %v6829_v18  ;;  %3016 = vmatprep.subr.bf16.mxu0 %v5843_v17  ;;  %v5844_v18 = vld [vmem:[#allocation9 + $0x1a0] ss:$8 sps:$4 sm:$0xff]   ;;  %v5849_v34 = vld [vmem:[#allocation9 + $0x1b4] ss:$8 sps:$4 sm:$0xff]  }
 0x21c   : > { %v1842_v5 = vadd.f32 %v1714_v4, %v7242_v16  ;;  %v1845_v43 = vadd.f32 %v1717_v6, %v7245_v29  ;;  %v1718_v39 = vmul.f32 0.044715, %v1590_v35  ;;  %v1465_v0 = vmul.f32 %v7274_v10, %v7274_v10  ;;  %3573 = vmatprep.mubr.bf16.mxu1 %v6831_v20 }
 0x21d   : > { %v2438_v9 = vpack.c.bf16 %v2330_v62, %v2326_v36  ;;  %v1305_v21 = vmul.f32 0.5, %v7079_v1  ;;  %v2197_v55 = vadd.f32 1.0, %v7165_v25  ;;  %v2201_v33 = vadd.f32 1.0, %v7180_v40 }
 0x21e   : > { %v1970_v17 = vmul.f32 0.7978846, %v1842_v5  ;;  %v1973_v12 = vmul.f32 0.7978846, %v1845_v43  ;;  %v1846_v46 = vadd.f32 %v1718_v39, %v7255_v44  ;;  %v1593_v57 = vmul.f32 %v1465_v0, %v7274_v10  ;;  %v7290_v13 = vpop.f32.mrb[40].mxu1  ;;  %3017 = vmatpush1.bf16.msra.mxu0 %v5841_v60 }
 0x21f   : > { %v7292_v63 = vpop.eup %5964  ;;  %2877 = vmatprep.mubr.bf16.mxu0 %v2438_v9  ;;  %v2325_v20 = vmul.f32 %v2197_v55, %v1301_v19  ;;  %v2329_v48 = vmul.f32 %v2201_v33, %v1305_v21  ;;  %v7296_v1 = vadd.f32 %v7229_v3, %v6974_v50  ;;  %v7299_v25 = vadd.f32 %v1007_v8, %v6971_v49  ;;  %v7301_v40 = vpop.f32.mrb[41].mxu1  ;;  %v5847_v0 = vld [vmem:[#allocation9 + $0x1b0] ss:$8 sps:$4 sm:$0xff]   ;;  %v5852_v33 = vld [vmem:[#allocation9 + $0x1c4] ss:$8 sps:$4 sm:$0xff]  }
 0x220   : > { %5972 = vtanh.f32 %v1970_v17  ;;  %v1974_v4 = vmul.f32 0.7978846, %v1846_v46  ;;  %v1721_v6 = vmul.f32 0.044715, %v1593_v57  ;;  %v7304_v35 = vadd.f32 %v1009_v27, %v6974_v50  ;;  %v7306_v60 = vpop.f32.mrb[42].mxu1  ;;  %3018 = vmatprep.subr.bf16.mxu0 %v5846_v23 }
 0x221   : > { %v7308_v36 = vpop.eup %5966  ;;  %5974 = vtanh.f32 %v1973_v12  ;;  %v2437_v3 = vpack.c.bf16 %v2329_v48, %v2325_v20  ;;  %v1466_v8 = vmul.f32 %v7296_v1, %v7296_v1  ;;  %v1469_v62 = vmul.f32 %v7299_v25, %v7299_v25  ;;  %v7314_v19 = vpop.f32.mrb[43].mxu1 }
 0x222   : > { %v7316_v5 = vpop.eup %5968  ;;  %5976 = vtanh.f32 %v1974_v4  ;;  %v1849_v27 = vadd.f32 %v1721_v6, %v7274_v10  ;;  %v1470_v43 = vmul.f32 %v7304_v35, %v7304_v35  ;;  %v1310_v39 = vmul.f32 0.5, %v7108_v56  ;;  %3019 = vmatpush1.bf16.msra.mxu0 %v5844_v18 }
 0x223   : > { %2878 = vmatmul.mubr.bf16.gmra.mrb[16].mxu0 %v2437_v3  ;;  %v1594_v23 = vmul.f32 %v1466_v8, %v7296_v1  ;;  %v1597_v9 = vmul.f32 %v1469_v62, %v7299_v25  ;;  %v1314_v21 = vmul.f32 0.5, %v7136_v42  ;;  %v2206_v55 = vadd.f32 1.0, %v7211_v14  ;;  %3574 = vmatmul.mubr.bf16.gmra.mrb[148].mxu1 %v6839_v28 }
 0x224   : > { %v1977_v17 = vmul.f32 0.7978846, %v1849_v27  ;;  %v1598_v12 = vmul.f32 %v1470_v43, %v7304_v35  ;;  %v2210_v46 = vadd.f32 1.0, %v7237_v45  ;;  %v7331_v56 = vadd.f32 %v7265_v61, %v6971_v49  ;;  %3583 = vmatprep.mubr.bf16.mxu1 %v6841_v30  ;;  %3020 = vmatprep.subr.bf16.mxu0 %v5849_v34  ;;  %v5850_v61 = vld [vmem:[#allocation9 + $0x1c0] ss:$8 sps:$4 sm:$0xff]  }
 0x225   : > { %v7334_v18 = vpop.eup %5970  ;;  %v1722_v42 = vmul.f32 0.044715, %v1594_v23  ;;  %v1725_v57 = vmul.f32 0.044715, %v1597_v9  ;;  %v2334_v14 = vmul.f32 %v2206_v55, %v1310_v39  ;;  %v1309_v28 = vmul.f32 0.5, %v7102_v32 }
 0x226   : > { %5978 = vtanh.f32 %v1977_v17  ;;  %v1726_v20 = vmul.f32 0.044715, %v1598_v12  ;;  %v2338_v48 = vmul.f32 %v2210_v46, %v1314_v21  ;;  %v1473_v45 = vmul.f32 %v7331_v56, %v7331_v56  ;;  %v7339_v4 = vpop.f32.mrb[44].mxu1  ;;  %3021 = vmatpush1.bf16.msra.mxu0 %v5847_v0  ;;  %v5855_v32 = vld [vmem:[#allocation9 + $0x1d4] ss:$8 sps:$4 sm:$0xff]  }
 0x227   : > { %v1850_v30 = vadd.f32 %v1722_v42, %v7296_v1  ;;  %v1853_v34 = vadd.f32 %v1725_v57, %v7299_v25  ;;  %v1313_v6 = vmul.f32 0.5, %v7119_v31  ;;  %v2205_v3 = vadd.f32 1.0, %v7205_v47  ;;  %v7345_v8 = vpop.f32.mrb[45].mxu1  ;;  %3022 = vmatprep.subr.bf16.mxu0 %v5852_v33 }
 0x228   : > { %v1854_v62 = vadd.f32 %v1726_v20, %v7304_v35  ;;  %v2442_v27 = vpack.c.bf16 %v2338_v48, %v2334_v14  ;;  %v1601_v43 = vmul.f32 %v1473_v45, %v7331_v56  ;;  %v2209_v39 = vadd.f32 1.0, %v7222_v22  ;;  %v7350_v0 = vpop.f32.mrb[46].mxu1  ;;  %v5853_v14 = vld [vmem:[#allocation9 + $0x1d0] ss:$8 sps:$4 sm:$0xff]   ;;  %v5858_v45 = vld [vmem:[#allocation9 + $0x1e4] ss:$8 sps:$4 sm:$0xff]  }
 0x229   : > { %v1978_v23 = vmul.f32 0.7978846, %v1850_v30  ;;  %v1981_v9 = vmul.f32 0.7978846, %v1853_v34  ;;  %v2333_v21 = vmul.f32 %v2205_v3, %v1309_v28  ;;  %v7354_v31 = vadd.f32 %v7270_v59, %v6974_v50  ;;  %v7356_v47 = vpop.f32.mrb[47].mxu1 }
 0x22a   : > { %v7358_v55 = vpop.eup %5972  ;;  %v1982_v33 = vmul.f32 0.7978846, %v1854_v62  ;;  %2887 = vmatprep.mubr.bf16.mxu0 %v2442_v27  ;;  %v1729_v17 = vmul.f32 0.044715, %v1601_v43  ;;  %v2337_v12 = vmul.f32 %v2209_v39, %v1313_v6  ;;  %v7362_v22 = vadd.f32 %v7290_v13, %v6971_v49  ;;  %3023 = vmatpush1.bf16.msra.mxu0 %v5850_v61  ;;  %v5856_v43 = vld [vmem:[#allocation9 + $0x1e0] ss:$8 sps:$4 sm:$0xff]  }
 0x22b   : > { %v7364_v46 = vpop.eup %5974  ;;  %5980 = vtanh.f32 %v1978_v23  ;;  %v1474_v59 = vmul.f32 %v7354_v31, %v7354_v31  ;;  %v7370_v42 = vadd.f32 %v7301_v40, %v6974_v50  ;;  %v1318_v57 = vmul.f32 0.5, %v7152_v24  ;;  %3584 = vmatmul.mubr.bf16.gmra.mrb[152].mxu1 %v6849_v37  ;;  %3024 = vmatprep.subr.bf16.mxu0 %v5855_v32 }
 0x22c   : > { %v7374_v28 = vpop.eup %5976  ;;  %5982 = vtanh.f32 %v1981_v9  ;;  %v1857_v13 = vadd.f32 %v1729_v17, %v7331_v56  ;;  %v2441_v20 = vpack.c.bf16 %v2337_v12, %v2333_v21  ;;  %v1477_v48 = vmul.f32 %v7362_v22, %v7362_v22  ;;  %3593 = vmatprep.mubr.bf16.mxu1 %v6851_v38  ;;  %v5861_v12 = vld [vmem:[#allocation9 + $0x1f4] ss:$8 sps:$4 sm:$0xff]  }
 0x22d   : > { %5984 = vtanh.f32 %v1982_v33  ;;  %v1602_v40 = vmul.f32 %v1474_v59, %v7354_v31  ;;  %v1478_v37 = vmul.f32 %v7370_v42, %v7370_v42  ;;  %v1322_v24 = vmul.f32 0.5, %v7188_v58 }
 0x22e   : > { %v1985_v61 = vmul.f32 0.7978846, %v1857_v13  ;;  %2888 = vmatmul.mubr.bf16.gmra.mrb[20].mxu0 %v2441_v20  ;;  %v1605_v30 = vmul.f32 %v1477_v48, %v7362_v22  ;;  %v2214_v34 = vadd.f32 1.0, %v7257_v15  ;;  %v2218_v6 = vadd.f32 1.0, %v7292_v63  ;;  %v7387_v3 = vpop.f32.mrb[48].mxu1 }
 0x22f   : > { %v1730_v38 = vmul.f32 0.044715, %v1602_v40  ;;  %v1606_v32 = vmul.f32 %v1478_v37, %v7370_v42  ;;  %v7392_v62 = vadd.f32 %v7306_v60, %v6971_v49  ;;  %v1317_v27 = vmul.f32 0.5, %v7149_v41  ;;  %v7395_v58 = vpop.f32.mrb[49].mxu1  ;;  %3025 = vmatpush1.bf16.msra.mxu0 %v5853_v14 }
 0x230   : > { %v7397_v39 = vpop.eup %5978  ;;  %5986 = vtanh.f32 %v1985_v61  ;;  %v1733_v15 = vmul.f32 0.044715, %v1605_v30  ;;  %v2342_v63 = vmul.f32 %v2214_v34, %v1318_v57  ;;  %v2346_v23 = vmul.f32 %v2218_v6, %v1322_v24  ;;  %v7399_v9 = vpop.f32.mrb[50].mxu1  ;;  %3026 = vmatprep.subr.bf16.mxu0 %v5858_v45 }
 0x231   : > { %v1858_v21 = vadd.f32 %v1730_v38, %v7354_v31  ;;  %v1734_v33 = vmul.f32 0.044715, %v1606_v32  ;;  %v1481_v60 = vmul.f32 %v7392_v62, %v7392_v62  ;;  %v1321_v41 = vmul.f32 0.5, %v7171_v2  ;;  %v7405_v17 = vpop.f32.mrb[51].mxu1  ;;  %v5859_v2 = vld [vmem:[#allocation9 + $0x1f0] ss:$8 sps:$4 sm:$0xff]  }
 0x232   : > { %v1861_v59 = vadd.f32 %v1733_v15, %v7362_v22  ;;  %v2446_v14 = vpack.c.bf16 %v2346_v23, %v2342_v63  ;;  %v2213_v57 = vadd.f32 1.0, %v7248_v7  ;;  %v2217_v13 = vadd.f32 1.0, %v7276_v53  ;;  %v5864_v53 = vld [vmem:[#allocation9 + $0x204] ss:$8 sps:$4 sm:$0xff]  }
 0x233   : > { %v1986_v20 = vmul.f32 0.7978846, %v1858_v21  ;;  %v1862_v48 = vadd.f32 %v1734_v33, %v7370_v42  ;;  %v1609_v45 = vmul.f32 %v1481_v60, %v7392_v62  ;;  %v7414_v40 = vadd.f32 %v7314_v19, %v6974_v50  ;;  %3594 = vmatmul.mubr.bf16.gmra.mrb[156].mxu1 %v6859_v52  ;;  %3027 = vmatpush1.bf16.msra.mxu0 %v5856_v43 }
 0x234   : > { %v1989_v37 = vmul.f32 0.7978846, %v1861_v59  ;;  %2897 = vmatprep.mubr.bf16.mxu0 %v2446_v14  ;;  %v2341_v24 = vmul.f32 %v2213_v57, %v1317_v27  ;;  %v2345_v61 = vmul.f32 %v2217_v13, %v1321_v41  ;;  %v7419_v7 = vadd.f32 %v7339_v4, %v6971_v49  ;;  %3603 = vmatprep.mubr.bf16.mxu1 %v6861_v54 }
 0x235   : > { %v7422_v30 = vpop.eup %5980  ;;  %5988 = vtanh.f32 %v1986_v20  ;;  %v1990_v19 = vmul.f32 0.7978846, %v1862_v48  ;;  %v1737_v34 = vmul.f32 0.044715, %v1609_v45  ;;  %v1482_v52 = vmul.f32 %v7414_v40, %v7414_v40  ;;  %3028 = vmatprep.subr.bf16.mxu0 %v5861_v12 }
 0x236   : > { %v7426_v6 = vpop.eup %5982  ;;  %5990 = vtanh.f32 %v1989_v37  ;;  %v2445_v38 = vpack.c.bf16 %v2345_v61, %v2341_v24  ;;  %v1485_v4 = vmul.f32 %v7419_v7, %v7419_v7  ;;  %v7432_v54 = vadd.f32 %v7345_v8, %v6974_v50  ;;  %v7434_v32 = vpop.f32.mrb[52].mxu1  ;;  %v9782_v37 = vld [vmem:[#allocation21_spill] sm:$0xff] }
 0x237   : > { %v7436_v27 = vpop.eup %5984  ;;  %5992 = vtanh.f32 %v1990_v19  ;;  %v1865_v43 = vadd.f32 %v1737_v34, %v7392_v62  ;;  %v1610_v15 = vmul.f32 %v1482_v52, %v7414_v40  ;;  %v1326_v63 = vmul.f32 0.5, %v7201_v51  ;;  %v7441_v23 = vpop.f32.mrb[53].mxu1  ;;  %3029 = vmatpush1.bf16.msra.mxu0 %v5859_v2  ;;  %v9783_v19 = vld [vmem:[#allocation22_spill] sm:$0xff] }
 0x238   : > { %2898 = vmatmul.mubr.bf16.gmra.mrb[24].mxu0 %v2445_v38  ;;  %v1613_v21 = vmul.f32 %v1485_v4, %v7419_v7  ;;  %v1486_v8 = vmul.f32 %v7432_v54, %v7432_v54  ;;  %v1330_v33 = vmul.f32 0.5, %v7242_v16  ;;  %v2222_v60 = vadd.f32 1.0, %v7316_v5  ;;  %v7448_v41 = vpop.f32.mrb[54].mxu1  ;;  %4452 = vmatprep.subr.bf16.mxu0 %v5864_v53 }
 0x239   : > { %v1993_v12 = vmul.f32 0.7978846, %v1865_v43  ;;  %v1738_v59 = vmul.f32 0.044715, %v1610_v15  ;;  %v2226_v51 = vadd.f32 1.0, %v7358_v55  ;;  %v7453_v14 = vadd.f32 %v7350_v0, %v6971_v49  ;;  %v7455_v57 = vpop.f32.mrb[55].mxu1 }
 0x23a   : > { %v7457_v13 = vpop.eup %5986  ;;  %v1741_v20 = vmul.f32 0.044715, %v1613_v21  ;;  %v1614_v16 = vmul.f32 %v1486_v8, %v7432_v54  ;;  %v2350_v48 = vmul.f32 %v2222_v60, %v1326_v63  ;;  %v1325_v5 = vmul.f32 0.5, %v7197_v11 }
 0x23b   : > { %5994 = vtanh.f32 %v1993_v12  ;;  %v1866_v45 = vadd.f32 %v1738_v59, %v7414_v40  ;;  %v2354_v2 = vmul.f32 %v2226_v51, %v1330_v33  ;;  %v1489_v55 = vmul.f32 %v7453_v14, %v7453_v14  ;;  %3604 = vmatmul.mubr.bf16.gmra.mrb[160].mxu1 %v9782_v37 }
 0x23c   : > { %v1869_v0 = vadd.f32 %v1741_v20, %v7419_v7  ;;  %v1742_v24 = vmul.f32 0.044715, %v1614_v16  ;;  %v1329_v61 = vmul.f32 0.5, %v7220_v26  ;;  %v2221_v53 = vadd.f32 1.0, %v7308_v36  ;;  %3613 = vmatprep.mubr.bf16.mxu1 %v9783_v19 }
 0x23d   : > { %v1994_v34 = vmul.f32 0.7978846, %v1866_v45  ;;  %v2450_v11 = vpack.c.bf16 %v2354_v2, %v2350_v48  ;;  %v1617_v52 = vmul.f32 %v1489_v55, %v7453_v14  ;;  %v2225_v38 = vadd.f32 1.0, %v7334_v18 }
 0x23e   : > { %v1997_v4 = vmul.f32 0.7978846, %v1869_v0  ;;  %v1870_v43 = vadd.f32 %v1742_v24, %v7432_v54  ;;  %v2349_v15 = vmul.f32 %v2221_v53, %v1325_v5  ;;  %v7474_v63 = vadd.f32 %v7356_v47, %v6974_v50  ;;  %v7476_v21 = vpop.f32.mrb[56].mxu1  ;;  %v9784_v53 = vld [vmem:[#allocation23_spill] sm:$0xff] }
 0x23f   : > { %v7478_v26 = vpop.eup %5988  ;;  %5996 = vtanh.f32 %v1994_v34  ;;  %2907 = vmatprep.mubr.bf16.mxu0 %v2450_v11  ;;  %v1745_v36 = vmul.f32 0.044715, %v1617_v52  ;;  %v2353_v8 = vmul.f32 %v2225_v38, %v1329_v61  ;;  %v7482_v33 = vadd.f32 %v7387_v3, %v6971_v49  ;;  %v7484_v18 = vpop.f32.mrb[57].mxu1 }
 0x240   : > { %v7486_v60 = vpop.eup %5990  ;;  %5998 = vtanh.f32 %v1997_v4  ;;  %v1998_v12 = vmul.f32 0.7978846, %v1870_v43  ;;  %v1490_v47 = vmul.f32 %v7474_v63, %v7474_v63  ;;  %v7492_v59 = vadd.f32 %v7395_v58, %v6974_v50  ;;  %v7494_v51 = vpop.f32.mrb[58].mxu1 }
 0x241   : > { %v7496_v20 = vpop.eup %5992  ;;  %v1873_v3 = vadd.f32 %v1745_v36, %v7453_v14  ;;  %v2449_v16 = vpack.c.bf16 %v2353_v8, %v2349_v15  ;;  %v1493_v48 = vmul.f32 %v7482_v33, %v7482_v33  ;;  %v1334_v5 = vmul.f32 0.5, %v7255_v44  ;;  %v7502_v45 = vpop.f32.mrb[59].mxu1 }
 0x242   : > { %6000 = vtanh.f32 %v1998_v12  ;;  %v1618_v2 = vmul.f32 %v1490_v47, %v7474_v63  ;;  %v1494_v58 = vmul.f32 %v7492_v59, %v7492_v59  ;;  %v1338_v55 = vmul.f32 0.5, %v7296_v1  ;;  %v9785_v1 = vld [vmem:[#allocation24_spill] sm:$0xff] }
 0x243   : > { %v2001_v37 = vmul.f32 0.7978846, %v1873_v3  ;;  %2908 = vmatmul.mubr.bf16.gmra.mrb[28].mxu0 %v2449_v16  ;;  %v1621_v0 = vmul.f32 %v1493_v48, %v7482_v33  ;;  %v2230_v24 = vadd.f32 1.0, %v7374_v28  ;;  %v2234_v61 = vadd.f32 1.0, %v7422_v30  ;;  %3614 = vmatmul.mubr.bf16.gmra.mrb[164].mxu1 %v9784_v53 }
 0x244   : > { %v1746_v44 = vmul.f32 0.044715, %v1618_v2  ;;  %v1622_v19 = vmul.f32 %v1494_v58, %v7492_v59  ;;  %v7515_v34 = vadd.f32 %v7399_v9, %v6971_v49  ;;  %v1333_v11 = vmul.f32 0.5, %v7245_v29  ;;  %3623 = vmatprep.mubr.bf16.mxu1 %v9785_v1 }
 0x245   : > { %v7519_v52 = vpop.eup %5994  ;;  %6002 = vtanh.f32 %v2001_v37  ;;  %v1749_v38 = vmul.f32 0.044715, %v1621_v0  ;;  %v2358_v28 = vmul.f32 %v2230_v24, %v1334_v5  ;;  %v2362_v4 = vmul.f32 %v2234_v61, %v1338_v55 }
 0x246   : > { %v1874_v30 = vadd.f32 %v1746_v44, %v7474_v63  ;;  %v1750_v43 = vmul.f32 0.044715, %v1622_v19  ;;  %v1497_v15 = vmul.f32 %v7515_v34, %v7515_v34  ;;  %v1337_v36 = vmul.f32 0.5, %v7274_v10  ;;  %v7525_v9 = vpop.f32.mrb[60].mxu1 }
 0x247   : > { %v1877_v29 = vadd.f32 %v1749_v38, %v7482_v33  ;;  %v2454_v8 = vpack.c.bf16 %v2362_v4, %v2358_v28  ;;  %v2229_v12 = vadd.f32 1.0, %v7364_v46  ;;  %v2233_v47 = vadd.f32 1.0, %v7397_v39  ;;  %v7530_v3 = vpop.f32.mrb[61].mxu1 }
 0x248   : > { %v2002_v16 = vmul.f32 0.7978846, %v1874_v30  ;;  %v1878_v48 = vadd.f32 %v1750_v43, %v7492_v59  ;;  %v1625_v5 = vmul.f32 %v1497_v15, %v7515_v34  ;;  %v7536_v2 = vadd.f32 %v7405_v17, %v6974_v50  ;;  %v7538_v10 = vpop.f32.mrb[62].mxu1  ;;  %v9787_v30 = vld [vmem:[#allocation26_spill] sm:$0xff] }
 0x249   : > { %v7540_v58 = vpop.eup %5996  ;;  %v2005_v55 = vmul.f32 0.7978846, %v1877_v29  ;;  %2917 = vmatprep.mubr.bf16.mxu0 %v2454_v8  ;;  %v2357_v46 = vmul.f32 %v2229_v12, %v1333_v11  ;;  %v2361_v37 = vmul.f32 %v2233_v47, %v1337_v36  ;;  %v7544_v39 = vadd.f32 %v7434_v32, %v6971_v49  ;;  %v7546_v0 = vpop.f32.mrb[63].mxu1  ;;  %v9786_v32 = vld [vmem:[#allocation25_spill] sm:$0xff] }
 0x24a   : > { %v7548_v24 = vpop.eup %5998  ;;  %6004 = vtanh.f32 %v2002_v16  ;;  %v2006_v61 = vmul.f32 0.7978846, %v1878_v48  ;;  %v1753_v17 = vmul.f32 0.044715, %v1625_v5  ;;  %v1498_v53 = vmul.f32 %v7536_v2, %v7536_v2 }
 0x24b   : > { %6006 = vtanh.f32 %v2005_v55  ;;  %v2453_v44 = vpack.c.bf16 %v2361_v37, %v2357_v46  ;;  %v1501_v19 = vmul.f32 %v7544_v39, %v7544_v39  ;;  %v7556_v11 = vadd.f32 %v7441_v23, %v6974_v50  ;;  %3624 = vmatmul.mubr.bf16.gmra.mrb[168].mxu1 %v9786_v32 }
 0x24c   : > { %v7559_v1 = vpop.eup %6000  ;;  %6008 = vtanh.f32 %v2006_v61  ;;  %v1881_v38 = vadd.f32 %v1753_v17, %v7515_v34  ;;  %v1626_v28 = vmul.f32 %v1498_v53, %v7536_v2  ;;  %v1342_v4 = vmul.f32 0.5, %v7304_v35  ;;  %3633 = vmatprep.mubr.bf16.mxu1 %v9787_v30 }
 0x24d   : > { %2918 = vmatmul.mubr.bf16.gmra.mrb[32].mxu0 %v2453_v44  ;;  %v1629_v43 = vmul.f32 %v1501_v19, %v7544_v39  ;;  %v1502_v23 = vmul.f32 %v7556_v11, %v7556_v11  ;;  %v1346_v15 = vmul.f32 0.5, %v7354_v31  ;;  %v2238_v36 = vadd.f32 1.0, %v7436_v27 }
 0x24e   : > { %v2009_v29 = vmul.f32 0.7978846, %v1881_v38  ;;  %v1754_v8 = vmul.f32 0.044715, %v1626_v28  ;;  %v2242_v12 = vadd.f32 1.0, %v7478_v26  ;;  %v7573_v47 = vadd.f32 %v7448_v41, %v6971_v49  ;;  %v7575_v35 = vpop.f32.mrb[64].mxu1 }
 0x24f   : > { %v7577_v16 = vpop.eup %6002  ;;  %v1757_v48 = vmul.f32 0.044715, %v1629_v43  ;;  %v1630_v5 = vmul.f32 %v1502_v23, %v7556_v11  ;;  %v2366_v55 = vmul.f32 %v2238_v36, %v1342_v4  ;;  %v1341_v31 = vmul.f32 0.5, %v7299_v25  ;;  %v7581_v46 = vpop.f32.mrb[65].mxu1 }
 0x250   : > { %6010 = vtanh.f32 %v2009_v29  ;;  %v1882_v27 = vadd.f32 %v1754_v8, %v7536_v2  ;;  %v2370_v26 = vmul.f32 %v2242_v12, %v1346_v15  ;;  %v1505_v41 = vmul.f32 %v7573_v47, %v7573_v47  ;;  %v7586_v37 = vpop.f32.mrb[66].mxu1  ;;  %v9788_v15 = vld [vmem:[#allocation27_spill] sm:$0xff] }
 0x251   : > { %v1885_v61 = vadd.f32 %v1757_v48, %v7544_v39  ;;  %v1758_v17 = vmul.f32 0.044715, %v1630_v5  ;;  %v1345_v53 = vmul.f32 0.5, %v7331_v56  ;;  %v2237_v44 = vadd.f32 1.0, %v7426_v6  ;;  %v7591_v19 = vpop.f32.mrb[67].mxu1 }
 0x252   : > { %v2010_v25 = vmul.f32 0.7978846, %v1882_v27  ;;  %v2458_v32 = vpack.c.bf16 %v2370_v26, %v2366_v55  ;;  %v1633_v38 = vmul.f32 %v1505_v41, %v7573_v47  ;;  %v2241_v28 = vadd.f32 1.0, %v7457_v13  ;;  %v9789_v13 = vld [vmem:[#allocation28_spill] sm:$0xff] }
 0x253   : > { %v2013_v4 = vmul.f32 0.7978846, %v1885_v61  ;;  %v1886_v30 = vadd.f32 %v1758_v17, %v7556_v11  ;;  %v2365_v43 = vmul.f32 %v2237_v44, %v1341_v31  ;;  %v7598_v23 = vadd.f32 %v7455_v57, %v6974_v50  ;;  %3634 = vmatmul.mubr.bf16.gmra.mrb[172].mxu1 %v9788_v15 }
 0x254   : > { %v7601_v56 = vpop.eup %6004  ;;  %6012 = vtanh.f32 %v2010_v25  ;;  %2927 = vmatprep.mubr.bf16.mxu0 %v2458_v32  ;;  %v1761_v6 = vmul.f32 0.044715, %v1633_v38  ;;  %v2369_v36 = vmul.f32 %v2241_v28, %v1345_v53  ;;  %v7605_v29 = vadd.f32 %v7476_v21, %v6971_v49  ;;  %3643 = vmatprep.mubr.bf16.mxu1 %v9789_v13 }
 0x255   : > { %v7608_v8 = vpop.eup %6006  ;;  %6014 = vtanh.f32 %v2013_v4  ;;  %v2014_v12 = vmul.f32 0.7978846, %v1886_v30  ;;  %v1506_v57 = vmul.f32 %v7598_v23, %v7598_v23  ;;  %v7614_v48 = vadd.f32 %v7484_v18, %v6974_v50 }
 0x256   : > { %v7616_v5 = vpop.eup %6008  ;;  %v1889_v55 = vadd.f32 %v1761_v6, %v7573_v47  ;;  %v2457_v31 = vpack.c.bf16 %v2369_v36, %v2365_v43  ;;  %v1509_v21 = vmul.f32 %v7605_v29, %v7605_v29  ;;  %v1350_v27 = vmul.f32 0.5, %v7370_v42  ;;  %v7622_v26 = vpop.f32.mrb[68].mxu1 }
 0x257   : > { %6016 = vtanh.f32 %v2014_v12  ;;  %v1634_v41 = vmul.f32 %v1506_v57, %v7598_v23  ;;  %v1510_v61 = vmul.f32 %v7614_v48, %v7614_v48  ;;  %v1354_v18 = vmul.f32 0.5, %v7414_v40  ;;  %v7628_v17 = vpop.f32.mrb[69].mxu1 }
 0x258   : > { %v2017_v53 = vmul.f32 0.7978846, %v1889_v55  ;;  %2928 = vmatmul.mubr.bf16.gmra.mrb[36].mxu0 %v2457_v31  ;;  %v1637_v44 = vmul.f32 %v1509_v21, %v7605_v29  ;;  %v2246_v25 = vadd.f32 1.0, %v7496_v20  ;;  %v2250_v42 = vadd.f32 1.0, %v7540_v58  ;;  %v7633_v32 = vpop.f32.mrb[70].mxu1  ;;  %v9791_v21 = vld [vmem:[#allocation30_spill] sm:$0xff] }
 0x259   : > { %v1762_v38 = vmul.f32 0.044715, %v1634_v41  ;;  %v1638_v28 = vmul.f32 %v1510_v61, %v7614_v48  ;;  %v7638_v4 = vadd.f32 %v7494_v51, %v6971_v49  ;;  %v1349_v40 = vmul.f32 0.5, %v7362_v22  ;;  %v7641_v30 = vpop.f32.mrb[71].mxu1  ;;  %v9790_v51 = vld [vmem:[#allocation29_spill] sm:$0xff] }
 0x25a   : > { %v7643_v43 = vpop.eup %6010  ;;  %6018 = vtanh.f32 %v2017_v53  ;;  %v1765_v15 = vmul.f32 0.044715, %v1637_v44  ;;  %v2374_v20 = vmul.f32 %v2246_v25, %v1350_v27  ;;  %v2378_v6 = vmul.f32 %v2250_v42, %v1354_v18 }
 0x25b   : > { %v1890_v58 = vadd.f32 %v1762_v38, %v7598_v23  ;;  %v1766_v36 = vmul.f32 0.044715, %v1638_v28  ;;  %v1513_v13 = vmul.f32 %v7638_v4, %v7638_v4  ;;  %v1353_v12 = vmul.f32 0.5, %v7392_v62  ;;  %3644 = vmatmul.mubr.bf16.gmra.mrb[176].mxu1 %v9790_v51 }
 0x25c   : > { %v1893_v22 = vadd.f32 %v1765_v15, %v7605_v29  ;;  %v2462_v57 = vpack.c.bf16 %v2378_v6, %v2374_v20  ;;  %v2245_v55 = vadd.f32 1.0, %v7486_v60  ;;  %v2249_v31 = vadd.f32 1.0, %v7519_v52  ;;  %3653 = vmatprep.mubr.bf16.mxu1 %v9791_v21 }
 0x25d   : > { %v2018_v27 = vmul.f32 0.7978846, %v1890_v58  ;;  %v1894_v41 = vadd.f32 %v1766_v36, %v7614_v48  ;;  %v1641_v61 = vmul.f32 %v1513_v13, %v7638_v4  ;;  %v7658_v18 = vadd.f32 %v7502_v45, %v6974_v50 }
 0x25e   : > { %v7660_v62 = vpop.eup %6012  ;;  %v2021_v53 = vmul.f32 0.7978846, %v1893_v22  ;;  %2937 = vmatprep.mubr.bf16.mxu0 %v2462_v57  ;;  %v2373_v44 = vmul.f32 %v2245_v55, %v1349_v40  ;;  %v2377_v25 = vmul.f32 %v2249_v31, %v1353_v12  ;;  %v7664_v60 = vadd.f32 %v7525_v9, %v6971_v49  ;;  %v7666_v52 = vpop.f32.mrb[72].mxu1 }
 0x25f   : > { %v7668_v42 = vpop.eup %6014  ;;  %6020 = vtanh.f32 %v2018_v27  ;;  %v2022_v38 = vmul.f32 0.7978846, %v1894_v41  ;;  %v1769_v28 = vmul.f32 0.044715, %v1641_v61  ;;  %v1514_v45 = vmul.f32 %v7658_v18, %v7658_v18  ;;  %v7672_v15 = vpop.f32.mrb[73].mxu1 }
 0x260   : > { %6022 = vtanh.f32 %v2021_v53  ;;  %v2461_v20 = vpack.c.bf16 %v2377_v25, %v2373_v44  ;;  %v1517_v40 = vmul.f32 %v7664_v60, %v7664_v60  ;;  %v7678_v9 = vadd.f32 %v7530_v3, %v6974_v50  ;;  %v7680_v6 = vpop.f32.mrb[74].mxu1 }
 0x261   : > { %v7682_v58 = vpop.eup %6016  ;;  %6024 = vtanh.f32 %v2022_v38  ;;  %v1897_v36 = vadd.f32 %v1769_v28, %v7638_v4  ;;  %v1642_v13 = vmul.f32 %v1514_v45, %v7658_v18  ;;  %v1358_v12 = vmul.f32 0.5, %v7432_v54  ;;  %v7687_v51 = vpop.f32.mrb[75].mxu1  ;;  %v9792_v54 = vld [vmem:[#allocation31_spill] sm:$0xff]  ;;  %v9793_v38 = vld [vmem:[#allocation32_spill] sm:$0xff] }
 0x262   : > { %2938 = vmatmul.mubr.bf16.gmra.mrb[40].mxu0 %v2461_v20  ;;  %v1645_v22 = vmul.f32 %v1517_v40, %v7664_v60  ;;  %v1518_v3 = vmul.f32 %v7678_v9, %v7678_v9  ;;  %v1362_v57 = vmul.f32 0.5, %v7474_v63  ;;  %v2254_v55 = vadd.f32 1.0, %v7559_v1 }
 0x263   : > { %v2025_v31 = vmul.f32 0.7978846, %v1897_v36  ;;  %v1770_v21 = vmul.f32 0.044715, %v1642_v13  ;;  %v2258_v27 = vadd.f32 1.0, %v7601_v56  ;;  %v7697_v41 = vadd.f32 %v7538_v10, %v6971_v49  ;;  %3654 = vmatmul.mubr.bf16.gmra.mrb[180].mxu1 %v9792_v54  ;;  %v9794_v54 = vld [vmem:[#allocation36_spill] sm:$0xff] }
 0x264   : > { %v7700_v61 = vpop.eup %6018  ;;  %v1773_v53 = vmul.f32 0.044715, %v1645_v22  ;;  %v1646_v44 = vmul.f32 %v1518_v3, %v7678_v9  ;;  %v2382_v25 = vmul.f32 %v2254_v55, %v1358_v12  ;;  %v1357_v63 = vmul.f32 0.5, %v7419_v7  ;;  %3663 = vmatprep.mubr.bf16.mxu1 %v9793_v38 }
 0x265   : > { %6026 = vtanh.f32 %v2025_v31  ;;  %v1898_v1 = vadd.f32 %v1770_v21, %v7658_v18  ;;  %v2386_v56 = vmul.f32 %v2258_v27, %v1362_v57  ;;  %v1521_v49 = vmul.f32 %v7697_v41, %v7697_v41 }
 0x266   : > { %v1901_v10 = vadd.f32 %v1773_v53, %v7664_v60  ;;  %v1774_v28 = vmul.f32 0.044715, %v1646_v44  ;;  %v1361_v45 = vmul.f32 0.5, %v7453_v14  ;;  %v2253_v20 = vadd.f32 1.0, %v7548_v24  ;;  %v7711_v40 = vpop.f32.mrb[76].mxu1 }
 0x267   : > { %v2026_v36 = vmul.f32 0.7978846, %v1898_v1  ;;  %v2466_v7 = vpack.c.bf16 %v2386_v56, %v2382_v25  ;;  %v1649_v13 = vmul.f32 %v1521_v49, %v7697_v41  ;;  %v2257_v12 = vadd.f32 1.0, %v7577_v16  ;;  %v7715_v22 = vpop.f32.mrb[77].mxu1  ;;  %v6294_v56 = vld [vmem:[#allocation8] sm:$0xf] }
 0x268   : > { %v2029_v3 = vmul.f32 0.7978846, %v1901_v10  ;;  %v1902_v57 = vadd.f32 %v1774_v28, %v7678_v9  ;;  %v2381_v55 = vmul.f32 %v2253_v20, %v1357_v63  ;;  %v7720_v31 = vadd.f32 %v7546_v0, %v6974_v50  ;;  %v7722_v14 = vpop.f32.mrb[78].mxu1  ;;  %v9795_v28 = vld [vmem:[#allocation33_spill] sm:$0xff] }
 0x269   : > { %v7724_v24 = vpop.eup %6020  ;;  %6028 = vtanh.f32 %v2026_v36  ;;  %2947 = vmatprep.mubr.bf16.mxu0 %v2466_v7  ;;  %v1777_v21 = vmul.f32 0.044715, %v1649_v13  ;;  %v2385_v27 = vmul.f32 %v2257_v12, %v1361_v45  ;;  %v553_v16 = vsub.s32 2, %v9794_v54  ;;  %v7727_v53 = vpop.f32.mrb[79].mxu1  ;;  %v9796_v7 = vld [vmem:[#allocation34_spill] sm:$0xff] }
 0x26a   : > { %v7729_v44 = vpop.eup %6022  ;;  %6030 = vtanh.f32 %v2029_v3  ;;  %v2030_v25 = vmul.f32 0.7978846, %v1902_v57  ;;  %v1522_v50 = vmul.f32 %v7720_v31, %v7720_v31  ;;  %v557_v0 = vsub.s32 3, %v9794_v54 }
 0x26b   : > { %v7734_v63 = vpop.eup %6024  ;;  %v1905_v38 = vadd.f32 %v1777_v21, %v7697_v41  ;;  %v2465_v1 = vpack.c.bf16 %v2385_v27, %v2381_v55  ;;  %v7737_v49 = vrot.slane %v6294_v56, %v553_v16  ;;  %v1366_v10 = vmul.f32 0.5, %v7492_v59  ;;  %3664 = vmatmul.mubr.bf16.gmra.mrb[184].mxu1 %v9795_v28 }
 0x26c   : > { %6032 = vtanh.f32 %v2030_v25  ;;  %v1650_v45 = vmul.f32 %v1522_v50, %v7720_v31  ;;  %v7742_v20 = vrot.slane %v6294_v56, %v557_v0  ;;  %v1370_v36 = vmul.f32 0.5, %v7536_v2  ;;  %3673 = vmatprep.mubr.bf16.mxu1 %v9796_v7 }
 0x26d   : > { %v2033_v13 = vmul.f32 0.7978846, %v1905_v38  ;;  %2948 = vmatmul.mubr.bf16.gmra.mrb[44].mxu0 %v2465_v1  ;;  %v1111_v12 = vadd.f32 %v7575_v35, %v7737_v49  ;;  %v2262_v3 = vadd.f32 1.0, %v7616_v5  ;;  %v2266_v59 = vadd.f32 1.0, %v7660_v62 }
 0x26e   : > { %v1778_v57 = vmul.f32 0.044715, %v1650_v45  ;;  %v7752_v55 = vadd.f32 %v7581_v46, %v7742_v20  ;;  %v1115_v21 = vadd.f32 %v7586_v37, %v7737_v49  ;;  %v1365_v2 = vmul.f32 0.5, %v7482_v33  ;;  %v7757_v27 = vpop.f32.mrb[80].mxu1 }
 0x26f   : > { %v7759_v54 = vpop.eup %6026  ;;  %6034 = vtanh.f32 %v2033_v13  ;;  %v7761_v35 = vmul.f32 0.5, %v1111_v12  ;;  %v1399_v5 = vmul.f32 %v1111_v12, %v1111_v12  ;;  %v2390_v16 = vmul.f32 %v2262_v3, %v1366_v10  ;;  %v7763_v62 = vpop.f32.mrb[81].mxu1 }
 0x270   : > { %v1906_v25 = vadd.f32 %v1778_v57, %v7720_v31  ;;  %v1400_v46 = vmul.f32 %v7752_v55, %v7752_v55  ;;  %v2394_v50 = vmul.f32 %v2266_v59, %v1370_v36  ;;  %v7768_v37 = vmul.f32 0.5, %v1115_v21  ;;  %v7770_v33 = vpop.f32.mrb[82].mxu1 }
 0x271   : > { %v1527_v0 = vmul.f32 %v1399_v5, %v1111_v12  ;;  %v1403_v38 = vmul.f32 %v1115_v21, %v1115_v21  ;;  %v1369_v1 = vmul.f32 0.5, %v7515_v34  ;;  %v2261_v56 = vadd.f32 1.0, %v7608_v8  ;;  %v7774_v28 = vpop.f32.mrb[83].mxu1  ;;  %v9797_v34 = vld [vmem:[#allocation35_spill] sm:$0xff] }
 0x272   : > { %v2034_v10 = vmul.f32 0.7978846, %v1906_v25  ;;  %v1528_v45 = vmul.f32 %v1400_v46, %v7752_v55  ;;  %v2470_v7 = vpack.c.bf16 %v2394_v50, %v2390_v16  ;;  %v2265_v13 = vadd.f32 1.0, %v7643_v43 }
 0x273   : > { %v7778_v3 = vpop.eup %6028  ;;  %v1655_v36 = vmul.f32 0.044715, %v1527_v0  ;;  %v1531_v59 = vmul.f32 %v1403_v38, %v1115_v21  ;;  %v2389_v57 = vmul.f32 %v2261_v56, %v1365_v2  ;;  %v7782_v5 = vadd.f32 %v7591_v19, %v7742_v20  ;;  %3674 = vmatmul.mubr.bf16.gmra.mrb[188].mxu1 %v9797_v34 }
 0x274   : > { %v7785_v8 = vpop.eup %6030  ;;  %6036 = vtanh.f32 %v2034_v10  ;;  %v1656_v25 = vmul.f32 0.044715, %v1528_v45  ;;  %2957 = vmatprep.mubr.bf16.mxu0 %v2470_v7  ;;  %v2393_v46 = vmul.f32 %v2265_v13, %v1369_v1  ;;  %v7789_v43 = vadd.f32 %v7622_v26, %v7737_v49 }
 0x275   : > { %v1783_v16 = vadd.f32 %v1655_v36, %v1111_v12  ;;  %v1659_v50 = vmul.f32 0.044715, %v1531_v59  ;;  %v1404_v2 = vmul.f32 %v7782_v5, %v7782_v5  ;;  %v7795_v19 = vadd.f32 %v7628_v17, %v7742_v20 }
 0x276   : > { %v7797_v0 = vpop.eup %6032  ;;  %v1784_v38 = vadd.f32 %v1656_v25, %v7752_v55  ;;  %v2469_v56 = vpack.c.bf16 %v2393_v46, %v2389_v57  ;;  %v1407_v1 = vmul.f32 %v7789_v43, %v7789_v43  ;;  %v1374_v26 = vmul.f32 0.5, %v7556_v11  ;;  %v7803_v10 = vpop.f32.mrb[84].mxu1 }
 0x277   : > { %v1911_v12 = vmul.f32 0.7978846, %v1783_v16  ;;  %v1787_v45 = vadd.f32 %v1659_v50, %v1115_v21  ;;  %v1532_v7 = vmul.f32 %v1404_v2, %v7782_v5  ;;  %v1408_v17 = vmul.f32 %v7795_v19, %v7795_v19  ;;  %v7808_v13 = vpop.f32.mrb[85].mxu1 }
 0x278   : > { %v1912_v36 = vmul.f32 0.7978846, %v1784_v38  ;;  %2958 = vmatmul.mubr.bf16.gmra.mrb[48].mxu0 %v2469_v56  ;;  %v1535_v59 = vmul.f32 %v1407_v1, %v7789_v43  ;;  %v1378_v57 = vmul.f32 0.5, %v7598_v23  ;;  %v2270_v34 = vadd.f32 1.0, %v7682_v58  ;;  %v7813_v11 = vpop.f32.mrb[86].mxu1 }
 0x279   : > { %v7815_v25 = vpop.eup %6034  ;;  %6038 = vtanh.f32 %v1911_v12  ;;  %v1915_v21 = vmul.f32 0.7978846, %v1787_v45  ;;  %v1660_v46 = vmul.f32 0.044715, %v1532_v7  ;;  %v1536_v16 = vmul.f32 %v1408_v17, %v7795_v19  ;;  %v7818_v50 = vpop.f32.mrb[87].mxu1 }
 0x27a   : > { %6040 = vtanh.f32 %v1912_v36  ;;  %v1663_v2 = vmul.f32 0.044715, %v1535_v59  ;;  %v2274_v38 = vadd.f32 1.0, %v7724_v24  ;;  %v2398_v56 = vmul.f32 %v2270_v34, %v1374_v26 }
 0x27b   : > { %6042 = vtanh.f32 %v1915_v21  ;;  %v1788_v23 = vadd.f32 %v1660_v46, %v7782_v5  ;;  %v1664_v58 = vmul.f32 0.044715, %v1536_v16  ;;  %v7824_v1 = vadd.f32 %v7633_v32, %v7737_v49 }
 0x27c   : > { %v1791_v12 = vadd.f32 %v1663_v2, %v7789_v43  ;;  %v2402_v45 = vmul.f32 %v2274_v38, %v1378_v57  ;;  %v1373_v7 = vmul.f32 0.5, %v7544_v39  ;;  %v1377_v17 = vmul.f32 0.5, %v7573_v47 }
 0x27d   : > { %v1916_v36 = vmul.f32 0.7978846, %v1788_v23  ;;  %v1792_v59 = vadd.f32 %v1664_v58, %v7795_v19  ;;  %v1411_v24 = vmul.f32 %v7824_v1, %v7824_v1  ;;  %v2269_v26 = vadd.f32 1.0, %v7668_v42 }
 0x27e   : > { %v7833_v34 = vpop.eup %6036  ;;  %v1919_v21 = vmul.f32 0.7978846, %v1791_v12  ;;  %v2474_v32 = vpack.c.bf16 %v2402_v45, %v2398_v56  ;;  %v2273_v46 = vadd.f32 1.0, %v7700_v61  ;;  %v7838_v57 = vadd.f32 %v7641_v30, %v7742_v20  ;;  %v7840_v39 = vpop.f32.mrb[88].mxu1 }
 0x27f   : > { %6044 = vtanh.f32 %v1916_v36  ;;  %v1920_v47 = vmul.f32 0.7978846, %v1792_v59  ;;  %v1539_v16 = vmul.f32 %v1411_v24, %v7824_v1  ;;  %v2397_v2 = vmul.f32 %v2269_v26, %v1373_v7  ;;  %v7843_v38 = vpop.f32.mrb[89].mxu1 }
 0x280   : > { %6046 = vtanh.f32 %v1919_v21  ;;  %2967 = vmatprep.mubr.bf16.mxu0 %v2474_v32  ;;  %v2401_v42 = vmul.f32 %v2273_v46, %v1377_v17  ;;  %v1412_v56 = vmul.f32 %v7838_v57, %v7838_v57  ;;  %v7849_v61 = vadd.f32 %v7666_v52, %v7737_v49  ;;  %v7851_v30 = vpop.f32.mrb[90].mxu1 }
 0x281   : > { %6048 = vtanh.f32 %v1920_v47  ;;  %v1667_v23 = vmul.f32 0.044715, %v1539_v16  ;;  %v7855_v58 = vadd.f32 %v7672_v15, %v7742_v20  ;;  %v1382_v12 = vmul.f32 0.5, %v7614_v48  ;;  %v7858_v45 = vpop.f32.mrb[91].mxu1 }
 0x282   : > { %9798 = vst [vmem:[#allocation21_spill] sm:$0xff] %v7858_v45  ;;  %v2473_v7 = vpack.c.bf16 %v2401_v42, %v2397_v2  ;;  %v1540_v17 = vmul.f32 %v1412_v56, %v7838_v57  ;;  %v1415_v36 = vmul.f32 %v7849_v61, %v7849_v61  ;;  %v1386_v52 = vmul.f32 0.5, %v7658_v18 }
 0x283   : > { %v6039_v59 = vpop.eup %6038  ;;  %v1795_v24 = vadd.f32 %v1667_v23, %v7824_v1  ;;  %v1416_v26 = vmul.f32 %v7855_v58, %v7855_v58  ;;  %v2278_v15 = vadd.f32 1.0, %v7734_v63  ;;  %v2282_v48 = vadd.f32 1.0, %v7778_v3 }
 0x284   : > { %v7869_v21 = vpop.eup %6040  ;;  %v2167_v32 = vadd.f32 1.0, %v6039_v59  ;;  %2968 = vmatmul.mubr.bf16.gmra.mrb[52].mxu0 %v2473_v7  ;;  %v1668_v46 = vmul.f32 0.044715, %v1540_v17  ;;  %v1543_v47 = vmul.f32 %v1415_v36, %v7849_v61  ;;  %v7874_v18 = vadd.f32 %v7680_v6, %v7737_v49 }
 0x285   : > { %v6043_v16 = vpop.eup %6042  ;;  %v1923_v2 = vmul.f32 0.7978846, %v1795_v24  ;;  %v1544_v42 = vmul.f32 %v1416_v26, %v7855_v58  ;;  %v2406_v56 = vmul.f32 %v2278_v15, %v1382_v12  ;;  %v2410_v23 = vmul.f32 %v2282_v48, %v1386_v52 }
 0x286   : > { %v7878_v63 = vmul.f32 %v2167_v32, %v7761_v35  ;;  %v2171_v3 = vadd.f32 1.0, %v6043_v16  ;;  %v1796_v59 = vadd.f32 %v1668_v46, %v7838_v57  ;;  %v1671_v7 = vmul.f32 0.044715, %v1543_v47  ;;  %v7881_v17 = vpop.f32.mrb[92].mxu1 }
 0x287   : > { %6050 = vtanh.f32 %v1923_v2  ;;  %v1672_v36 = vmul.f32 0.044715, %v1544_v42  ;;  %v2478_v45 = vpack.c.bf16 %v2410_v23, %v2406_v56  ;;  %v1419_v6 = vmul.f32 %v7874_v18, %v7874_v18  ;;  %v7885_v24 = vpop.f32.mrb[93].mxu1 }
 0x288   : > { %v7888_v12 = vmul.f32 %v2171_v3, %v7768_v37  ;;  %v1924_v52 = vmul.f32 0.7978846, %v1796_v59  ;;  %v1799_v35 = vadd.f32 %v1671_v7, %v7849_v61  ;;  %v1381_v26 = vmul.f32 0.5, %v7605_v29  ;;  %v7892_v15 = vpop.f32.mrb[94].mxu1 }
 0x289   : > { %v7894_v48 = vpop.eup %6044  ;;  %v1800_v32 = vadd.f32 %v1672_v36, %v7855_v58  ;;  %2977 = vmatprep.mubr.bf16.mxu0 %v2478_v45  ;;  %v1547_v46 = vmul.f32 %v1419_v6, %v7874_v18  ;;  %v1385_v47 = vmul.f32 0.5, %v7638_v4  ;;  %v2277_v16 = vadd.f32 1.0, %v7729_v44  ;;  %v7900_v37 = vpop.f32.mrb[95].mxu1 }
 0x28a   : > { %v7902_v2 = vpop.eup %6046  ;;  %6052 = vtanh.f32 %v1924_v52  ;;  %v1927_v42 = vmul.f32 0.7978846, %v1799_v35  ;;  %v2281_v29 = vadd.f32 1.0, %v7759_v54  ;;  %v7907_v56 = vadd.f32 %v7687_v51, %v7742_v20 }
 0x28b   : > { %v7909_v23 = vpop.eup %6048  ;;  %v1928_v45 = vmul.f32 0.7978846, %v1800_v32  ;;  %v1675_v3 = vmul.f32 0.044715, %v1547_v46  ;;  %v2405_v59 = vmul.f32 %v2277_v16, %v1381_v26  ;;  %v7913_v4 = vadd.f32 %v7711_v40, %v7737_v49 }
 0x28c   : > { %6054 = vtanh.f32 %v1927_v42  ;;  %v2409_v44 = vmul.f32 %v2281_v29, %v1385_v47  ;;  %v1420_v7 = vmul.f32 %v7907_v56, %v7907_v56  ;;  %v7919_v54 = vadd.f32 %v7715_v22, %v7742_v20 }
 0x28d   : > { %6056 = vtanh.f32 %v1928_v45  ;;  %v1803_v51 = vadd.f32 %v1675_v3, %v7874_v18  ;;  %v1423_v36 = vmul.f32 %v7913_v4, %v7913_v4  ;;  %v1390_v6 = vmul.f32 0.5, %v7678_v9 }
 0x28e   : > { %v2477_v52 = vpack.c.bf16 %v2409_v44, %v2405_v59  ;;  %v1548_v40 = vmul.f32 %v1420_v7, %v7907_v56  ;;  %v1424_v35 = vmul.f32 %v7919_v54, %v7919_v54  ;;  %v1394_v26 = vmul.f32 0.5, %v7720_v31  ;;  %v7929_v32 = vpop.f32.mrb[96].mxu1 }
 0x28f   : > { %v1931_v22 = vmul.f32 0.7978846, %v1803_v51  ;;  %v1551_v46 = vmul.f32 %v1423_v36, %v7913_v4  ;;  %v2286_v47 = vadd.f32 1.0, %v7797_v0  ;;  %v2290_v16 = vadd.f32 1.0, %v7833_v34  ;;  %v7934_v42 = vpop.f32.mrb[97].mxu1 }
 0x290   : > { %2978 = vmatmul.mubr.bf16.gmra.mrb[56].mxu0 %v2477_v52  ;;  %v1676_v9 = vmul.f32 0.044715, %v1548_v40  ;;  %v1552_v29 = vmul.f32 %v1424_v35, %v7919_v54  ;;  %v7939_v45 = vadd.f32 %v7722_v14, %v7737_v49  ;;  %v1389_v31 = vmul.f32 0.5, %v7664_v60  ;;  %v7942_v3 = vpop.f32.mrb[98].mxu1 }
 0x291   : > { %v7944_v59 = vpop.eup %6050  ;;  %6058 = vtanh.f32 %v1931_v22  ;;  %v1679_v0 = vmul.f32 0.044715, %v1551_v46  ;;  %v2414_v44 = vmul.f32 %v2286_v47, %v1390_v6  ;;  %v2418_v34 = vmul.f32 %v2290_v16, %v1394_v26  ;;  %v7946_v7 = vpop.f32.mrb[99].mxu1 }
 0x292   : > { %v1804_v51 = vadd.f32 %v1676_v9, %v7907_v56  ;;  %v1680_v36 = vmul.f32 0.044715, %v1552_v29  ;;  %v1427_v52 = vmul.f32 %v7939_v45, %v7939_v45  ;;  %v1393_v14 = vmul.f32 0.5, %v7697_v41 }
 0x293   : > { %v1807_v60 = vadd.f32 %v1679_v0, %v7913_v4  ;;  %v2482_v40 = vpack.c.bf16 %v2418_v34, %v2414_v44  ;;  %v2285_v35 = vadd.f32 1.0, %v7785_v8  ;;  %v2289_v22 = vadd.f32 1.0, %v7815_v25 }
 0x294   : > { %v7955_v46 = vpop.eup %6052  ;;  %v1932_v6 = vmul.f32 0.7978846, %v1804_v51  ;;  %v1808_v26 = vadd.f32 %v1680_v36, %v7919_v54  ;;  %v1555_v47 = vmul.f32 %v1427_v52, %v7939_v45  ;;  %v7961_v16 = vadd.f32 %v7727_v53, %v7742_v20 }
 0x295   : > { %v1935_v9 = vmul.f32 0.7978846, %v1807_v60  ;;  %2987 = vmatprep.mubr.bf16.mxu0 %v2482_v40  ;;  %v2413_v41 = vmul.f32 %v2285_v35, %v1389_v31  ;;  %v2417_v29 = vmul.f32 %v2289_v22, %v1393_v14  ;;  %v7965_v8 = vadd.f32 %v7757_v27, %v7737_v49 }
 0x296   : > { %v7967_v25 = vpop.eup %6054  ;;  %6060 = vtanh.f32 %v1932_v6  ;;  %v1936_v0 = vmul.f32 0.7978846, %v1808_v26  ;;  %v1683_v44 = vmul.f32 0.044715, %v1555_v47  ;;  %v1428_v34 = vmul.f32 %v7961_v16, %v7961_v16  ;;  %v7971_v51 = vpop.f32.mrb[100].mxu1 }
 0x297   : > { %v7973_v53 = vpop.eup %6056  ;;  %6062 = vtanh.f32 %v1935_v9  ;;  %v2481_v36 = vpack.c.bf16 %v2417_v29, %v2413_v41  ;;  %v1431_v31 = vmul.f32 %v7965_v8, %v7965_v8  ;;  %v7979_v27 = vadd.f32 %v7763_v62, %v7742_v20  ;;  %v7981_v52 = vpop.f32.mrb[101].mxu1 }
 0x298   : > { %6064 = vtanh.f32 %v1936_v0  ;;  %v1811_v14 = vadd.f32 %v1683_v44, %v7939_v45  ;;  %v1556_v60 = vmul.f32 %v1428_v34, %v7961_v16  ;;  %v1272_v40 = vmul.f32 0.5, %v7752_v55  ;;  %v7986_v35 = vpop.f32.mrb[102].mxu1 }
 0x299   : > { %9799 = vst [vmem:[#allocation22_spill] sm:$0xff] %v7986_v35  ;;  %2988 = vmatmul.mubr.bf16.gmra.mrb[60].mxu0 %v2481_v36  ;;  %v1559_v22 = vmul.f32 %v1431_v31, %v7965_v8  ;;  %v1432_v6 = vmul.f32 %v7979_v27, %v7979_v27  ;;  %v1276_v62 = vmul.f32 0.5, %v7782_v5  ;;  %v2168_v26 = vadd.f32 1.0, %v7869_v21  ;;  %v7993_v47 = vpop.f32.mrb[103].mxu1 }
 0x29a   : > { %9800 = vst [vmem:[#allocation23_spill] sm:$0xff] %v7993_v47  ;;  %v1939_v9 = vmul.f32 0.7978846, %v1811_v14  ;;  %v1684_v41 = vmul.f32 0.044715, %v1556_v60  ;;  %v2172_v29 = vadd.f32 1.0, %v7894_v48  ;;  %v7998_v55 = vadd.f32 %v7770_v33, %v7737_v49 }
 0x29b   : > { %v8000_v0 = vpop.eup %6058  ;;  %v1687_v44 = vmul.f32 0.044715, %v1559_v22  ;;  %v1560_v34 = vmul.f32 %v1432_v6, %v7979_v27  ;;  %v2296_v36 = vmul.f32 %v2168_v26, %v1272_v40  ;;  %v2423_v5 = vpack.c.bf16 %v7888_v12, %v7878_v63  ;;  %v5862_v6 = vld [vmem:[#allocation9 + $0x200] ss:$8 sps:$4 sm:$0xff]  }
 0x29c   : > { %6066 = vtanh.f32 %v1939_v9  ;;  %v1812_v21 = vadd.f32 %v1684_v41, %v7961_v16  ;;  %v2300_v31 = vmul.f32 %v2172_v29, %v1276_v62  ;;  %v1435_v48 = vmul.f32 %v7998_v55, %v7998_v55  ;;  %v5867_v29 = vld [vmem:[#allocation9 + $0x214] ss:$8 sps:$4 sm:$0xff]  }
 0x29d   : > { %v1815_v14 = vadd.f32 %v1687_v44, %v7965_v8  ;;  %v1688_v33 = vmul.f32 0.044715, %v1560_v34  ;;  %v8011_v60 = vadd.f32 %v7774_v28, %v7742_v20  ;;  %v8015_v40 = vadd.f32 %v7803_v10, %v7737_v49 }
 0x29e   : > { %v1940_v22 = vmul.f32 0.7978846, %v1812_v21  ;;  %v2424_v63 = vpack.c.bf16 %v2300_v31, %v2296_v36  ;;  %v1563_v12 = vmul.f32 %v1435_v48, %v7998_v55  ;;  %v8020_v62 = vadd.f32 %v7808_v13, %v7742_v20  ;;  %v8022_v26 = vpop.f32.mrb[104].mxu1 }
 0x29f   : > { %9801 = vst [vmem:[#allocation24_spill] sm:$0xff] %v8022_v26  ;;  %v1943_v9 = vmul.f32 0.7978846, %v1815_v14  ;;  %v1816_v41 = vadd.f32 %v1688_v33, %v7979_v27  ;;  %v1436_v28 = vmul.f32 %v8011_v60, %v8011_v60  ;;  %v1439_v10 = vmul.f32 %v8015_v40, %v8015_v40  ;;  %v8029_v44 = vpop.f32.mrb[105].mxu1 }
 0x2a0   : > { %9802 = vst [vmem:[#allocation25_spill] sm:$0xff] %v8029_v44  ;;  %v8031_v34 = vpop.eup %6060  ;;  %6068 = vtanh.f32 %v1940_v22  ;;  %3030 = vmatprep.mubr.bf16.mxu0 %v2424_v63  ;;  %v1691_v13 = vmul.f32 0.044715, %v1563_v12  ;;  %v1440_v36 = vmul.f32 %v8020_v62, %v8020_v62  ;;  %v1280_v21 = vmul.f32 0.5, %v7795_v19  ;;  %v8036_v31 = vpop.f32.mrb[106].mxu1 }
 0x2a1   : > { %9803 = vst [vmem:[#allocation26_spill] sm:$0xff] %v8036_v31  ;;  %v8038_v48 = vpop.eup %6062  ;;  %6070 = vtanh.f32 %v1943_v9  ;;  %v1944_v14 = vmul.f32 0.7978846, %v1816_v41  ;;  %3031 = vmatmul.mubr.bf16.vlgmr.msra.gmra.mrb[0].mxu0 %v2423_v5  ;;  %v1564_v33 = vmul.f32 %v1436_v28, %v8011_v60  ;;  %v1567_v44 = vmul.f32 %v1439_v10, %v8015_v40  ;;  %v8042_v26 = vpop.f32.mrb[107].mxu1  ;;  %v5865_v9 = vld [vmem:[#allocation9 + $0x210] ss:$8 sps:$4 sm:$0xff]  }
 0x2a2   : > { %9804 = vst [vmem:[#allocation27_spill] sm:$0xff] %v8042_v26  ;;  %v8044_v22 = vpop.eup %6064  ;;  %v1819_v63 = vadd.f32 %v1691_v13, %v7998_v55  ;;  %4453 = vmatpush1.bf16.msra.mxu0 %v5862_v6  ;;  %v1568_v19 = vmul.f32 %v1440_v36, %v8020_v62  ;;  %v1284_v12 = vmul.f32 0.5, %v7838_v57  ;;  %v2176_v31 = vadd.f32 1.0, %v7909_v23  ;;  %v5870_v41 = vld [vmem:[#allocation9 + $0x224] ss:$8 sps:$4 sm:$0xff]  }
 0x2a3   : > { %6072 = vtanh.f32 %v1944_v14  ;;  %v1692_v5 = vmul.f32 0.044715, %v1564_v33  ;;  %v1695_v28 = vmul.f32 0.044715, %v1567_v44  ;;  %v2180_v10 = vadd.f32 1.0, %v7955_v46  ;;  %4454 = vmatprep.subr.bf16.mxu0 %v5867_v29 }
 0x2a4   : > { %v1947_v26 = vmul.f32 0.7978846, %v1819_v63  ;;  %v1696_v47 = vmul.f32 0.044715, %v1568_v19  ;;  %v2304_v35 = vmul.f32 %v2176_v31, %v1280_v21  ;;  %v8053_v6 = vadd.f32 %v7813_v11, %v7737_v49  ;;  %v5868_v11 = vld [vmem:[#allocation9 + $0x220] ss:$8 sps:$4 sm:$0xff]  }
 0x2a5   : > { %v1820_v13 = vadd.f32 %v1692_v5, %v8011_v60  ;;  %v1823_v57 = vadd.f32 %v1695_v28, %v8015_v40  ;;  %v2308_v23 = vmul.f32 %v2180_v10, %v1284_v12  ;;  %v1279_v36 = vmul.f32 0.5, %v7789_v43  ;;  %v5873_v21 = vld [vmem:[#allocation9 + $0x234] ss:$8 sps:$4 sm:$0xff]  }
 0x2a6   : > { %v8058_v14 = vpop.eup %6066  ;;  %6074 = vtanh.f32 %v1947_v26  ;;  %v1824_v46 = vadd.f32 %v1696_v47, %v8020_v62  ;;  %v1443_v29 = vmul.f32 %v8053_v6, %v8053_v6  ;;  %v1283_v44 = vmul.f32 0.5, %v7824_v1  ;;  %4455 = vmatpush1.bf16.msra.mxu0 %v5865_v9  ;;  %v8064_v31 = vpop.f32.mrb[108].mxu1 }
 0x2a7   : > { %v1948_v33 = vmul.f32 0.7978846, %v1820_v13  ;;  %v1951_v63 = vmul.f32 0.7978846, %v1823_v57  ;;  %v2428_v19 = vpack.c.bf16 %v2308_v23, %v2304_v35  ;;  %v2175_v43 = vadd.f32 1.0, %v7902_v2  ;;  %4456 = vmatprep.subr.bf16.mxu0 %v5870_v41  ;;  %v8067_v12 = vpop.f32.mrb[109].mxu1 }
 0x2a8   : > { %v1952_v26 = vmul.f32 0.7978846, %v1824_v46  ;;  %v1571_v47 = vmul.f32 %v1443_v29, %v8053_v6  ;;  %v2179_v5 = vadd.f32 1.0, %v7944_v59  ;;  %v8073_v1 = vadd.f32 %v7818_v50, %v7742_v20  ;;  %v8075_v9 = vpop.f32.mrb[110].mxu1 }
 0x2a9   : > { %6076 = vtanh.f32 %v1948_v33  ;;  %3040 = vmatprep.mubr.bf16.mxu0 %v2428_v19  ;;  %v2303_v28 = vmul.f32 %v2175_v43, %v1279_v36  ;;  %v8079_v2 = vadd.f32 %v7840_v39, %v7737_v49  ;;  %v8083_v35 = vadd.f32 %v7843_v38, %v7742_v20  ;;  %v8085_v41 = vpop.f32.mrb[111].mxu1  ;;  %v5871_v36 = vld [vmem:[#allocation9 + $0x230] ss:$8 sps:$4 sm:$0xff]   ;;  %v5876_v33 = vld [vmem:[#allocation9 + $0x244] ss:$8 sps:$4 sm:$0xff]  }
 0x2aa   : > { %v8087_v59 = vpop.eup %6068  ;;  %6078 = vtanh.f32 %v1951_v63  ;;  %v1699_v50 = vmul.f32 0.044715, %v1571_v47  ;;  %v2307_v10 = vmul.f32 %v2179_v5, %v1283_v44  ;;  %v1444_v13 = vmul.f32 %v8073_v1, %v8073_v1  ;;  %4457 = vmatpush1.bf16.msra.mxu0 %v5868_v11  ;;  %v5874_v47 = vld [vmem:[#allocation9 + $0x240] ss:$8 sps:$4 sm:$0xff]  }
 0x2ab   : > { %v8091_v57 = vpop.eup %6070  ;;  %6080 = vtanh.f32 %v1952_v26  ;;  %v1447_v39 = vmul.f32 %v8079_v2, %v8079_v2  ;;  %v1448_v38 = vmul.f32 %v8083_v35, %v8083_v35  ;;  %v1288_v23 = vmul.f32 0.5, %v7855_v58  ;;  %4458 = vmatprep.subr.bf16.mxu0 %v5873_v21 }
 0x2ac   : > { %v1827_v46 = vadd.f32 %v1699_v50, %v8053_v6  ;;  %v2427_v29 = vpack.c.bf16 %v2307_v10, %v2303_v28  ;;  %v1572_v44 = vmul.f32 %v1444_v13, %v8073_v1  ;;  %v1292_v11 = vmul.f32 0.5, %v7907_v56 }
 0x2ad   : > { %v8101_v63 = vpop.eup %6072  ;;  %v1575_v19 = vmul.f32 %v1447_v39, %v8079_v2  ;;  %v1576_v43 = vmul.f32 %v1448_v38, %v8083_v35  ;;  %v2184_v26 = vadd.f32 1.0, %v7973_v53  ;;  %v2188_v58 = vadd.f32 1.0, %v8031_v34 }
 0x2ae   : > { %v1955_v21 = vmul.f32 0.7978846, %v1827_v46  ;;  %3041 = vmatmul.mubr.bf16.gmra.mrb[4].mxu0 %v2427_v29  ;;  %v1700_v5 = vmul.f32 0.044715, %v1572_v44  ;;  %v8109_v28 = vadd.f32 %v7851_v30, %v7737_v49  ;;  %v1287_v56 = vmul.f32 0.5, %v7849_v61  ;;  %v8112_v50 = vpop.f32.mrb[112].mxu1 }
 0x2af   : > { %v1703_v10 = vmul.f32 0.044715, %v1575_v19  ;;  %v1704_v13 = vmul.f32 0.044715, %v1576_v43  ;;  %v2312_v39 = vmul.f32 %v2184_v26, %v1288_v23  ;;  %v2316_v38 = vmul.f32 %v2188_v58, %v1292_v11  ;;  %4459 = vmatpush1.bf16.msra.mxu0 %v5871_v36  ;;  %v8114_v53 = vpop.f32.mrb[113].mxu1 }
 0x2b0   : > { %v8116_v34 = vpop.eup %6074  ;;  %6082 = vtanh.f32 %v1955_v21  ;;  %v1828_v46 = vadd.f32 %v1700_v5, %v8073_v1  ;;  %v1451_v30 = vmul.f32 %v8109_v28, %v8109_v28  ;;  %v1291_v29 = vmul.f32 0.5, %v7874_v18  ;;  %4460 = vmatprep.subr.bf16.mxu0 %v5876_v33  ;;  %v5879_v61 = vld [vmem:[#allocation9 + $0x254] ss:$8 sps:$4 sm:$0xff]   ;;  %v8122_v44 = vpop.f32.mrb[114].mxu1  ;;  %v9806_v18 = vld [vmem:[#allocation21_spill] sm:$0xff] }
 0x2b1   : > { %9805 = vst [vmem:[#allocation28_spill] sm:$0xff] %v8122_v44  ;;  %v1831_v23 = vadd.f32 %v1703_v10, %v8079_v2  ;;  %v1832_v36 = vadd.f32 %v1704_v13, %v8083_v35  ;;  %v2432_v11 = vpack.c.bf16 %v2316_v38, %v2312_v39  ;;  %v2183_v19 = vadd.f32 1.0, %v7967_v25  ;;  %v8127_v43 = vpop.f32.mrb[115].mxu1  ;;  %v5877_v39 = vld [vmem:[#allocation9 + $0x250] ss:$8 sps:$4 sm:$0xff]  }
 0x2b2   : > { %v1956_v26 = vmul.f32 0.7978846, %v1828_v46  ;;  %v1579_v58 = vmul.f32 %v1451_v30, %v8109_v28  ;;  %v2187_v21 = vadd.f32 1.0, %v8000_v0  ;;  %v8133_v33 = vadd.f32 %v9806_v18, %v7742_v20  ;;  %v5882_v18 = vld [vmem:[#allocation9 + $0x264] ss:$8 sps:$4 sm:$0xff]  }
 0x2b3   : > { %v8135_v5 = vpop.eup %6076  ;;  %v1959_v44 = vmul.f32 0.7978846, %v1831_v23  ;;  %v1960_v10 = vmul.f32 0.7978846, %v1832_v36  ;;  %3050 = vmatprep.mubr.bf16.mxu0 %v2432_v11  ;;  %v2311_v13 = vmul.f32 %v2183_v19, %v1287_v56  ;;  %v8139_v25 = vadd.f32 %v7881_v17, %v7737_v49  ;;  %4461 = vmatpush1.bf16.msra.mxu0 %v5874_v47 }
 0x2b4   : > { %v8141_v38 = vpop.eup %6078  ;;  %6084 = vtanh.f32 %v1956_v26  ;;  %v1707_v0 = vmul.f32 0.044715, %v1579_v58  ;;  %v2315_v46 = vmul.f32 %v2187_v21, %v1291_v29  ;;  %v1452_v30 = vmul.f32 %v8133_v33, %v8133_v33  ;;  %4462 = vmatprep.subr.bf16.mxu0 %v5879_v61  ;;  %v5880_v61 = vld [vmem:[#allocation9 + $0x260] ss:$8 sps:$4 sm:$0xff]  }
 0x2b5   : > { %v8145_v23 = vpop.eup %6080  ;;  %6086 = vtanh.f32 %v1959_v44  ;;  %v1455_v56 = vmul.f32 %v8139_v25, %v8139_v25  ;;  %v8151_v17 = vadd.f32 %v7885_v24, %v7742_v20  ;;  %v1296_v47 = vmul.f32 0.5, %v7919_v54  ;;  %v5885_v54 = vld [vmem:[#allocation9 + $0x274] ss:$8 sps:$4 sm:$0xff]  }
 0x2b6   : > { %6088 = vtanh.f32 %v1960_v10  ;;  %v1835_v29 = vadd.f32 %v1707_v0, %v8109_v28  ;;  %v2431_v36 = vpack.c.bf16 %v2315_v46, %v2311_v13  ;;  %v1580_v11 = vmul.f32 %v1452_v30, %v8133_v33  ;;  %v8156_v19 = vpop.f32.mrb[116].mxu1 }
 0x2b7   : > { %9807 = vst [vmem:[#allocation29_spill] sm:$0xff] %v8156_v19  ;;  %v1583_v44 = vmul.f32 %v1455_v56, %v8139_v25  ;;  %v1456_v26 = vmul.f32 %v8151_v17, %v8151_v17  ;;  %v1300_v58 = vmul.f32 0.5, %v7961_v16  ;;  %v2192_v24 = vadd.f32 1.0, %v8044_v22  ;;  %4463 = vmatpush1.bf16.msra.mxu0 %v5877_v39  ;;  %v8163_v21 = vpop.f32.mrb[117].mxu1 }
 0x2b8   : > { %v1963_v10 = vmul.f32 0.7978846, %v1835_v29  ;;  %3051 = vmatmul.mubr.bf16.gmra.mrb[8].mxu0 %v2431_v36  ;;  %v1708_v13 = vmul.f32 0.044715, %v1580_v11  ;;  %v2196_v0 = vadd.f32 1.0, %v8087_v59  ;;  %v8168_v46 = vadd.f32 %v7892_v15, %v7737_v49  ;;  %4464 = vmatprep.subr.bf16.mxu0 %v5882_v18  ;;  %v8170_v30 = vpop.f32.mrb[118].mxu1 }
 0x2b9   : > { %9808 = vst [vmem:[#allocation30_spill] sm:$0xff] %v8170_v30  ;;  %v1711_v56 = vmul.f32 0.044715, %v1583_v44  ;;  %v1584_v16 = vmul.f32 %v1456_v26, %v8151_v17  ;;  %v2320_v22 = vmul.f32 %v2192_v24, %v1296_v47  ;;  %v1295_v39 = vmul.f32 0.5, %v7913_v4  ;;  %v8174_v19 = vpop.f32.mrb[119].mxu1 }
 0x2ba   : > { %9809 = vst [vmem:[#allocation31_spill] sm:$0xff] %v8174_v19  ;;  %v8176_v29 = vpop.eup %6082  ;;  %6090 = vtanh.f32 %v1963_v10  ;;  %v1836_v59 = vadd.f32 %v1708_v13, %v8133_v33  ;;  %v2324_v36 = vmul.f32 %v2196_v0, %v1300_v58  ;;  %v1459_v15 = vmul.f32 %v8168_v46, %v8168_v46  ;;  %v5883_v4 = vld [vmem:[#allocation9 + $0x270] ss:$8 sps:$4 sm:$0xff]   ;;  %v5888_v58 = vld [vmem:[#allocation9 + $0x284] ss:$8 sps:$4 sm:$0xff]  }
 0x2bb   : > { %v1839_v18 = vadd.f32 %v1711_v56, %v8139_v25  ;;  %v1712_v11 = vmul.f32 0.044715, %v1584_v16  ;;  %v1299_v44 = vmul.f32 0.5, %v7939_v45  ;;  %v2191_v47 = vadd.f32 1.0, %v8038_v48  ;;  %4465 = vmatpush1.bf16.msra.mxu0 %v5880_v61 }
 0x2bc   : > { %v1964_v26 = vmul.f32 0.7978846, %v1836_v59  ;;  %v2436_v24 = vpack.c.bf16 %v2324_v36, %v2320_v22  ;;  %v1587_v19 = vmul.f32 %v1459_v15, %v8168_v46  ;;  %v2195_v10 = vadd.f32 1.0, %v8058_v14  ;;  %4466 = vmatprep.subr.bf16.mxu0 %v5885_v54 }
 0x2bd   : > { %v1967_v13 = vmul.f32 0.7978846, %v1839_v18  ;;  %v1840_v0 = vadd.f32 %v1712_v11, %v8151_v17  ;;  %v2319_v30 = vmul.f32 %v2191_v47, %v1295_v39  ;;  %v8189_v56 = vadd.f32 %v7900_v37, %v7742_v20 }
 0x2be   : > { %v8191_v45 = vpop.eup %6084  ;;  %6092 = vtanh.f32 %v1964_v26  ;;  %3060 = vmatprep.mubr.bf16.mxu0 %v2436_v24  ;;  %v1715_v48 = vmul.f32 0.044715, %v1587_v19  ;;  %v2323_v61 = vmul.f32 %v2195_v10, %v1299_v44  ;;  %v8195_v16 = vadd.f32 %v7929_v32, %v7737_v49  ;;  %v8197_v14 = vpop.f32.mrb[120].mxu1  ;;  %v5886_v19 = vld [vmem:[#allocation9 + $0x280] ss:$8 sps:$4 sm:$0xff]  }
 0x2bf   : > { %v8199_v54 = vpop.eup %6086  ;;  %6094 = vtanh.f32 %v1967_v13  ;;  %v1968_v22 = vmul.f32 0.7978846, %v1840_v0  ;;  %v1460_v37 = vmul.f32 %v8189_v56, %v8189_v56  ;;  %v8205_v39 = vadd.f32 %v7934_v42, %v7742_v20  ;;  %4467 = vmatpush1.bf16.msra.mxu0 %v5883_v4  ;;  %v8207_v59 = vpop.f32.mrb[121].mxu1  ;;  %v5891_v44 = vld [vmem:[#allocation9 + $0x294] ss:$8 sps:$4 sm:$0xff]  }
 0x2c0   : > { %v8209_v36 = vpop.eup %6088  ;;  %v1843_v32 = vadd.f32 %v1715_v48, %v8168_v46  ;;  %v2435_v15 = vpack.c.bf16 %v2323_v61, %v2319_v30  ;;  %v1463_v18 = vmul.f32 %v8195_v16, %v8195_v16  ;;  %v1304_v11 = vmul.f32 0.5, %v7979_v27  ;;  %4468 = vmatprep.subr.bf16.mxu0 %v5888_v58  ;;  %v8215_v47 = vpop.f32.mrb[122].mxu1 }
 0x2c1   : > { %6096 = vtanh.f32 %v1968_v22  ;;  %v1588_v42 = vmul.f32 %v1460_v37, %v8189_v56  ;;  %v1464_v4 = vmul.f32 %v8205_v39, %v8205_v39  ;;  %v1308_v26 = vmul.f32 0.5, %v8011_v60  ;;  %v8221_v24 = vpop.f32.mrb[123].mxu1  ;;  %v5889_v60 = vld [vmem:[#allocation9 + $0x290] ss:$8 sps:$4 sm:$0xff]  }
 0x2c2   : > { %v1971_v30 = vmul.f32 0.7978846, %v1843_v32  ;;  %3061 = vmatmul.mubr.bf16.gmra.mrb[12].mxu0 %v2435_v15  ;;  %v1591_v10 = vmul.f32 %v1463_v18, %v8195_v16  ;;  %v2200_v27 = vadd.f32 1.0, %v8101_v63  ;;  %v2204_v58 = vadd.f32 1.0, %v8135_v5  ;;  %v5894_v63 = vld [vmem:[#allocation9 + $0x2a4] ss:$8 sps:$4 sm:$0xff]  }
 0x2c3   : > { %v1716_v13 = vmul.f32 0.044715, %v1588_v42  ;;  %v1592_v0 = vmul.f32 %v1464_v4, %v8205_v39  ;;  %v8229_v48 = vadd.f32 %v7942_v3, %v7737_v49  ;;  %v1303_v61 = vmul.f32 0.5, %v7965_v8  ;;  %4469 = vmatpush1.bf16.msra.mxu0 %v5886_v19 }
 0x2c4   : > { %v8232_v22 = vpop.eup %6090  ;;  %6098 = vtanh.f32 %v1971_v30  ;;  %v1719_v37 = vmul.f32 0.044715, %v1591_v10  ;;  %v2328_v32 = vmul.f32 %v2200_v27, %v1304_v11  ;;  %v2332_v15 = vmul.f32 %v2204_v58, %v1308_v26  ;;  %4470 = vmatprep.subr.bf16.mxu0 %v5891_v44 }
 0x2c5   : > { %v1844_v5 = vadd.f32 %v1716_v13, %v8189_v56  ;;  %v1720_v18 = vmul.f32 0.044715, %v1592_v0  ;;  %v1467_v42 = vmul.f32 %v8229_v48, %v8229_v48  ;;  %v1307_v3 = vmul.f32 0.5, %v7998_v55  ;;  %v5892_v55 = vld [vmem:[#allocation9 + $0x2a0] ss:$8 sps:$4 sm:$0xff]  }
 0x2c6   : > { %v1847_v8 = vadd.f32 %v1719_v37, %v8195_v16  ;;  %v2440_v19 = vpack.c.bf16 %v2332_v15, %v2328_v32  ;;  %v2199_v4 = vadd.f32 1.0, %v8091_v57  ;;  %v2203_v30 = vadd.f32 1.0, %v8116_v34  ;;  %v8241_v10 = vpop.f32.mrb[124].mxu1  ;;  %v5897_v15 = vld [vmem:[#allocation9 + $0x2b4] ss:$8 sps:$4 sm:$0xff]  }
 0x2c7   : > { %v1972_v11 = vmul.f32 0.7978846, %v1844_v5  ;;  %v1848_v44 = vadd.f32 %v1720_v18, %v8205_v39  ;;  %v1595_v26 = vmul.f32 %v1467_v42, %v8229_v48  ;;  %v8247_v27 = vadd.f32 %v7946_v7, %v7742_v20  ;;  %4471 = vmatpush1.bf16.msra.mxu0 %v5889_v60  ;;  %v8249_v58 = vpop.f32.mrb[125].mxu1 }
 0x2c8   : > { %v8251_v13 = vpop.eup %6092  ;;  %v1975_v57 = vmul.f32 0.7978846, %v1847_v8  ;;  %3070 = vmatprep.mubr.bf16.mxu0 %v2440_v19  ;;  %v2327_v34 = vmul.f32 %v2199_v4, %v1303_v61  ;;  %v2331_v0 = vmul.f32 %v2203_v30, %v1307_v3  ;;  %v8255_v37 = vadd.f32 %v7971_v51, %v7737_v49  ;;  %4472 = vmatprep.subr.bf16.mxu0 %v5894_v63  ;;  %v8257_v32 = vpop.f32.mrb[126].mxu1  ;;  %v5895_v30 = vld [vmem:[#allocation9 + $0x2b0] ss:$8 sps:$4 sm:$0xff]  }
 0x2c9   : > { %v8259_v7 = vpop.eup %6094  ;;  %6100 = vtanh.f32 %v1972_v11  ;;  %v1976_v60 = vmul.f32 0.7978846, %v1848_v44  ;;  %v1723_v5 = vmul.f32 0.044715, %v1595_v26  ;;  %v1468_v18 = vmul.f32 %v8247_v27, %v8247_v27  ;;  %v8263_v42 = vpop.f32.mrb[127].mxu1 }
 0x2ca   : > { %9810 = vst [vmem:[#allocation32_spill] sm:$0xff] %v8263_v42  ;;  %6102 = vtanh.f32 %v1975_v57  ;;  %v2439_v61 = vpack.c.bf16 %v2331_v0, %v2327_v34  ;;  %v1471_v51 = vmul.f32 %v8255_v37, %v8255_v37  ;;  %v8269_v63 = vadd.f32 %v7981_v52, %v7742_v20  ;;  %v5900_v57 = vld [vmem:[#allocation9 + $0x2c4] ss:$8 sps:$4 sm:$0xff]  }
 0x2cb   : > { %v8271_v3 = vpop.eup %6096  ;;  %6104 = vtanh.f32 %v1976_v60  ;;  %v1851_v8 = vadd.f32 %v1723_v5, %v8229_v48  ;;  %v1596_v19 = vmul.f32 %v1468_v18, %v8247_v27  ;;  %v1312_v4 = vmul.f32 0.5, %v8020_v62  ;;  %4473 = vmatpush1.bf16.msra.mxu0 %v5892_v55  ;;  %v9811_v62 = vld [vmem:[#allocation22_spill] sm:$0xff] }
 0x2cc   : > { %3071 = vmatmul.mubr.bf16.gmra.mrb[16].mxu0 %v2439_v61  ;;  %v1599_v11 = vmul.f32 %v1471_v51, %v8255_v37  ;;  %v1472_v44 = vmul.f32 %v8269_v63, %v8269_v63  ;;  %v1316_v52 = vmul.f32 0.5, %v8073_v1  ;;  %v2208_v26 = vadd.f32 1.0, %v8145_v23  ;;  %4474 = vmatprep.subr.bf16.mxu0 %v5897_v15 }
 0x2cd   : > { %v1979_v34 = vmul.f32 0.7978846, %v1851_v8  ;;  %v1724_v0 = vmul.f32 0.044715, %v1596_v19  ;;  %v2212_v60 = vadd.f32 1.0, %v8191_v45  ;;  %v8284_v55 = vadd.f32 %v9811_v62, %v7737_v49 }
 0x2ce   : > { %v8286_v5 = vpop.eup %6098  ;;  %v1727_v18 = vmul.f32 0.044715, %v1599_v11  ;;  %v1600_v61 = vmul.f32 %v1472_v44, %v8269_v63  ;;  %v2336_v51 = vmul.f32 %v2208_v26, %v1312_v4  ;;  %v1311_v1 = vmul.f32 0.5, %v8015_v40  ;;  %v8290_v42 = vpop.f32.mrb[128].mxu1  ;;  %v5898_v19 = vld [vmem:[#allocation9 + $0x2c0] ss:$8 sps:$4 sm:$0xff]  }
 0x2cf   : > { %9812 = vst [vmem:[#allocation36_spill] sm:$0xff] %v8290_v42  ;;  %6106 = vtanh.f32 %v1979_v34  ;;  %v1852_v23 = vadd.f32 %v1724_v0, %v8247_v27  ;;  %v2340_v15 = vmul.f32 %v2212_v60, %v1316_v52  ;;  %v1475_v45 = vmul.f32 %v8284_v55, %v8284_v55  ;;  %4475 = vmatpush1.bf16.msra.mxu0 %v5895_v30  ;;  %v8295_v8 = vpop.f32.mrb[129].mxu1  ;;  %v5903_v62 = vld [vmem:[#allocation9 + $0x2d4] ss:$8 sps:$4 sm:$0xff]  }
 0x2d0   : > { %9813 = vst [vmem:[#allocation33_spill] sm:$0xff] %v8295_v8  ;;  %v1855_v11 = vadd.f32 %v1727_v18, %v8255_v37  ;;  %v1728_v44 = vmul.f32 0.044715, %v1600_v61  ;;  %v1315_v4 = vmul.f32 0.5, %v8053_v6  ;;  %v2207_v40 = vadd.f32 1.0, %v8141_v38  ;;  %v8300_v26 = vpop.f32.mrb[130].mxu1  ;;  %4476 = vmatprep.subr.bf16.mxu0 %v5900_v57 }
 0x2d1   : > { %9814 = vst [vmem:[#allocation34_spill] sm:$0xff] %v8300_v26  ;;  %v1980_v34 = vmul.f32 0.7978846, %v1852_v23  ;;  %v2444_v52 = vpack.c.bf16 %v2340_v15, %v2336_v51  ;;  %v1603_v0 = vmul.f32 %v1475_v45, %v8284_v55  ;;  %v2211_v30 = vadd.f32 1.0, %v8176_v29  ;;  %v8304_v60 = vpop.f32.mrb[131].mxu1  ;;  %v9816_v61 = vld [vmem:[#allocation23_spill] sm:$0xff] }
 0x2d2   : > { %9815 = vst [vmem:[#allocation35_spill] sm:$0xff] %v8304_v60  ;;  %v1983_v8 = vmul.f32 0.7978846, %v1855_v11  ;;  %v1856_v42 = vadd.f32 %v1728_v44, %v8269_v63  ;;  %v2335_v18 = vmul.f32 %v2207_v40, %v1311_v1  ;;  %v8309_v6 = vadd.f32 %v9816_v61, %v7742_v20  ;;  %v9817_v23 = vld [vmem:[#allocation24_spill] sm:$0xff]  ;;  %v9818_v11 = vld [vmem:[#allocation25_spill] sm:$0xff] }
 0x2d3   : > { %v8311_v38 = vpop.eup %6100  ;;  %6108 = vtanh.f32 %v1980_v34  ;;  %3080 = vmatprep.mubr.bf16.mxu0 %v2444_v52  ;;  %v1731_v57 = vmul.f32 0.044715, %v1603_v0  ;;  %v2339_v51 = vmul.f32 %v2211_v30, %v1315_v4  ;;  %v8315_v15 = vadd.f32 %v9817_v23, %v7737_v49  ;;  %4477 = vmatpush1.bf16.msra.mxu0 %v5898_v19  ;;  %v5901_v40 = vld [vmem:[#allocation9 + $0x2d0] ss:$8 sps:$4 sm:$0xff]  }
 0x2d4   : > { %v8317_v29 = vpop.eup %6102  ;;  %6110 = vtanh.f32 %v1983_v8  ;;  %v1984_v45 = vmul.f32 0.7978846, %v1856_v42  ;;  %v1476_v1 = vmul.f32 %v8309_v6, %v8309_v6  ;;  %v8323_v44 = vadd.f32 %v9818_v11, %v7742_v20  ;;  %4478 = vmatprep.subr.bf16.mxu0 %v5903_v62  ;;  %v5906_v42 = vld [vmem:[#allocation9 + $0x2e4] ss:$8 sps:$4 sm:$0xff]  }
 0x2d5   : > { %v8325_v34 = vpop.eup %6104  ;;  %v1859_v4 = vadd.f32 %v1731_v57, %v8284_v55  ;;  %v2443_v52 = vpack.c.bf16 %v2339_v51, %v2335_v18  ;;  %v1479_v19 = vmul.f32 %v8315_v15, %v8315_v15  ;;  %v1320_v8 = vmul.f32 0.5, %v8083_v35  ;;  %v9821_v11 = vld [vmem:[#allocation26_spill] sm:$0xff] }
 0x2d6   : > { %6112 = vtanh.f32 %v1984_v45  ;;  %v1604_v0 = vmul.f32 %v1476_v1, %v8309_v6  ;;  %v1480_v30 = vmul.f32 %v8323_v44, %v8323_v44  ;;  %v1324_v61 = vmul.f32 0.5, %v8133_v33  ;;  %v8335_v62 = vpop.f32.mrb[132].mxu1 }
 0x2d7   : > { %9819 = vst [vmem:[#allocation21_spill] sm:$0xff] %v8335_v62  ;;  %v1987_v23 = vmul.f32 0.7978846, %v1859_v4  ;;  %3081 = vmatmul.mubr.bf16.gmra.mrb[20].mxu0 %v2443_v52  ;;  %v1607_v18 = vmul.f32 %v1479_v19, %v8315_v15  ;;  %v2216_v57 = vadd.f32 1.0, %v8209_v36  ;;  %v2220_v51 = vadd.f32 1.0, %v8251_v13  ;;  %v8340_v35 = vpop.f32.mrb[133].mxu1 }
 0x2d8   : > { %9820 = vst [vmem:[#allocation22_spill] sm:$0xff] %v8340_v35  ;;  %v1732_v45 = vmul.f32 0.044715, %v1604_v0  ;;  %v1608_v1 = vmul.f32 %v1480_v30, %v8323_v44  ;;  %v8345_v60 = vadd.f32 %v9821_v11, %v7737_v49  ;;  %v1319_v33 = vmul.f32 0.5, %v8079_v2  ;;  %v8348_v62 = vpop.f32.mrb[134].mxu1  ;;  %4479 = vmatpush1.bf16.msra.mxu0 %v5901_v40 }
 0x2d9   : > { %9822 = vst [vmem:[#allocation23_spill] sm:$0xff] %v8348_v62  ;;  %v5904_v4 = vld [vmem:[#allocation9 + $0x2e0] ss:$8 sps:$4 sm:$0xff]   ;;  %v8350_v52 = vpop.eup %6106  ;;  %6114 = vtanh.f32 %v1987_v23  ;;  %v1735_v36 = vmul.f32 0.044715, %v1607_v18  ;;  %v2344_v13 = vmul.f32 %v2216_v57, %v1320_v8  ;;  %v2348_v19 = vmul.f32 %v2220_v51, %v1324_v61  ;;  %v8352_v35 = vpop.f32.mrb[135].mxu1  ;;  %4480 = vmatprep.subr.bf16.mxu0 %v5906_v42 }
 0x2da   : > { %v5909_v0 = vld [vmem:[#allocation9 + $0x2f4] ss:$8 sps:$4 sm:$0xff]   ;;  %v1860_v30 = vadd.f32 %v1732_v45, %v8309_v6  ;;  %v1736_v11 = vmul.f32 0.044715, %v1608_v1  ;;  %v1483_v2 = vmul.f32 %v8345_v60, %v8345_v60  ;;  %v1323_v62 = vmul.f32 0.5, %v8109_v28 }
 0x2db   : > { %v1863_v40 = vadd.f32 %v1735_v36, %v8315_v15  ;;  %v2448_v26 = vpack.c.bf16 %v2348_v19, %v2344_v13  ;;  %v2215_v23 = vadd.f32 1.0, %v8199_v54  ;;  %v2219_v8 = vadd.f32 1.0, %v8232_v22  ;;  %v9823_v57 = vld [vmem:[#allocation27_spill] sm:$0xff] }
 0x2dc   : > { %v1988_v61 = vmul.f32 0.7978846, %v1860_v30  ;;  %v1864_v18 = vadd.f32 %v1736_v11, %v8323_v44  ;;  %v1611_v42 = vmul.f32 %v1483_v2, %v8345_v60  ;;  %v8365_v51 = vadd.f32 %v9823_v57, %v7742_v20  ;;  %4481 = vmatpush1.bf16.msra.mxu0 %v5904_v4  ;;  %v5907_v45 = vld [vmem:[#allocation9 + $0x2f0] ss:$8 sps:$4 sm:$0xff]  }
 0x2dd   : > { %v8367_v1 = vpop.eup %6108  ;;  %v1991_v28 = vmul.f32 0.7978846, %v1863_v40  ;;  %3090 = vmatprep.mubr.bf16.mxu0 %v2448_v26  ;;  %v2343_v36 = vmul.f32 %v2215_v23, %v1319_v33  ;;  %v2347_v13 = vmul.f32 %v2219_v8, %v1323_v62  ;;  %v8371_v54 = vadd.f32 %v8064_v31, %v7737_v49  ;;  %4482 = vmatprep.subr.bf16.mxu0 %v5909_v0 }
 0x2de   : > { %v8373_v22 = vpop.eup %6110  ;;  %6116 = vtanh.f32 %v1988_v61  ;;  %v1992_v19 = vmul.f32 0.7978846, %v1864_v18  ;;  %v1739_v30 = vmul.f32 0.044715, %v1611_v42  ;;  %v1484_v4 = vmul.f32 %v8365_v51, %v8365_v51  ;;  %v8377_v11 = vpop.f32.mrb[136].mxu1 }
 0x2df   : > { %6118 = vtanh.f32 %v1991_v28  ;;  %v2447_v2 = vpack.c.bf16 %v2347_v13, %v2343_v36  ;;  %v1487_v26 = vmul.f32 %v8371_v54, %v8371_v54  ;;  %v8383_v31 = vadd.f32 %v8067_v12, %v7742_v20  ;;  %v8385_v62 = vpop.f32.mrb[137].mxu1 }
 0x2e0   : > { %v8387_v33 = vpop.eup %6112  ;;  %6120 = vtanh.f32 %v1992_v19  ;;  %v1867_v0 = vadd.f32 %v1739_v30, %v8345_v60  ;;  %v1612_v40 = vmul.f32 %v1484_v4, %v8365_v51  ;;  %v1328_v23 = vmul.f32 0.5, %v8151_v17  ;;  %v8392_v8 = vpop.f32.mrb[138].mxu1  ;;  %4483 = vmatpush1.bf16.msra.mxu0 %v5907_v45 }
 0x2e1   : > { %3091 = vmatmul.mubr.bf16.gmra.mrb[24].mxu0 %v2447_v2  ;;  %v1615_v61 = vmul.f32 %v1487_v26, %v8371_v54  ;;  %v1488_v12 = vmul.f32 %v8383_v31, %v8383_v31  ;;  %v1332_v18 = vmul.f32 0.5, %v8189_v56  ;;  %v2224_v42 = vadd.f32 1.0, %v8271_v3  ;;  %v8399_v57 = vpop.f32.mrb[139].mxu1 }
 0x2e2   : > { %9824 = vst [vmem:[#allocation24_spill] sm:$0xff] %v8399_v57  ;;  %v1995_v28 = vmul.f32 0.7978846, %v1867_v0  ;;  %v1740_v36 = vmul.f32 0.044715, %v1612_v40  ;;  %v2228_v13 = vadd.f32 1.0, %v8311_v38  ;;  %v8404_v17 = vadd.f32 %v8075_v9, %v7737_v49 }
 0x2e3   : > { %v8406_v45 = vpop.eup %6114  ;;  %v1743_v19 = vmul.f32 0.044715, %v1615_v61  ;;  %v1616_v30 = vmul.f32 %v1488_v12, %v8383_v31  ;;  %v2352_v4 = vmul.f32 %v2224_v42, %v1328_v23  ;;  %v1327_v56 = vmul.f32 0.5, %v8139_v25 }
 0x2e4   : > { %6122 = vtanh.f32 %v1995_v28  ;;  %v1868_v3 = vadd.f32 %v1740_v36, %v8365_v51  ;;  %v2356_v2 = vmul.f32 %v2228_v13, %v1332_v18  ;;  %v1491_v26 = vmul.f32 %v8404_v17, %v8404_v17 }
 0x2e5   : > { %v1871_v38 = vadd.f32 %v1743_v19, %v8371_v54  ;;  %v1744_v0 = vmul.f32 0.044715, %v1616_v30  ;;  %v1331_v9 = vmul.f32 0.5, %v8168_v46  ;;  %v2223_v40 = vadd.f32 1.0, %v8259_v7 }
 0x2e6   : > { %v1996_v61 = vmul.f32 0.7978846, %v1868_v3  ;;  %v2452_v57 = vpack.c.bf16 %v2356_v2, %v2352_v4  ;;  %v1619_v23 = vmul.f32 %v1491_v26, %v8404_v17  ;;  %v2227_v25 = vadd.f32 1.0, %v8286_v5  ;;  %v8418_v12 = vpop.f32.mrb[140].mxu1 }
 0x2e7   : > { %v1999_v42 = vmul.f32 0.7978846, %v1871_v38  ;;  %v1872_v18 = vadd.f32 %v1744_v0, %v8383_v31  ;;  %v2351_v28 = vmul.f32 %v2223_v40, %v1327_v56  ;;  %v8423_v36 = vadd.f32 %v8085_v41, %v7742_v20  ;;  %v8425_v13 = vpop.f32.mrb[141].mxu1 }
 0x2e8   : > { %v8427_v46 = vpop.eup %6116  ;;  %6124 = vtanh.f32 %v1996_v61  ;;  %3100 = vmatprep.mubr.bf16.mxu0 %v2452_v57  ;;  %v1747_v7 = vmul.f32 0.044715, %v1619_v23  ;;  %v2355_v19 = vmul.f32 %v2227_v25, %v1331_v9  ;;  %v8431_v5 = vadd.f32 %v8112_v50, %v7737_v49  ;;  %v8433_v30 = vpop.f32.mrb[142].mxu1 }
 0x2e9   : > { %v8435_v4 = vpop.eup %6118  ;;  %6126 = vtanh.f32 %v1999_v42  ;;  %v2000_v56 = vmul.f32 0.7978846, %v1872_v18  ;;  %v1492_v41 = vmul.f32 %v8423_v36, %v8423_v36  ;;  %v8441_v3 = vadd.f32 %v8114_v53, %v7742_v20  ;;  %v8443_v57 = vpop.f32.mrb[143].mxu1 }
 0x2ea   : > { %v8445_v2 = vpop.eup %6120  ;;  %v1875_v50 = vadd.f32 %v1747_v7, %v8404_v17  ;;  %v2451_v26 = vpack.c.bf16 %v2355_v19, %v2351_v28  ;;  %v1495_v38 = vmul.f32 %v8431_v5, %v8431_v5  ;;  %v1336_v0 = vmul.f32 0.5, %v8205_v39  ;;  %v9825_v39 = vld [vmem:[#allocation28_spill] sm:$0xff] }
 0x2eb   : > { %6128 = vtanh.f32 %v2000_v56  ;;  %v1620_v9 = vmul.f32 %v1492_v41, %v8423_v36  ;;  %v1496_v40 = vmul.f32 %v8441_v3, %v8441_v3  ;;  %v1340_v53 = vmul.f32 0.5, %v8247_v27 }
 0x2ec   : > { %v2003_v61 = vmul.f32 0.7978846, %v1875_v50  ;;  %3101 = vmatmul.mubr.bf16.gmra.mrb[28].mxu0 %v2451_v26  ;;  %v1623_v23 = vmul.f32 %v1495_v38, %v8431_v5  ;;  %v2232_v25 = vadd.f32 1.0, %v8325_v34  ;;  %v2236_v42 = vadd.f32 1.0, %v8367_v1 }
 0x2ed   : > { %v1748_v18 = vmul.f32 0.044715, %v1620_v9  ;;  %v1624_v28 = vmul.f32 %v1496_v40, %v8441_v3  ;;  %v8461_v7 = vadd.f32 %v9825_v39, %v7737_v49  ;;  %v1335_v19 = vmul.f32 0.5, %v8195_v16 }
 0x2ee   : > { %v8464_v56 = vpop.eup %6122  ;;  %6130 = vtanh.f32 %v2003_v61  ;;  %v1751_v27 = vmul.f32 0.044715, %v1623_v23  ;;  %v2360_v41 = vmul.f32 %v2232_v25, %v1336_v0  ;;  %v2364_v50 = vmul.f32 %v2236_v42, %v1340_v53  ;;  %v8466_v26 = vpop.f32.mrb[144].mxu1 }
 0x2ef   : > { %v1876_v34 = vadd.f32 %v1748_v18, %v8423_v36  ;;  %v1752_v1 = vmul.f32 0.044715, %v1624_v28  ;;  %v1499_v38 = vmul.f32 %v8461_v7, %v8461_v7  ;;  %v1339_v9 = vmul.f32 0.5, %v8229_v48  ;;  %v8472_v40 = vpop.f32.mrb[145].mxu1 }
 0x2f0   : > { %v1879_v16 = vadd.f32 %v1751_v27, %v8431_v5  ;;  %v2456_v39 = vpack.c.bf16 %v2364_v50, %v2360_v41  ;;  %v2231_v61 = vadd.f32 1.0, %v8317_v29  ;;  %v2235_v0 = vadd.f32 1.0, %v8350_v52  ;;  %v8477_v53 = vpop.f32.mrb[146].mxu1  ;;  %v9828_v52 = vld [vmem:[#allocation29_spill] sm:$0xff] }
 0x2f1   : > { %9826 = vst [vmem:[#allocation25_spill] sm:$0xff] %v8477_v53  ;;  %v2004_v23 = vmul.f32 0.7978846, %v1876_v34  ;;  %v1880_v25 = vadd.f32 %v1752_v1, %v8441_v3  ;;  %v1627_v42 = vmul.f32 %v1499_v38, %v8461_v7  ;;  %v8483_v18 = vadd.f32 %v8127_v43, %v7742_v20  ;;  %v8485_v48 = vpop.f32.mrb[147].mxu1 }
 0x2f2   : > { %9827 = vst [vmem:[#allocation26_spill] sm:$0xff] %v8485_v48  ;;  %v8487_v28 = vpop.eup %6124  ;;  %v2007_v27 = vmul.f32 0.7978846, %v1879_v16  ;;  %3110 = vmatprep.mubr.bf16.mxu0 %v2456_v39  ;;  %v2359_v29 = vmul.f32 %v2231_v61, %v1335_v19  ;;  %v2363_v41 = vmul.f32 %v2235_v0, %v1339_v9  ;;  %v8491_v50 = vadd.f32 %v9828_v52, %v7737_v49 }
 0x2f3   : > { %v8493_v34 = vpop.eup %6126  ;;  %6132 = vtanh.f32 %v2004_v23  ;;  %v2008_v1 = vmul.f32 0.7978846, %v1880_v25  ;;  %v1755_v38 = vmul.f32 0.044715, %v1627_v42  ;;  %v1500_v43 = vmul.f32 %v8483_v18, %v8483_v18 }
 0x2f4   : > { %6134 = vtanh.f32 %v2007_v27  ;;  %v2455_v48 = vpack.c.bf16 %v2363_v41, %v2359_v29  ;;  %v1503_v16 = vmul.f32 %v8491_v50, %v8491_v50  ;;  %v8501_v19 = vadd.f32 %v8163_v21, %v7742_v20 }
 0x2f5   : > { %v8503_v9 = vpop.eup %6128  ;;  %6136 = vtanh.f32 %v2008_v1  ;;  %v1883_v39 = vadd.f32 %v1755_v38, %v8461_v7  ;;  %v1628_v61 = vmul.f32 %v1500_v43, %v8483_v18  ;;  %v1344_v0 = vmul.f32 0.5, %v8269_v63  ;;  %v9830_v1 = vld [vmem:[#allocation30_spill] sm:$0xff] }
 0x2f6   : > { %3111 = vmatmul.mubr.bf16.gmra.mrb[32].mxu0 %v2455_v48  ;;  %v1631_v23 = vmul.f32 %v1503_v16, %v8491_v50  ;;  %v1504_v25 = vmul.f32 %v8501_v19, %v8501_v19  ;;  %v1348_v42 = vmul.f32 0.5, %v8309_v6  ;;  %v2240_v21 = vadd.f32 1.0, %v8387_v33  ;;  %v8513_v27 = vpop.f32.mrb[148].mxu1 }
 0x2f7   : > { %9829 = vst [vmem:[#allocation27_spill] sm:$0xff] %v8513_v27  ;;  %v2011_v29 = vmul.f32 0.7978846, %v1883_v39  ;;  %v1756_v41 = vmul.f32 0.044715, %v1628_v61  ;;  %v2244_v52 = vadd.f32 1.0, %v8427_v46  ;;  %v8518_v38 = vadd.f32 %v9830_v1, %v7737_v49 }
 0x2f8   : > { %v8520_v63 = vpop.f32.mrb[149].mxu1  ;;  %v8522_v48 = vpop.eup %6130  ;;  %v1759_v43 = vmul.f32 0.044715, %v1631_v23  ;;  %v1632_v16 = vmul.f32 %v1504_v25, %v8501_v19  ;;  %v2368_v6 = vmul.f32 %v2240_v21, %v1344_v0  ;;  %v1343_v33 = vmul.f32 0.5, %v8255_v37 }
 0x2f9   : > { %9831 = vst [vmem:[#allocation28_spill] sm:$0xff] %v8520_v63  ;;  %v8526_v53 = vpop.f32.mrb[150].mxu1  ;;  %6138 = vtanh.f32 %v2011_v29  ;;  %v1884_v39 = vadd.f32 %v1756_v41, %v8483_v18  ;;  %v2372_v46 = vmul.f32 %v2244_v52, %v1348_v42  ;;  %v1507_v61 = vmul.f32 %v8518_v38, %v8518_v38 }
 0x2fa   : > { %9832 = vst [vmem:[#allocation29_spill] sm:$0xff] %v8526_v53  ;;  %v8531_v1 = vpop.f32.mrb[151].mxu1  ;;  %v1887_v63 = vadd.f32 %v1759_v43, %v8491_v50  ;;  %v1760_v27 = vmul.f32 0.044715, %v1632_v16  ;;  %v1347_v23 = vmul.f32 0.5, %v8284_v55  ;;  %v2239_v0 = vadd.f32 1.0, %v8373_v22 }
 0x2fb   : > { %9833 = vst [vmem:[#allocation30_spill] sm:$0xff] %v8531_v1  ;;  %v2012_v25 = vmul.f32 0.7978846, %v1884_v39  ;;  %v2460_v37 = vpack.c.bf16 %v2372_v46, %v2368_v6  ;;  %v1635_v21 = vmul.f32 %v1507_v61, %v8518_v38  ;;  %v2243_v29 = vadd.f32 1.0, %v8406_v45  ;;  %v9834_v53 = vld [vmem:[#allocation31_spill] sm:$0xff] }
 0x2fc   : > { %v2015_v41 = vmul.f32 0.7978846, %v1887_v63  ;;  %v1888_v42 = vadd.f32 %v1760_v27, %v8501_v19  ;;  %v2367_v52 = vmul.f32 %v2239_v0, %v1343_v33  ;;  %v8541_v1 = vadd.f32 %v9834_v53, %v7742_v20 }
 0x2fd   : > { %v8543_v43 = vpop.eup %6132  ;;  %6140 = vtanh.f32 %v2012_v25  ;;  %3120 = vmatprep.mubr.bf16.mxu0 %v2460_v37  ;;  %v1763_v55 = vmul.f32 0.044715, %v1635_v21  ;;  %v2371_v22 = vmul.f32 %v2243_v29, %v1347_v23  ;;  %v8547_v16 = vadd.f32 %v8197_v14, %v7737_v49 }
 0x2fe   : > { %v8549_v6 = vpop.eup %6134  ;;  %6142 = vtanh.f32 %v2015_v41  ;;  %v2016_v45 = vmul.f32 0.7978846, %v1888_v42  ;;  %v1508_v27 = vmul.f32 %v8541_v1, %v8541_v1  ;;  %v8555_v53 = vadd.f32 %v8207_v59, %v7742_v20  ;;  %v8557_v63 = vpop.f32.mrb[152].mxu1 }
 0x2ff   : > { %v8559_v33 = vpop.eup %6136  ;;  %v1891_v39 = vadd.f32 %v1763_v55, %v8518_v38  ;;  %v2459_v46 = vpack.c.bf16 %v2371_v22, %v2367_v52  ;;  %v1511_v14 = vmul.f32 %v8547_v16, %v8547_v16  ;;  %v1352_v61 = vmul.f32 0.5, %v8323_v44  ;;  %v8565_v23 = vpop.f32.mrb[153].mxu1 }
 0x300   : > { %6144 = vtanh.f32 %v2016_v45  ;;  %v1636_v0 = vmul.f32 %v1508_v27, %v8541_v1  ;;  %v1512_v59 = vmul.f32 %v8555_v53, %v8555_v53  ;;  %v1356_v25 = vmul.f32 0.5, %v8365_v51  ;;  %v8571_v37 = vpop.f32.mrb[154].mxu1 }
 0x301   : > { %9835 = vst [vmem:[#allocation31_spill] sm:$0xff] %v8571_v37  ;;  %v2019_v21 = vmul.f32 0.7978846, %v1891_v39  ;;  %3121 = vmatmul.mubr.bf16.gmra.mrb[36].mxu0 %v2459_v46  ;;  %v1639_v29 = vmul.f32 %v1511_v14, %v8547_v16  ;;  %v2248_v41 = vadd.f32 1.0, %v8445_v2  ;;  %v2252_v44 = vadd.f32 1.0, %v8487_v28  ;;  %v8576_v42 = vpop.f32.mrb[155].mxu1 }
 0x302   : > { %9836 = vst [vmem:[#allocation39_spill] sm:$0xff] %v8576_v42  ;;  %v1764_v52 = vmul.f32 0.044715, %v1636_v0  ;;  %v1640_v55 = vmul.f32 %v1512_v59, %v8555_v53  ;;  %v8581_v22 = vadd.f32 %v8215_v47, %v7737_v49  ;;  %v1351_v51 = vmul.f32 0.5, %v8315_v15 }
 0x303   : > { %v8584_v45 = vpop.eup %6138  ;;  %6146 = vtanh.f32 %v2019_v21  ;;  %v1767_v27 = vmul.f32 0.044715, %v1639_v29  ;;  %v2376_v39 = vmul.f32 %v2248_v41, %v1352_v61  ;;  %v2380_v46 = vmul.f32 %v2252_v44, %v1356_v25 }
 0x304   : > { %v1892_v2 = vadd.f32 %v1764_v52, %v8541_v1  ;;  %v1768_v28 = vmul.f32 0.044715, %v1640_v55  ;;  %v1515_v14 = vmul.f32 %v8581_v22, %v8581_v22  ;;  %v1355_v0 = vmul.f32 0.5, %v8345_v60 }
 0x305   : > { %v1895_v59 = vadd.f32 %v1767_v27, %v8547_v16  ;;  %v2464_v47 = vpack.c.bf16 %v2380_v46, %v2376_v39  ;;  %v2247_v42 = vadd.f32 1.0, %v8435_v4  ;;  %v2251_v15 = vadd.f32 1.0, %v8464_v56 }
 0x306   : > { %v2020_v37 = vmul.f32 0.7978846, %v1892_v2  ;;  %v1896_v21 = vadd.f32 %v1768_v28, %v8555_v53  ;;  %v1643_v61 = vmul.f32 %v1515_v14, %v8581_v22  ;;  %v8597_v25 = vadd.f32 %v8221_v24, %v7742_v20  ;;  %v8599_v29 = vpop.f32.mrb[156].mxu1 }
 0x307   : > { %v8601_v41 = vpop.eup %6140  ;;  %v2023_v60 = vmul.f32 0.7978846, %v1895_v59  ;;  %3130 = vmatprep.mubr.bf16.mxu0 %v2464_v47  ;;  %v2375_v44 = vmul.f32 %v2247_v42, %v1351_v51  ;;  %v2379_v52 = vmul.f32 %v2251_v15, %v1355_v0  ;;  %v8605_v4 = vadd.f32 %v8241_v10, %v7737_v49  ;;  %v8607_v56 = vpop.f32.mrb[157].mxu1 }
 0x308   : > { %v8609_v55 = vpop.eup %6142  ;;  %6148 = vtanh.f32 %v2020_v37  ;;  %v2024_v27 = vmul.f32 0.7978846, %v1896_v21  ;;  %v1771_v24 = vmul.f32 0.044715, %v1643_v61  ;;  %v1516_v39 = vmul.f32 %v8597_v25, %v8597_v25  ;;  %v8613_v46 = vpop.f32.mrb[158].mxu1 }
 0x309   : > { %6150 = vtanh.f32 %v2023_v60  ;;  %v2463_v2 = vpack.c.bf16 %v2379_v52, %v2375_v44  ;;  %v1519_v42 = vmul.f32 %v8605_v4, %v8605_v4  ;;  %v8619_v10 = vadd.f32 %v8249_v58, %v7742_v20  ;;  %v8621_v51 = vpop.f32.mrb[159].mxu1 }
 0x30a   : > { %v8623_v28 = vpop.eup %6144  ;;  %6152 = vtanh.f32 %v2024_v27  ;;  %v1899_v37 = vadd.f32 %v1771_v24, %v8581_v22  ;;  %v1644_v14 = vmul.f32 %v1516_v39, %v8597_v25  ;;  %v1360_v0 = vmul.f32 0.5, %v8383_v31 }
 0x30b   : > { %3131 = vmatmul.mubr.bf16.gmra.mrb[40].mxu0 %v2463_v2  ;;  %v1647_v59 = vmul.f32 %v1519_v42, %v8605_v4  ;;  %v1520_v47 = vmul.f32 %v8619_v10, %v8619_v10  ;;  %v1364_v58 = vmul.f32 0.5, %v8423_v36  ;;  %v2256_v15 = vadd.f32 1.0, %v8503_v9 }
 0x30c   : > { %v2027_v21 = vmul.f32 0.7978846, %v1899_v37  ;;  %v1772_v61 = vmul.f32 0.044715, %v1644_v14  ;;  %v2260_v60 = vadd.f32 1.0, %v8543_v43  ;;  %v8636_v44 = vadd.f32 %v8257_v32, %v7737_v49 }
 0x30d   : > { %v8638_v52 = vpop.eup %6146  ;;  %v1775_v31 = vmul.f32 0.044715, %v1647_v59  ;;  %v1648_v27 = vmul.f32 %v1520_v47, %v8619_v10  ;;  %v2384_v24 = vmul.f32 %v2256_v15, %v1360_v0  ;;  %v1359_v39 = vmul.f32 0.5, %v8371_v54  ;;  %v3287_v43 = vld [vmem:[#allocation8 + $0x4] sm:$0x3] }
 0x30e   : > { %6154 = vtanh.f32 %v2027_v21  ;;  %v1900_v36 = vadd.f32 %v1772_v61, %v8597_v25  ;;  %v2388_v9 = vmul.f32 %v2260_v60, %v1364_v58  ;;  %v1523_v2 = vmul.f32 %v8636_v44, %v8636_v44  ;;  %v8645_v42 = vpop.f32.mrb[160].mxu1 }
 0x30f   : > { %9837 = vst [vmem:[#allocation40_spill] sm:$0xff] %v8645_v42  ;;  %v1903_v49 = vadd.f32 %v1775_v31, %v8605_v4  ;;  %v1776_v32 = vmul.f32 0.044715, %v1648_v27  ;;  %v1363_v37 = vmul.f32 0.5, %v8404_v17  ;;  %v2255_v14 = vadd.f32 1.0, %v8493_v34  ;;  %v8650_v0 = vpop.f32.mrb[161].mxu1 }
 0x310   : > { %9838 = vst [vmem:[#allocation41_spill] sm:$0xff] %v8650_v0  ;;  %v2028_v54 = vmul.f32 0.7978846, %v1900_v36  ;;  %v2468_v59 = vpack.c.bf16 %v2388_v9, %v2384_v24  ;;  %v1651_v47 = vmul.f32 %v1523_v2, %v8636_v44  ;;  %v2259_v58 = vadd.f32 1.0, %v8522_v48  ;;  %v8654_v15 = vpop.f32.mrb[162].mxu1  ;;  %v9840_v31 = vld [vmem:[#allocation32_spill] sm:$0xff] }
 0x311   : > { %9839 = vst [vmem:[#allocation42_spill] sm:$0xff] %v8654_v15  ;;  %v2031_v21 = vmul.f32 0.7978846, %v1903_v49  ;;  %v1904_v61 = vadd.f32 %v1776_v32, %v8619_v10  ;;  %v2383_v60 = vmul.f32 %v2255_v14, %v1359_v39  ;;  %v8659_v27 = vadd.f32 %v9840_v31, %v7742_v20  ;;  %v8661_v17 = vpop.f32.mrb[163].mxu1  ;;  %v9842_v9 = vld [vmem:[#allocation37_spill] sm:$0xff] }
 0x312   : > { %9841 = vst [vmem:[#allocation32_spill] sm:$0xff] %v8661_v17  ;;  %v8663_v34 = vpop.eup %6148  ;;  %6156 = vtanh.f32 %v2028_v54  ;;  %3140 = vmatprep.mubr.bf16.mxu0 %v2468_v59  ;;  %v1779_v24 = vmul.f32 0.044715, %v1651_v47  ;;  %v2387_v36 = vmul.f32 %v2259_v58, %v1363_v37  ;;  %v8666_v48 = vrot.slane %v3287_v43, %v9842_v9  ;;  %v9843_v59 = vld [vmem:[#allocation36_spill] sm:$0xff]  ;;  %v9844_v17 = vld [vmem:[#allocation38_spill] sm:$0xff] }
 0x313   : > { %v8668_v2 = vpop.eup %6150  ;;  %6158 = vtanh.f32 %v2031_v21  ;;  %v2032_v49 = vmul.f32 0.7978846, %v1904_v61  ;;  %v1524_v39 = vmul.f32 %v8659_v27, %v8659_v27  ;;  %v1368_v20 = vmul.f32 0.5, %v8441_v3 }
 0x314   : > { %v8673_v32 = vpop.eup %6152  ;;  %v1907_v14 = vadd.f32 %v1779_v24, %v8636_v44  ;;  %v2467_v54 = vpack.c.bf16 %v2387_v36, %v2383_v60  ;;  %v3526_v37 = vadd.f32 %v9843_v59, %v8666_v48  ;;  %v1372_v47 = vmul.f32 0.5, %v8483_v18 }
 0x315   : > { %6160 = vtanh.f32 %v2032_v49  ;;  %v1652_v58 = vmul.f32 %v1524_v39, %v8659_v27  ;;  %v2264_v21 = vadd.f32 1.0, %v8559_v33  ;;  %v2268_v61 = vadd.f32 1.0, %v8601_v41 }
 0x316   : > { %v2035_v31 = vmul.f32 0.7978846, %v1907_v14  ;;  %3141 = vmatmul.mubr.bf16.gmra.mrb[44].mxu0 %v2467_v54  ;;  %v8682_v3 = vmul.f32 0.5, %v3526_v37  ;;  %v3748_v9 = vmul.f32 %v3526_v37, %v3526_v37  ;;  %v8685_v24 = vrot.slane %v3287_v43, %v9844_v17  ;;  %v8687_v60 = vpop.f32.mrb[164].mxu1  ;;  %v9847_v14 = vld [vmem:[#allocation33_spill] sm:$0xff] }
 0x317   : > { %9845 = vst [vmem:[#allocation36_spill] sm:$0xff] %v8687_v60  ;;  %v1780_v36 = vmul.f32 0.044715, %v1652_v58  ;;  %v2392_v59 = vmul.f32 %v2264_v21, %v1368_v20  ;;  %v2396_v18 = vmul.f32 %v2268_v61, %v1372_v47  ;;  %v1367_v49 = vmul.f32 0.5, %v8431_v5  ;;  %v8690_v39 = vpop.f32.mrb[165].mxu1 }
 0x318   : > { %9846 = vst [vmem:[#allocation43_spill] sm:$0xff] %v8690_v39  ;;  %v8692_v33 = vpop.eup %6154  ;;  %6162 = vtanh.f32 %v2035_v31  ;;  %v3812_v41 = vmul.f32 %v3748_v9, %v3526_v37  ;;  %v8696_v54 = vadd.f32 %v9847_v14, %v8685_v24  ;;  %v1371_v43 = vmul.f32 0.5, %v8461_v7  ;;  %v8699_v17 = vpop.f32.mrb[166].mxu1  ;;  %v9850_v31 = vld [vmem:[#allocation34_spill] sm:$0xff]  ;;  %v9851_v7 = vld [vmem:[#allocation35_spill] sm:$0xff] }
 0x319   : > { %9848 = vst [vmem:[#allocation33_spill] sm:$0xff] %v8699_v17  ;;  %v1908_v58 = vadd.f32 %v1780_v36, %v8659_v27  ;;  %v2472_v20 = vpack.c.bf16 %v2396_v18, %v2392_v59  ;;  %v2263_v47 = vadd.f32 1.0, %v8549_v6  ;;  %v2267_v5 = vadd.f32 1.0, %v8584_v45  ;;  %v8704_v21 = vpop.f32.mrb[167].mxu1  ;;  %v9852_v6 = vld [vmem:[#allocation21_spill] sm:$0xff] }
 0x31a   : > { %9849 = vst [vmem:[#allocation44_spill] sm:$0xff] %v8704_v21  ;;  %v3876_v61 = vmul.f32 0.044715, %v3812_v41  ;;  %v3749_v9 = vmul.f32 %v8696_v54, %v8696_v54  ;;  %v3530_v14 = vadd.f32 %v9850_v31, %v8666_v48  ;;  %v8712_v39 = vadd.f32 %v9851_v7, %v8685_v24 }
 0x31b   : > { %v2036_v17 = vmul.f32 0.7978846, %v1908_v58  ;;  %3150 = vmatprep.mubr.bf16.mxu0 %v2472_v20  ;;  %v2391_v36 = vmul.f32 %v2263_v47, %v1367_v49  ;;  %v2395_v59 = vmul.f32 %v2267_v5, %v1371_v43  ;;  %v8716_v45 = vadd.f32 %v9852_v6, %v8666_v48 }
 0x31c   : > { %v8718_v18 = vpop.eup %6156  ;;  %v3940_v41 = vadd.f32 %v3876_v61, %v3526_v37  ;;  %v3813_v21 = vmul.f32 %v3749_v9, %v8696_v54  ;;  %v8721_v60 = vmul.f32 0.5, %v3530_v14  ;;  %v3750_v31 = vmul.f32 %v3530_v14, %v3530_v14 }
 0x31d   : > { %v8723_v15 = vpop.eup %6158  ;;  %6164 = vtanh.f32 %v2036_v17  ;;  %v2471_v7 = vpack.c.bf16 %v2395_v59, %v2391_v36  ;;  %v3751_v49 = vmul.f32 %v8712_v39, %v8712_v39  ;;  %v3752_v43 = vmul.f32 %v8716_v45, %v8716_v45 }
 0x31e   : > { %v4004_v58 = vmul.f32 0.7978846, %v3940_v41  ;;  %v3877_v20 = vmul.f32 0.044715, %v3813_v21  ;;  %v3814_v47 = vmul.f32 %v3750_v31, %v3530_v14  ;;  %v1376_v37 = vmul.f32 0.5, %v8501_v19  ;;  %v8730_v5 = vpop.f32.mrb[168].mxu1 }
 0x31f   : > { %9853 = vst [vmem:[#allocation34_spill] sm:$0xff] %v8730_v5  ;;  %v8732_v61 = vpop.eup %6160  ;;  %3151 = vmatmul.mubr.bf16.gmra.mrb[48].mxu0 %v2471_v7  ;;  %v3815_v9 = vmul.f32 %v3751_v49, %v8712_v39  ;;  %v3816_v17 = vmul.f32 %v3752_v43, %v8716_v45  ;;  %v1380_v36 = vmul.f32 0.5, %v8541_v1  ;;  %v2272_v59 = vadd.f32 1.0, %v8623_v28  ;;  %v8738_v6 = vpop.f32.mrb[169].mxu1  ;;  %v9855_v49 = vld [vmem:[#allocation22_spill] sm:$0xff] }
 0x320   : > { %9854 = vst [vmem:[#allocation35_spill] sm:$0xff] %v8738_v6  ;;  %6166 = vtanh.f32 %v4004_v58  ;;  %v3941_v21 = vadd.f32 %v3877_v20, %v8696_v54  ;;  %v3878_v41 = vmul.f32 0.044715, %v3814_v47  ;;  %v2276_v19 = vadd.f32 1.0, %v8663_v34  ;;  %v8742_v31 = vpop.f32.mrb[170].mxu1 }
 0x321   : > { %v3879_v5 = vmul.f32 0.044715, %v3815_v9  ;;  %v3880_v7 = vmul.f32 0.044715, %v3816_v17  ;;  %v2400_v0 = vmul.f32 %v2272_v59, %v1376_v37  ;;  %v8746_v43 = vadd.f32 %v9855_v49, %v8685_v24  ;;  %v8748_v1 = vpop.f32.mrb[171].mxu1 }
 0x322   : > { %9856 = vst [vmem:[#allocation21_spill] sm:$0xff] %v8748_v1  ;;  %v8750_v28 = vpop.eup %6162  ;;  %v4005_v6 = vmul.f32 0.7978846, %v3941_v21  ;;  %v3942_v58 = vadd.f32 %v3878_v41, %v3530_v14  ;;  %v2404_v42 = vmul.f32 %v2276_v19, %v1380_v36  ;;  %v1375_v20 = vmul.f32 0.5, %v8491_v50  ;;  %v9857_v36 = vld [vmem:[#allocation23_spill] sm:$0xff] }
 0x323   : > { %v3943_v34 = vadd.f32 %v3879_v5, %v8712_v39  ;;  %v3944_v47 = vadd.f32 %v3880_v7, %v8716_v45  ;;  %v3753_v37 = vmul.f32 %v8746_v43, %v8746_v43  ;;  %v1379_v9 = vmul.f32 0.5, %v8518_v38 }
 0x324   : > { %6168 = vtanh.f32 %v4005_v6  ;;  %v4006_v17 = vmul.f32 0.7978846, %v3942_v58  ;;  %v2476_v59 = vpack.c.bf16 %v2404_v42, %v2400_v0  ;;  %v2271_v49 = vadd.f32 1.0, %v8609_v55 }
 0x325   : > { %v4007_v1 = vmul.f32 0.7978846, %v3943_v34  ;;  %v4008_v21 = vmul.f32 0.7978846, %v3944_v47  ;;  %v3817_v14 = vmul.f32 %v3753_v37, %v8746_v43  ;;  %v2275_v50 = vadd.f32 1.0, %v8638_v52 }
 0x326   : > { %6170 = vtanh.f32 %v4006_v17  ;;  %3160 = vmatprep.mubr.bf16.mxu0 %v2476_v59  ;;  %v2399_v5 = vmul.f32 %v2271_v49, %v1375_v20  ;;  %v8763_v41 = vadd.f32 %v9857_v36, %v8666_v48  ;;  %v8767_v38 = vadd.f32 %v8352_v35, %v8685_v24  ;;  %v8769_v42 = vpop.f32.mrb[172].mxu1 }
 0x327   : > { %v8771_v55 = vpop.eup %6164  ;;  %6172 = vtanh.f32 %v4007_v1  ;;  %v3881_v0 = vmul.f32 0.044715, %v3817_v14  ;;  %v2403_v6 = vmul.f32 %v2275_v50, %v1379_v9  ;;  %v8775_v52 = vadd.f32 %v8377_v11, %v8666_v48  ;;  %v8777_v19 = vpop.f32.mrb[173].mxu1 }
 0x328   : > { %6174 = vtanh.f32 %v4008_v21  ;;  %v3754_v7 = vmul.f32 %v8763_v41, %v8763_v41  ;;  %v3755_v35 = vmul.f32 %v8767_v38, %v8767_v38  ;;  %v1384_v58 = vmul.f32 0.5, %v8555_v53  ;;  %v8784_v20 = vpop.f32.mrb[174].mxu1 }
 0x329   : > { %v3945_v1 = vadd.f32 %v3881_v0, %v8746_v43  ;;  %v2475_v34 = vpack.c.bf16 %v2403_v6, %v2399_v5  ;;  %v3756_v11 = vmul.f32 %v8775_v52, %v8775_v52  ;;  %v1388_v47 = vmul.f32 0.5, %v8597_v25  ;;  %v8790_v37 = vpop.f32.mrb[175].mxu1 }
 0x32a   : > { %v6167_v9 = vpop.eup %6166  ;;  %v3818_v17 = vmul.f32 %v3754_v7, %v8763_v41  ;;  %v3819_v59 = vmul.f32 %v3755_v35, %v8767_v38  ;;  %v2280_v49 = vadd.f32 1.0, %v8673_v32  ;;  %v2284_v53 = vadd.f32 1.0, %v8718_v18 }
 0x32b   : > { %v4132_v21 = vadd.f32 1.0, %v6167_v9  ;;  %v4009_v14 = vmul.f32 0.7978846, %v3945_v1  ;;  %3161 = vmatmul.mubr.bf16.gmra.mrb[52].mxu0 %v2475_v34  ;;  %v3820_v50 = vmul.f32 %v3756_v11, %v8775_v52  ;;  %v8799_v5 = vadd.f32 %v8385_v62, %v8685_v24 }
 0x32c   : > { %v3882_v25 = vmul.f32 0.044715, %v3818_v17  ;;  %v3883_v36 = vmul.f32 0.044715, %v3819_v59  ;;  %v2408_v0 = vmul.f32 %v2280_v49, %v1384_v58  ;;  %v2412_v6 = vmul.f32 %v2284_v53, %v1388_v47 }
 0x32d   : > { %v8802_v7 = vmul.f32 %v4132_v21, %v8682_v3  ;;  %6176 = vtanh.f32 %v4009_v14  ;;  %v3884_v32 = vmul.f32 0.044715, %v3820_v50  ;;  %v3757_v18 = vmul.f32 %v8799_v5, %v8799_v5 }
 0x32e   : > { %v8806_v35 = vpop.eup %6168  ;;  %v3946_v1 = vadd.f32 %v3882_v25, %v8763_v41  ;;  %v3947_v34 = vadd.f32 %v3883_v36, %v8767_v38  ;;  %v2480_v62 = vpack.c.bf16 %v2412_v6, %v2408_v0  ;;  %v1383_v11 = vmul.f32 0.5, %v8547_v16  ;;  %v8811_v9 = vpop.f32.mrb[176].mxu1 }
 0x32f   : > { %v3948_v58 = vadd.f32 %v3884_v32, %v8775_v52  ;;  %v3821_v3 = vmul.f32 %v3757_v18, %v8799_v5  ;;  %v1387_v47 = vmul.f32 0.5, %v8581_v22  ;;  %v2279_v17 = vadd.f32 1.0, %v8668_v2  ;;  %v8817_v59 = vpop.f32.mrb[177].mxu1 }
 0x330   : > { %v6171_v49 = vpop.eup %6170  ;;  %v4010_v53 = vmul.f32 0.7978846, %v3946_v1  ;;  %v4011_v21 = vmul.f32 0.7978846, %v3947_v34  ;;  %3170 = vmatprep.mubr.bf16.mxu0 %v2480_v62  ;;  %v2283_v14 = vadd.f32 1.0, %v8692_v33  ;;  %v8822_v16 = vadd.f32 %v8392_v8, %v8666_v48  ;;  %v8824_v50 = vpop.f32.mrb[178].mxu1 }
 0x331   : > { %v8826_v25 = vpop.eup %6172  ;;  %v4134_v36 = vadd.f32 1.0, %v6171_v49  ;;  %v4012_v22 = vmul.f32 0.7978846, %v3948_v58  ;;  %v3885_v0 = vmul.f32 0.044715, %v3821_v3  ;;  %v2407_v2 = vmul.f32 %v2279_v17, %v1383_v11  ;;  %v8828_v6 = vpop.f32.mrb[179].mxu1 }
 0x332   : > { %v8830_v32 = vpop.eup %6174  ;;  %6178 = vtanh.f32 %v4010_v53  ;;  %v2411_v18 = vmul.f32 %v2283_v14, %v1387_v47  ;;  %v3758_v33 = vmul.f32 %v8822_v16, %v8822_v16  ;;  %v9858_v8 = vld [vmem:[#allocation24_spill] sm:$0xff]  ;;  %v8844_v11 = vadd.f32 %v8418_v12, %v8666_v48 }
 0x333   : > { %v8836_v1 = vadd.f32 %v9858_v8, %v8685_v24  ;;  %v8839_v34 = vmul.f32 %v4134_v36, %v8721_v60  ;;  %6180 = vtanh.f32 %v4011_v21  ;;  %v3949_v62 = vadd.f32 %v3885_v0, %v8799_v5 }
 0x334   : > { %6182 = vtanh.f32 %v4012_v22  ;;  %v2479_v58 = vpack.c.bf16 %v2411_v18, %v2407_v2  ;;  %v3822_v3 = vmul.f32 %v3758_v33, %v8822_v16  ;;  %v3760_v49 = vmul.f32 %v8844_v11, %v8844_v11 }
 0x335   : > { %v3759_v47 = vmul.f32 %v8836_v1, %v8836_v1  ;;  %v4013_v17 = vmul.f32 0.7978846, %v3949_v62  ;;  %v1392_v60 = vmul.f32 0.5, %v8619_v10  ;;  %v1396_v53 = vmul.f32 0.5, %v8659_v27 }
 0x336   : > { %3171 = vmatmul.mubr.bf16.gmra.mrb[56].mxu0 %v2479_v58  ;;  %v3886_v21 = vmul.f32 0.044715, %v3822_v3  ;;  %v2288_v14 = vadd.f32 1.0, %v8732_v61  ;;  %v2292_v36 = vadd.f32 1.0, %v8771_v55  ;;  %v8856_v22 = vpop.f32.mrb[180].mxu1  ;;  %v3824_v2 = vmul.f32 %v3760_v49, %v8844_v11 }
 0x337   : > { %v3823_v12 = vmul.f32 %v3759_v47, %v8836_v1  ;;  %v8858_v0 = vpop.eup %6176  ;;  %6184 = vtanh.f32 %v4013_v17  ;;  %v8863_v10 = vadd.f32 %v8425_v13, %v8685_v24  ;;  %v1391_v27 = vmul.f32 0.5, %v8605_v4  ;;  %v8866_v18 = vpop.f32.mrb[181].mxu1 }
 0x338   : > { %9859 = vst [vmem:[#allocation22_spill] sm:$0xff] %v8866_v18  ;;  %v3950_v33 = vadd.f32 %v3886_v21, %v8822_v16  ;;  %v2416_v8 = vmul.f32 %v2288_v14, %v1392_v60  ;;  %v2420_v55 = vmul.f32 %v2292_v36, %v1396_v53  ;;  %v8869_v62 = vpop.f32.mrb[182].mxu1  ;;  %v3888_v58 = vmul.f32 0.044715, %v3824_v2 }
 0x339   : > { %v3887_v61 = vmul.f32 0.044715, %v3823_v12  ;;  %v3761_v3 = vmul.f32 %v8863_v10, %v8863_v10  ;;  %v1395_v47 = vmul.f32 0.5, %v8636_v44  ;;  %v2287_v13 = vadd.f32 1.0, %v8723_v15  ;;  %v8875_v17 = vpop.f32.mrb[183].mxu1 }
 0x33a   : > { %9860 = vst [vmem:[#allocation23_spill] sm:$0xff] %v8875_v17  ;;  %v4014_v4 = vmul.f32 0.7978846, %v3950_v33  ;;  %v2484_v18 = vpack.c.bf16 %v2420_v55, %v2416_v8  ;;  %v2291_v21 = vadd.f32 1.0, %v8750_v28  ;;  %v3952_v60 = vadd.f32 %v3888_v58, %v8844_v11 }
 0x33b   : > { %v3951_v49 = vadd.f32 %v3887_v61, %v8836_v1  ;;  %v3825_v53 = vmul.f32 %v3761_v3, %v8863_v10  ;;  %v2415_v12 = vmul.f32 %v2287_v13, %v1391_v27  ;;  %v8883_v14 = vadd.f32 %v8433_v30, %v8666_v48 }
 0x33c   : > { %v8885_v44 = vpop.eup %6178  ;;  %6186 = vtanh.f32 %v4014_v4  ;;  %3180 = vmatprep.mubr.bf16.mxu0 %v2484_v18  ;;  %v2419_v36 = vmul.f32 %v2291_v21, %v1395_v47  ;;  %v8889_v2 = vadd.f32 %v8443_v57, %v8685_v24  ;;  %v4016_v33 = vmul.f32 0.7978846, %v3952_v60 }
 0x33d   : > { %v4015_v15 = vmul.f32 0.7978846, %v3951_v49  ;;  %v8891_v28 = vpop.eup %6180  ;;  %v3889_v61 = vmul.f32 0.044715, %v3825_v53  ;;  %v3762_v27 = vmul.f32 %v8883_v14, %v8883_v14  ;;  %v8897_v30 = vadd.f32 %v8466_v26, %v8666_v48 }
 0x33e   : > { %v8899_v8 = vpop.eup %6182  ;;  %v2483_v18 = vpack.c.bf16 %v2419_v36, %v2415_v12  ;;  %v3763_v55 = vmul.f32 %v8889_v2, %v8889_v2  ;;  %v8905_v57 = vadd.f32 %v8472_v40, %v8685_v24  ;;  %v8907_v58 = vpop.f32.mrb[184].mxu1  ;;  %v3685_v40 = vmul.f32 0.5, %v8696_v54  ;;  %v9865_v54 = vld [vmem:[#allocation25_spill] sm:$0xff] }
 0x33f   : > { %6188 = vtanh.f32 %v4015_v15  ;;  %9861 = vst [vmem:[#allocation24_spill] sm:$0xff] %v8907_v58  ;;  %v3953_v3 = vadd.f32 %v3889_v61, %v8863_v10  ;;  %v3826_v47 = vmul.f32 %v3762_v27, %v8883_v14  ;;  %v3764_v26 = vmul.f32 %v8897_v30, %v8897_v30  ;;  %v8913_v13 = vpop.f32.mrb[185].mxu1 }
 0x340   : > { %6190 = vtanh.f32 %v4016_v33  ;;  %9862 = vst [vmem:[#allocation45_spill] sm:$0xff] %v8913_v13  ;;  %3181 = vmatmul.mubr.bf16.gmra.mrb[60].mxu0 %v2483_v18  ;;  %v3827_v4 = vmul.f32 %v3763_v55, %v8889_v2  ;;  %v3765_v49 = vmul.f32 %v8905_v57, %v8905_v57  ;;  %v3687_v21 = vmul.f32 0.5, %v8712_v39  ;;  %v8920_v60 = vpop.f32.mrb[186].mxu1 }
 0x341   : > { %9863 = vst [vmem:[#allocation46_spill] sm:$0xff] %v8920_v60  ;;  %v8922_v53 = vpop.eup %6184  ;;  %v4017_v12 = vmul.f32 0.7978846, %v3953_v3  ;;  %v3890_v15 = vmul.f32 0.044715, %v3826_v47  ;;  %v3828_v36 = vmul.f32 %v3764_v26, %v8897_v30  ;;  %v4133_v33 = vadd.f32 1.0, %v8806_v35 }
 0x342   : > { %v8926_v61 = vpop.f32.mrb[187].mxu1  ;;  %v3891_v27 = vmul.f32 0.044715, %v3827_v4  ;;  %v3829_v18 = vmul.f32 %v3765_v49, %v8905_v57  ;;  %v4135_v55 = vadd.f32 1.0, %v8826_v25  ;;  %v8932_v39 = vadd.f32 %v9865_v54, %v8666_v48  ;;  %v9866_v54 = vld [vmem:[#allocation26_spill] sm:$0xff] }
 0x343   : > { %9864 = vst [vmem:[#allocation47_spill] sm:$0xff] %v8926_v61  ;;  %6192 = vtanh.f32 %v4017_v12  ;;  %v3954_v60 = vadd.f32 %v3890_v15, %v8883_v14  ;;  %v3892_v3 = vmul.f32 0.044715, %v3828_v36  ;;  %v4197_v47 = vmul.f32 %v4133_v33, %v3685_v40 }
 0x344   : > { %v3955_v26 = vadd.f32 %v3891_v27, %v8889_v2  ;;  %v3893_v13 = vmul.f32 0.044715, %v3829_v18  ;;  %v4199_v35 = vmul.f32 %v4135_v55, %v3687_v21  ;;  %v3766_v4 = vmul.f32 %v8932_v39, %v8932_v39 }
 0x345   : > { %v4018_v61 = vmul.f32 0.7978846, %v3954_v60  ;;  %v3956_v49 = vadd.f32 %v3892_v3, %v8897_v30  ;;  %v4260_v25 = vpack.c.bf16 %v8839_v34, %v8802_v7  ;;  %v8943_v12 = vadd.f32 %v9866_v54, %v8685_v24  ;;  %v9868_v7 = vld [vmem:[#allocation27_spill] sm:$0xff] }
 0x346   : > { %v8945_v15 = vpop.eup %6186  ;;  %v4019_v40 = vmul.f32 0.7978846, %v3955_v26  ;;  %v3957_v36 = vadd.f32 %v3893_v13, %v8905_v57  ;;  %v4261_v33 = vpack.c.bf16 %v4199_v35, %v4197_v47  ;;  %v3830_v21 = vmul.f32 %v3766_v4, %v8932_v39  ;;  %v8949_v27 = vpop.f32.mrb[188].mxu1  ;;  %v9870_v26 = vld [vmem:[#allocation28_spill] sm:$0xff] }
 0x347   : > { %9867 = vst [vmem:[#allocation25_spill] sm:$0xff] %v8949_v27  ;;  %6194 = vtanh.f32 %v4018_v61  ;;  %v4020_v60 = vmul.f32 0.7978846, %v3956_v49  ;;  %v3767_v18 = vmul.f32 %v8943_v12, %v8943_v12  ;;  %v8955_v34 = vadd.f32 %v9868_v7, %v8666_v48  ;;  %v8957_v55 = vpop.f32.mrb[189].mxu1 }
 0x348   : > { %9869 = vst [vmem:[#allocation26_spill] sm:$0xff] %v8957_v55  ;;  %6196 = vtanh.f32 %v4019_v40  ;;  %v4021_v13 = vmul.f32 0.7978846, %v3957_v36  ;;  %4484 = vmatprep.mubr.bf16.mxu0 %v4261_v33  ;;  %v3894_v47 = vmul.f32 0.044715, %v3830_v21  ;;  %v8963_v35 = vadd.f32 %v9870_v26, %v8685_v24  ;;  %v8965_v61 = vpop.f32.mrb[190].mxu1 }
 0x349   : > { %v8959_v3 = vpop.eup %6188  ;;  %9871 = vst [vmem:[#allocation27_spill] sm:$0xff] %v8965_v61  ;;  %6198 = vtanh.f32 %v4020_v60  ;;  %4485 = vmatmul.mubr.bf16.vlgmr.msra.gmra.mrb[0].mxu0 %v4260_v25  ;;  %v3831_v49 = vmul.f32 %v3767_v18, %v8943_v12  ;;  %v3768_v54 = vmul.f32 %v8955_v34, %v8955_v34  ;;  %v3689_v40 = vmul.f32 0.5, %v8746_v43  ;;  %v8973_v36 = vpop.f32.mrb[191].mxu1 }
 0x34a   : > { %v8967_v4 = vpop.eup %6190  ;;  %9872 = vst [vmem:[#allocation28_spill] sm:$0xff] %v8973_v36  ;;  %6200 = vtanh.f32 %v4021_v13  ;;  %v3958_v33 = vadd.f32 %v3894_v47, %v8932_v39  ;;  %v3769_v21 = vmul.f32 %v8963_v35, %v8963_v35  ;;  %v3691_v7 = vmul.f32 0.5, %v8767_v38  ;;  %v9873_v36 = vld [vmem:[#allocation29_spill] sm:$0xff] }
 0x34b   : > { %v3895_v26 = vmul.f32 0.044715, %v3831_v49  ;;  %v3832_v25 = vmul.f32 %v3768_v54, %v8955_v34  ;;  %v4137_v60 = vadd.f32 1.0, %v8858_v0  ;;  %v4139_v18 = vadd.f32 1.0, %v8891_v28 }
 0x34c   : > { %v4022_v61 = vmul.f32 0.7978846, %v3958_v33  ;;  %v3833_v43 = vmul.f32 %v3769_v21, %v8963_v35  ;;  %v8985_v13 = vadd.f32 %v9873_v36, %v8666_v48  ;;  %v3688_v47 = vmul.f32 0.5, %v8716_v45 }
 0x34d   : > { %v8988_v55 = vpop.eup %6192  ;;  %v3959_v38 = vadd.f32 %v3895_v26, %v8943_v12  ;;  %v3896_v49 = vmul.f32 0.044715, %v3832_v25  ;;  %v4201_v27 = vmul.f32 %v4137_v60, %v3689_v40  ;;  %v4203_v54 = vmul.f32 %v4139_v18, %v3691_v7 }
 0x34e   : > { %6202 = vtanh.f32 %v4022_v61  ;;  %v3897_v0 = vmul.f32 0.044715, %v3833_v43  ;;  %v3770_v28 = vmul.f32 %v8985_v13, %v8985_v13  ;;  %v3690_v33 = vmul.f32 0.5, %v8763_v41  ;;  %v9874_v61 = vld [vmem:[#allocation30_spill] sm:$0xff] }
 0x34f   : > { %v4023_v21 = vmul.f32 0.7978846, %v3959_v38  ;;  %v3960_v36 = vadd.f32 %v3896_v49, %v8955_v34  ;;  %v4263_v58 = vpack.c.bf16 %v4203_v54, %v4201_v27  ;;  %v4136_v45 = vadd.f32 1.0, %v8830_v32 }
 0x350   : > { %v3961_v17 = vadd.f32 %v3897_v0, %v8963_v35  ;;  %v3834_v26 = vmul.f32 %v3770_v28, %v8985_v13  ;;  %v4138_v40 = vadd.f32 1.0, %v8885_v44  ;;  %v9001_v7 = vadd.f32 %v9874_v61, %v8685_v24 }
 0x351   : > { %v9003_v25 = vpop.eup %6194  ;;  %6204 = vtanh.f32 %v4023_v21  ;;  %v4024_v41 = vmul.f32 0.7978846, %v3960_v36  ;;  %4494 = vmatprep.mubr.bf16.mxu0 %v4263_v58  ;;  %v4200_v60 = vmul.f32 %v4136_v45, %v3688_v47  ;;  %v9007_v27 = vadd.f32 %v8557_v63, %v8666_v48 }
 0x352   : > { %v9009_v32 = vpop.eup %6196  ;;  %v4025_v18 = vmul.f32 0.7978846, %v3961_v17  ;;  %v3898_v43 = vmul.f32 0.044715, %v3834_v26  ;;  %v4202_v38 = vmul.f32 %v4138_v40, %v3690_v33  ;;  %v3771_v44 = vmul.f32 %v9001_v7, %v9001_v7  ;;  %v9875_v40 = vld [vmem:[#allocation31_spill] sm:$0xff] }
 0x353   : > { %v9013_v49 = vpop.eup %6198  ;;  %6206 = vtanh.f32 %v4024_v41  ;;  %v3772_v54 = vmul.f32 %v9007_v27, %v9007_v27  ;;  %v9019_v58 = vadd.f32 %v8565_v23, %v8685_v24  ;;  %v3693_v63 = vmul.f32 0.5, %v8799_v5 }
 0x354   : > { %v9022_v47 = vpop.eup %6200  ;;  %6208 = vtanh.f32 %v4025_v18  ;;  %v3962_v17 = vadd.f32 %v3898_v43, %v8985_v13  ;;  %v4262_v0 = vpack.c.bf16 %v4202_v38, %v4200_v60  ;;  %v3835_v28 = vmul.f32 %v3771_v44, %v9001_v7 }
 0x355   : > { %v3836_v33 = vmul.f32 %v3772_v54, %v9007_v27  ;;  %v3773_v21 = vmul.f32 %v9019_v58, %v9019_v58  ;;  %v3695_v36 = vmul.f32 0.5, %v8836_v1  ;;  %v4141_v23 = vadd.f32 1.0, %v8922_v53 }
 0x356   : > { %v4026_v45 = vmul.f32 0.7978846, %v3962_v17  ;;  %4495 = vmatmul.mubr.bf16.gmra.mrb[4].mxu0 %v4262_v0  ;;  %v3899_v5 = vmul.f32 0.044715, %v3835_v28  ;;  %v4143_v26 = vadd.f32 1.0, %v8959_v3  ;;  %v9034_v61 = vadd.f32 %v9875_v40, %v8666_v48 }
 0x357   : > { %v3900_v41 = vmul.f32 0.044715, %v3836_v33  ;;  %v3837_v60 = vmul.f32 %v3773_v21, %v9019_v58  ;;  %v4205_v18 = vmul.f32 %v4141_v23, %v3693_v63  ;;  %v3692_v43 = vmul.f32 0.5, %v8775_v52 }
 0x358   : > { %v9038_v38 = vpop.eup %6202  ;;  %6210 = vtanh.f32 %v4026_v45  ;;  %v3963_v1 = vadd.f32 %v3899_v5, %v9001_v7  ;;  %v4207_v53 = vmul.f32 %v4143_v26, %v3695_v36  ;;  %v3774_v44 = vmul.f32 %v9034_v61, %v9034_v61  ;;  %v9876_v5 = vld [vmem:[#allocation39_spill] sm:$0xff] }
 0x359   : > { %v3964_v3 = vadd.f32 %v3900_v41, %v9007_v27  ;;  %v3901_v54 = vmul.f32 0.044715, %v3837_v60  ;;  %v3694_v17 = vmul.f32 0.5, %v8822_v16  ;;  %v4140_v0 = vadd.f32 1.0, %v8899_v8 }
 0x35a   : > { %v4027_v28 = vmul.f32 0.7978846, %v3963_v1  ;;  %v4265_v63 = vpack.c.bf16 %v4207_v53, %v4205_v18  ;;  %v3838_v52 = vmul.f32 %v3774_v44, %v9034_v61  ;;  %v4142_v33 = vadd.f32 1.0, %v8945_v15 }
 0x35b   : > { %v9048_v21 = vpop.eup %6204  ;;  %v4028_v23 = vmul.f32 0.7978846, %v3964_v3  ;;  %v3965_v36 = vadd.f32 %v3901_v54, %v9019_v58  ;;  %v4204_v45 = vmul.f32 %v4140_v0, %v3692_v43  ;;  %v9053_v26 = vadd.f32 %v9876_v5, %v8685_v24 }
 0x35c   : > { %6212 = vtanh.f32 %v4027_v28  ;;  %4504 = vmatprep.mubr.bf16.mxu0 %v4265_v63  ;;  %v3902_v16 = vmul.f32 0.044715, %v3838_v52  ;;  %v4206_v8 = vmul.f32 %v4142_v33, %v3694_v17  ;;  %v9057_v40 = vadd.f32 %v8599_v29, %v8666_v48 }
 0x35d   : > { %v9059_v41 = vpop.eup %6206  ;;  %6214 = vtanh.f32 %v4028_v23  ;;  %v4029_v15 = vmul.f32 0.7978846, %v3965_v36  ;;  %v3775_v60 = vmul.f32 %v9053_v26, %v9053_v26  ;;  %v9065_v18 = vadd.f32 %v8607_v56, %v8685_v24 }
 0x35e   : > { %v9067_v43 = vpop.eup %6208  ;;  %v3966_v1 = vadd.f32 %v3902_v16, %v9034_v61  ;;  %v4264_v53 = vpack.c.bf16 %v4206_v8, %v4204_v45  ;;  %v3776_v29 = vmul.f32 %v9057_v40, %v9057_v40  ;;  %v3697_v44 = vmul.f32 0.5, %v8863_v10 }
 0x35f   : > { %6216 = vtanh.f32 %v4029_v15  ;;  %v3839_v3 = vmul.f32 %v3775_v60, %v9053_v26  ;;  %v3777_v54 = vmul.f32 %v9065_v18, %v9065_v18  ;;  %v3699_v17 = vmul.f32 0.5, %v8889_v2 }
 0x360   : > { %v4030_v56 = vmul.f32 0.7978846, %v3966_v1  ;;  %4505 = vmatmul.mubr.bf16.gmra.mrb[8].mxu0 %v4264_v53  ;;  %v3840_v0 = vmul.f32 %v3776_v29, %v9057_v40  ;;  %v4145_v28 = vadd.f32 1.0, %v8988_v55  ;;  %v4147_v63 = vadd.f32 1.0, %v9009_v32 }
 0x361   : > { %v3903_v52 = vmul.f32 0.044715, %v3839_v3  ;;  %v3841_v33 = vmul.f32 %v3777_v54, %v9065_v18  ;;  %v9083_v10 = vadd.f32 %v8613_v46, %v8666_v48  ;;  %v3696_v23 = vmul.f32 0.5, %v8844_v11 }
 0x362   : > { %v9086_v36 = vpop.eup %6210  ;;  %6218 = vtanh.f32 %v4030_v56  ;;  %v3904_v2 = vmul.f32 0.044715, %v3840_v0  ;;  %v4209_v45 = vmul.f32 %v4145_v28, %v3697_v44  ;;  %v4211_v5 = vmul.f32 %v4147_v63, %v3699_v17  ;;  %v9877_v56 = vld [vmem:[#allocation40_spill] sm:$0xff] }
 0x363   : > { %v3967_v16 = vadd.f32 %v3903_v52, %v9053_v26  ;;  %v3905_v55 = vmul.f32 0.044715, %v3841_v33  ;;  %v3778_v32 = vmul.f32 %v9083_v10, %v9083_v10  ;;  %v3698_v8 = vmul.f32 0.5, %v8883_v14  ;;  %v9878_v33 = vld [vmem:[#allocation41_spill] sm:$0xff] }
 0x364   : > { %v3968_v15 = vadd.f32 %v3904_v2, %v9057_v40  ;;  %v4267_v46 = vpack.c.bf16 %v4211_v5, %v4209_v45  ;;  %v4144_v60 = vadd.f32 1.0, %v8967_v4  ;;  %v4146_v11 = vadd.f32 1.0, %v9003_v25 }
 0x365   : > { %v4031_v1 = vmul.f32 0.7978846, %v3967_v16  ;;  %v3969_v53 = vadd.f32 %v3905_v55, %v9065_v18  ;;  %v3842_v29 = vmul.f32 %v3778_v32, %v9083_v10  ;;  %v9099_v44 = vadd.f32 %v8621_v51, %v8685_v24 }
 0x366   : > { %v9101_v3 = vpop.eup %6212  ;;  %v4032_v54 = vmul.f32 0.7978846, %v3968_v15  ;;  %4514 = vmatprep.mubr.bf16.mxu0 %v4267_v46  ;;  %v4208_v14 = vmul.f32 %v4144_v60, %v3696_v23  ;;  %v4210_v17 = vmul.f32 %v4146_v11, %v3698_v8  ;;  %v9105_v4 = vadd.f32 %v9877_v56, %v8666_v48 }
 0x367   : > { %v9107_v25 = vpop.eup %6214  ;;  %6220 = vtanh.f32 %v4031_v1  ;;  %v4033_v0 = vmul.f32 0.7978846, %v3969_v53  ;;  %v3906_v28 = vmul.f32 0.044715, %v3842_v29  ;;  %v3779_v63 = vmul.f32 %v9099_v44, %v9099_v44  ;;  %v9879_v1 = vld [vmem:[#allocation42_spill] sm:$0xff] }
 0x368   : > { %6222 = vtanh.f32 %v4032_v54  ;;  %v4266_v51 = vpack.c.bf16 %v4210_v17, %v4208_v14  ;;  %v3780_v52 = vmul.f32 %v9105_v4, %v9105_v4  ;;  %v9115_v23 = vadd.f32 %v9878_v33, %v8685_v24 }
 0x369   : > { %v9117_v2 = vpop.eup %6216  ;;  %6224 = vtanh.f32 %v4033_v0  ;;  %v3970_v45 = vadd.f32 %v3906_v28, %v9083_v10  ;;  %v3843_v5 = vmul.f32 %v3779_v63, %v9099_v44  ;;  %v3701_v16 = vmul.f32 0.5, %v8905_v57 }
 0x36a   : > { %4515 = vmatmul.mubr.bf16.gmra.mrb[12].mxu0 %v4266_v51  ;;  %v3844_v55 = vmul.f32 %v3780_v52, %v9105_v4  ;;  %v3781_v32 = vmul.f32 %v9115_v23, %v9115_v23  ;;  %v3703_v8 = vmul.f32 0.5, %v8943_v12  ;;  %v4149_v15 = vadd.f32 1.0, %v9022_v47 }
 0x36b   : > { %v4034_v46 = vmul.f32 0.7978846, %v3970_v45  ;;  %v3907_v60 = vmul.f32 0.044715, %v3843_v5  ;;  %v4151_v11 = vadd.f32 1.0, %v9048_v21  ;;  %v9130_v53 = vadd.f32 %v9879_v1, %v8666_v48  ;;  %v9882_v1 = vld [vmem:[#allocation43_spill] sm:$0xff] }
 0x36c   : > { %v9132_v29 = vpop.eup %6218  ;;  %v3908_v57 = vmul.f32 0.044715, %v3844_v55  ;;  %v3845_v54 = vmul.f32 %v3781_v32, %v9115_v23  ;;  %v4213_v14 = vmul.f32 %v4149_v15, %v3701_v16  ;;  %v3700_v17 = vmul.f32 0.5, %v8897_v30  ;;  %v9880_v55 = vld [vmem:[#allocation32_spill] sm:$0xff] }
 0x36d   : > { %6226 = vtanh.f32 %v4034_v46  ;;  %v3971_v12 = vadd.f32 %v3907_v60, %v9099_v44  ;;  %v4215_v47 = vmul.f32 %v4151_v11, %v3703_v8  ;;  %v3782_v56 = vmul.f32 %v9130_v53, %v9130_v53  ;;  %v9881_v15 = vld [vmem:[#allocation36_spill] sm:$0xff] }
 0x36e   : > { %v3972_v21 = vadd.f32 %v3908_v57, %v9105_v4  ;;  %v3909_v0 = vmul.f32 0.044715, %v3845_v54  ;;  %v3702_v28 = vmul.f32 0.5, %v8932_v39  ;;  %v4148_v63 = vadd.f32 1.0, %v9013_v49 }
 0x36f   : > { %v4035_v51 = vmul.f32 0.7978846, %v3971_v12  ;;  %v4269_v52 = vpack.c.bf16 %v4215_v47, %v4213_v14  ;;  %v3846_v33 = vmul.f32 %v3782_v56, %v9130_v53  ;;  %v4150_v30 = vadd.f32 1.0, %v9038_v38 }
 0x370   : > { %v4036_v45 = vmul.f32 0.7978846, %v3972_v21  ;;  %v3973_v5 = vadd.f32 %v3909_v0, %v9115_v23  ;;  %v4212_v16 = vmul.f32 %v4148_v63, %v3700_v17  ;;  %v9147_v32 = vadd.f32 %v9880_v55, %v8685_v24 }
 0x371   : > { %v9149_v8 = vpop.eup %6220  ;;  %6228 = vtanh.f32 %v4035_v51  ;;  %4524 = vmatprep.mubr.bf16.mxu0 %v4269_v52  ;;  %v3910_v39 = vmul.f32 0.044715, %v3846_v33  ;;  %v4214_v49 = vmul.f32 %v4150_v30, %v3702_v28  ;;  %v9153_v46 = vadd.f32 %v9881_v15, %v8666_v48 }
 0x372   : > { %v9155_v60 = vpop.eup %6222  ;;  %6230 = vtanh.f32 %v4036_v45  ;;  %v4037_v38 = vmul.f32 0.7978846, %v3973_v5  ;;  %v3783_v11 = vmul.f32 %v9147_v32, %v9147_v32  ;;  %v9161_v57 = vadd.f32 %v9882_v1, %v8685_v24 }
 0x373   : > { %v9163_v54 = vpop.eup %6224  ;;  %v3974_v14 = vadd.f32 %v3910_v39, %v9130_v53  ;;  %v4268_v17 = vpack.c.bf16 %v4214_v49, %v4212_v16  ;;  %v3784_v12 = vmul.f32 %v9153_v46, %v9153_v46  ;;  %v3705_v47 = vmul.f32 0.5, %v8963_v35  ;;  %v9883_v35 = vld [vmem:[#allocation33_spill] sm:$0xff] }
 0x374   : > { %6232 = vtanh.f32 %v4037_v38  ;;  %v3847_v56 = vmul.f32 %v3783_v11, %v9147_v32  ;;  %v3785_v21 = vmul.f32 %v9161_v57, %v9161_v57  ;;  %v3707_v0 = vmul.f32 0.5, %v9001_v7 }
 0x375   : > { %v4038_v28 = vmul.f32 0.7978846, %v3974_v14  ;;  %4525 = vmatmul.mubr.bf16.gmra.mrb[16].mxu0 %v4268_v17  ;;  %v3848_v63 = vmul.f32 %v3784_v12, %v9153_v46  ;;  %v4153_v51 = vadd.f32 1.0, %v9067_v43  ;;  %v4155_v52 = vadd.f32 1.0, %v9101_v3 }
 0x376   : > { %v3911_v33 = vmul.f32 0.044715, %v3847_v56  ;;  %v3849_v30 = vmul.f32 %v3785_v21, %v9161_v57  ;;  %v9179_v45 = vadd.f32 %v9883_v35, %v8666_v48  ;;  %v3704_v5 = vmul.f32 0.5, %v8955_v34 }
 0x377   : > { %v9182_v16 = vpop.eup %6226  ;;  %6234 = vtanh.f32 %v4038_v28  ;;  %v3912_v7 = vmul.f32 0.044715, %v3848_v63  ;;  %v4217_v55 = vmul.f32 %v4153_v51, %v3705_v47  ;;  %v4219_v39 = vmul.f32 %v4155_v52, %v3707_v0  ;;  %v9884_v47 = vld [vmem:[#allocation44_spill] sm:$0xff]  ;;  %v9885_v63 = vld [vmem:[#allocation34_spill] sm:$0xff] }
 0x378   : > { %v3975_v49 = vadd.f32 %v3911_v33, %v9147_v32  ;;  %v3913_v43 = vmul.f32 0.044715, %v3849_v30  ;;  %v3786_v3 = vmul.f32 %v9179_v45, %v9179_v45  ;;  %v3706_v15 = vmul.f32 0.5, %v8985_v13 }
 0x379   : > { %v3976_v38 = vadd.f32 %v3912_v7, %v9153_v46  ;;  %v4271_v11 = vpack.c.bf16 %v4219_v39, %v4217_v55  ;;  %v4152_v1 = vadd.f32 1.0, %v9059_v41  ;;  %v4154_v34 = vadd.f32 1.0, %v9086_v36 }
 0x37a   : > { %v4039_v14 = vmul.f32 0.7978846, %v3975_v49  ;;  %v3977_v17 = vadd.f32 %v3913_v43, %v9161_v57  ;;  %v3850_v12 = vmul.f32 %v3786_v3, %v9179_v45  ;;  %v9195_v56 = vadd.f32 %v9884_v47, %v8685_v24 }
 0x37b   : > { %v9197_v21 = vpop.eup %6228  ;;  %v4040_v0 = vmul.f32 0.7978846, %v3976_v38  ;;  %4534 = vmatprep.mubr.bf16.mxu0 %v4271_v11  ;;  %v4216_v13 = vmul.f32 %v4152_v1, %v3704_v5  ;;  %v4218_v28 = vmul.f32 %v4154_v34, %v3706_v15  ;;  %v9201_v41 = vadd.f32 %v9885_v63, %v8666_v48  ;;  %v9886_v5 = vld [vmem:[#allocation35_spill] sm:$0xff] }
 0x37c   : > { %v9203_v36 = vpop.eup %6230  ;;  %6236 = vtanh.f32 %v4039_v14  ;;  %v4041_v51 = vmul.f32 0.7978846, %v3977_v17  ;;  %v3914_v52 = vmul.f32 0.044715, %v3850_v12  ;;  %v3787_v33 = vmul.f32 %v9195_v56, %v9195_v56 }
 0x37d   : > { %6238 = vtanh.f32 %v4040_v0  ;;  %v4270_v30 = vpack.c.bf16 %v4218_v28, %v4216_v13  ;;  %v3788_v35 = vmul.f32 %v9201_v41, %v9201_v41  ;;  %v9211_v7 = vadd.f32 %v9886_v5, %v8685_v24 }
 0x37e   : > { %v9213_v55 = vpop.eup %6232  ;;  %6240 = vtanh.f32 %v4041_v51  ;;  %v3978_v39 = vadd.f32 %v3914_v52, %v9179_v45  ;;  %v3851_v49 = vmul.f32 %v3787_v33, %v9195_v56  ;;  %v3709_v43 = vmul.f32 0.5, %v9019_v58 }
 0x37f   : > { %4535 = vmatmul.mubr.bf16.gmra.mrb[20].mxu0 %v4270_v30  ;;  %v3852_v3 = vmul.f32 %v3788_v35, %v9201_v41  ;;  %v3789_v15 = vmul.f32 %v9211_v7, %v9211_v7  ;;  %v3711_v38 = vmul.f32 0.5, %v9053_v26  ;;  %v4157_v11 = vadd.f32 1.0, %v9117_v2 }
 0x380   : > { %v4042_v1 = vmul.f32 0.7978846, %v3978_v39  ;;  %v3915_v34 = vmul.f32 0.044715, %v3851_v49  ;;  %v4159_v14 = vadd.f32 1.0, %v9149_v8  ;;  %v9226_v17 = vadd.f32 %v8742_v31, %v8666_v48  ;;  %v9887_v49 = vld [vmem:[#allocation21_spill] sm:$0xff] }
 0x381   : > { %v9228_v12 = vpop.eup %6234  ;;  %v3916_v58 = vmul.f32 0.044715, %v3852_v3  ;;  %v3853_v47 = vmul.f32 %v3789_v15, %v9211_v7  ;;  %v4221_v0 = vmul.f32 %v4157_v11, %v3709_v43  ;;  %v3708_v13 = vmul.f32 0.5, %v9007_v27 }
 0x382   : > { %6242 = vtanh.f32 %v4042_v1  ;;  %v3979_v26 = vadd.f32 %v3915_v34, %v9195_v56  ;;  %v4223_v2 = vmul.f32 %v4159_v14, %v3711_v38  ;;  %v3790_v28 = vmul.f32 %v9226_v17, %v9226_v17 }
 0x383   : > { %v3980_v8 = vadd.f32 %v3916_v58, %v9201_v41  ;;  %v3917_v63 = vmul.f32 0.044715, %v3853_v47  ;;  %v3710_v31 = vmul.f32 0.5, %v9034_v61  ;;  %v4156_v51 = vadd.f32 1.0, %v9107_v25 }
 0x384   : > { %v4043_v52 = vmul.f32 0.7978846, %v3979_v26  ;;  %v4273_v33 = vpack.c.bf16 %v4223_v2, %v4221_v0  ;;  %v3854_v30 = vmul.f32 %v3790_v28, %v9226_v17  ;;  %v4158_v27 = vadd.f32 1.0, %v9132_v29 }
 0x385   : > { %v4044_v35 = vmul.f32 0.7978846, %v3980_v8  ;;  %v3981_v5 = vadd.f32 %v3917_v63, %v9211_v7  ;;  %v4220_v39 = vmul.f32 %v4156_v51, %v3708_v13  ;;  %v9243_v43 = vadd.f32 %v9887_v49, %v8685_v24 }
 0x386   : > { %v9245_v3 = vpop.eup %6236  ;;  %6244 = vtanh.f32 %v4043_v52  ;;  %4544 = vmatprep.mubr.bf16.mxu0 %v4273_v33  ;;  %v3918_v61 = vmul.f32 0.044715, %v3854_v30  ;;  %v4222_v25 = vmul.f32 %v4158_v27, %v3710_v31  ;;  %v9249_v15 = vadd.f32 %v8769_v42, %v8666_v48 }
 0x387   : > { %v9251_v38 = vpop.eup %6238  ;;  %6246 = vtanh.f32 %v4044_v35  ;;  %v4045_v29 = vmul.f32 0.7978846, %v3981_v5  ;;  %v3791_v11 = vmul.f32 %v9243_v43, %v9243_v43  ;;  %v9257_v1 = vadd.f32 %v8777_v19, %v8685_v24 }
 0x388   : > { %v9259_v34 = vpop.eup %6240  ;;  %v3982_v14 = vadd.f32 %v3918_v61, %v9226_v17  ;;  %v4272_v58 = vpack.c.bf16 %v4222_v25, %v4220_v39  ;;  %v3792_v42 = vmul.f32 %v9249_v15, %v9249_v15  ;;  %v3713_v47 = vmul.f32 0.5, %v9065_v18 }
 0x389   : > { %6248 = vtanh.f32 %v4045_v29  ;;  %v3855_v0 = vmul.f32 %v3791_v11, %v9243_v43  ;;  %v3793_v13 = vmul.f32 %v9257_v1, %v9257_v1  ;;  %v3715_v26 = vmul.f32 0.5, %v9099_v44 }
 0x38a   : > { %v4046_v19 = vmul.f32 0.7978846, %v3982_v14  ;;  %4545 = vmatmul.mubr.bf16.gmra.mrb[24].mxu0 %v4272_v58  ;;  %v3856_v2 = vmul.f32 %v3792_v42, %v9249_v15  ;;  %v4161_v28 = vadd.f32 1.0, %v9163_v54  ;;  %v4163_v8 = vadd.f32 1.0, %v9197_v21 }
 0x38b   : > { %v3919_v63 = vmul.f32 0.044715, %v3855_v0  ;;  %v3857_v31 = vmul.f32 %v3793_v13, %v9257_v1  ;;  %v9275_v18 = vadd.f32 %v8784_v20, %v8666_v48  ;;  %v3712_v51 = vmul.f32 0.5, %v9057_v40 }
 0x38c   : > { %v9278_v52 = vpop.eup %6242  ;;  %6250 = vtanh.f32 %v4046_v19  ;;  %v3920_v44 = vmul.f32 0.044715, %v3856_v2  ;;  %v4225_v33 = vmul.f32 %v4161_v28, %v3713_v47  ;;  %v4227_v30 = vmul.f32 %v4163_v8, %v3715_v26 }
 0x38d   : > { %v3983_v27 = vadd.f32 %v3919_v63, %v9243_v43  ;;  %v3921_v54 = vmul.f32 0.044715, %v3857_v31  ;;  %v3794_v21 = vmul.f32 %v9275_v18, %v9275_v18  ;;  %v3714_v35 = vmul.f32 0.5, %v9083_v10 }
 0x38e   : > { %v3984_v5 = vadd.f32 %v3920_v44, %v9249_v15  ;;  %v4275_v20 = vpack.c.bf16 %v4227_v30, %v4225_v33  ;;  %v4160_v39 = vadd.f32 1.0, %v9155_v60  ;;  %v4162_v40 = vadd.f32 1.0, %v9182_v16 }
 0x38f   : > { %v4047_v49 = vmul.f32 0.7978846, %v3983_v27  ;;  %v3985_v61 = vadd.f32 %v3921_v54, %v9257_v1  ;;  %v3858_v25 = vmul.f32 %v3794_v21, %v9275_v18  ;;  %v9291_v29 = vadd.f32 %v8790_v37, %v8685_v24 }
 0x390   : > { %v9293_v11 = vpop.eup %6244  ;;  %v4048_v14 = vmul.f32 0.7978846, %v3984_v5  ;;  %4554 = vmatprep.mubr.bf16.mxu0 %v4275_v20  ;;  %v4224_v10 = vmul.f32 %v4160_v39, %v3712_v51  ;;  %v4226_v58 = vmul.f32 %v4162_v40, %v3714_v35  ;;  %v9297_v60 = vadd.f32 %v8811_v9, %v8666_v48 }
 0x391   : > { %v9299_v16 = vpop.eup %6246  ;;  %6252 = vtanh.f32 %v4047_v49  ;;  %v4049_v42 = vmul.f32 0.7978846, %v3985_v61  ;;  %v3922_v47 = vmul.f32 0.044715, %v3858_v25  ;;  %v3795_v0 = vmul.f32 %v9291_v29, %v9291_v29 }
 0x392   : > { %6254 = vtanh.f32 %v4048_v14  ;;  %v4274_v37 = vpack.c.bf16 %v4226_v58, %v4224_v10  ;;  %v3796_v13 = vmul.f32 %v9297_v60, %v9297_v60  ;;  %v9307_v26 = vadd.f32 %v8817_v59, %v8685_v24 }
 0x393   : > { %v9309_v19 = vpop.eup %6248  ;;  %6256 = vtanh.f32 %v4049_v42  ;;  %v3986_v9 = vadd.f32 %v3922_v47, %v9275_v18  ;;  %v3859_v2 = vmul.f32 %v3795_v0, %v9291_v29  ;;  %v3717_v28 = vmul.f32 0.5, %v9115_v23 }
 0x394   : > { %4555 = vmatmul.mubr.bf16.gmra.mrb[28].mxu0 %v4274_v37  ;;  %v3860_v8 = vmul.f32 %v3796_v13, %v9297_v60  ;;  %v3797_v63 = vmul.f32 %v9307_v26, %v9307_v26  ;;  %v3719_v31 = vmul.f32 0.5, %v9147_v32  ;;  %v4165_v59 = vadd.f32 1.0, %v9213_v55 }
 0x395   : > { %v4050_v51 = vmul.f32 0.7978846, %v3986_v9  ;;  %v3923_v44 = vmul.f32 0.044715, %v3859_v2  ;;  %v4167_v33 = vadd.f32 1.0, %v9245_v3  ;;  %v9322_v30 = vadd.f32 %v8824_v50, %v8666_v48 }
 0x396   : > { %v9324_v27 = vpop.eup %6250  ;;  %v3924_v23 = vmul.f32 0.044715, %v3860_v8  ;;  %v3861_v54 = vmul.f32 %v3797_v63, %v9307_v26  ;;  %v4229_v21 = vmul.f32 %v4165_v59, %v3717_v28  ;;  %v3716_v35 = vmul.f32 0.5, %v9105_v4 }
 0x397   : > { %6258 = vtanh.f32 %v4050_v51  ;;  %v3987_v32 = vadd.f32 %v3923_v44, %v9291_v29  ;;  %v4231_v55 = vmul.f32 %v4167_v33, %v3719_v31  ;;  %v3798_v5 = vmul.f32 %v9322_v30, %v9322_v30 }
 0x398   : > { %v3988_v3 = vadd.f32 %v3924_v23, %v9297_v60  ;;  %v3925_v20 = vmul.f32 0.044715, %v3861_v54  ;;  %v3718_v50 = vmul.f32 0.5, %v9130_v53  ;;  %v4164_v39 = vadd.f32 1.0, %v9203_v36 }
 0x399   : > { %v4051_v40 = vmul.f32 0.7978846, %v3987_v32  ;;  %v4277_v49 = vpack.c.bf16 %v4231_v55, %v4229_v21  ;;  %v3862_v61 = vmul.f32 %v3798_v5, %v9322_v30  ;;  %v4166_v4 = vadd.f32 1.0, %v9228_v12 }
 0x39a   : > { %v4052_v25 = vmul.f32 0.7978846, %v3988_v3  ;;  %v3989_v14 = vadd.f32 %v3925_v20, %v9307_v26  ;;  %v4228_v10 = vmul.f32 %v4164_v39, %v3716_v35  ;;  %v9339_v58 = vadd.f32 %v8828_v6, %v8685_v24  ;;  %v9888_v6 = vld [vmem:[#allocation22_spill] sm:$0xff] }
 0x39b   : > { %v9341_v42 = vpop.eup %6252  ;;  %6260 = vtanh.f32 %v4051_v40  ;;  %4564 = vmatprep.mubr.bf16.mxu0 %v4277_v49  ;;  %v3926_v53 = vmul.f32 0.044715, %v3862_v61  ;;  %v4230_v36 = vmul.f32 %v4166_v4, %v3718_v50  ;;  %v9345_v47 = vadd.f32 %v8856_v22, %v8666_v48  ;;  %v9889_v4 = vld [vmem:[#allocation23_spill] sm:$0xff] }
 0x39c   : > { %v9347_v0 = vpop.eup %6254  ;;  %6262 = vtanh.f32 %v4052_v25  ;;  %v4053_v12 = vmul.f32 0.7978846, %v3989_v14  ;;  %v3799_v37 = vmul.f32 %v9339_v58, %v9339_v58  ;;  %v9353_v13 = vadd.f32 %v9888_v6, %v8685_v24 }
 0x39d   : > { %v9355_v9 = vpop.eup %6256  ;;  %v3990_v2 = vadd.f32 %v3926_v53, %v9322_v30  ;;  %v4276_v28 = vpack.c.bf16 %v4230_v36, %v4228_v10  ;;  %v3800_v22 = vmul.f32 %v9345_v47, %v9345_v47  ;;  %v3721_v8 = vmul.f32 0.5, %v9161_v57  ;;  %v9890_v36 = vld [vmem:[#allocation24_spill] sm:$0xff] }
 0x39e   : > { %6264 = vtanh.f32 %v4053_v12  ;;  %v3863_v63 = vmul.f32 %v3799_v37, %v9339_v58  ;;  %v3801_v31 = vmul.f32 %v9353_v13, %v9353_v13  ;;  %v3723_v59 = vmul.f32 0.5, %v9195_v56 }
 0x39f   : > { %v4054_v51 = vmul.f32 0.7978846, %v3990_v2  ;;  %4565 = vmatmul.mubr.bf16.gmra.mrb[32].mxu0 %v4276_v28  ;;  %v3864_v44 = vmul.f32 %v3800_v22, %v9345_v47  ;;  %v4169_v33 = vadd.f32 1.0, %v9259_v34  ;;  %v4171_v23 = vadd.f32 1.0, %v9293_v11  ;;  %v9891_v22 = vld [vmem:[#allocation45_spill] sm:$0xff] }
 0x3a0   : > { %v3927_v54 = vmul.f32 0.044715, %v3863_v63  ;;  %v3865_v21 = vmul.f32 %v3801_v31, %v9353_v13  ;;  %v9371_v57 = vadd.f32 %v8869_v62, %v8666_v48  ;;  %v3720_v35 = vmul.f32 0.5, %v9153_v46 }
 0x3a1   : > { %v9374_v32 = vpop.eup %6258  ;;  %6266 = vtanh.f32 %v4054_v51  ;;  %v3928_v56 = vmul.f32 0.044715, %v3864_v44  ;;  %v4233_v55 = vmul.f32 %v4169_v33, %v3721_v8  ;;  %v4235_v5 = vmul.f32 %v4171_v23, %v3723_v59 }
 0x3a2   : > { %v3991_v3 = vadd.f32 %v3927_v54, %v9339_v58  ;;  %v3929_v34 = vmul.f32 0.044715, %v3865_v21  ;;  %v3802_v11 = vmul.f32 %v9371_v57, %v9371_v57  ;;  %v3722_v20 = vmul.f32 0.5, %v9179_v45 }
 0x3a3   : > { %v3992_v50 = vadd.f32 %v3928_v56, %v9345_v47  ;;  %v4279_v62 = vpack.c.bf16 %v4235_v5, %v4233_v55  ;;  %v4168_v39 = vadd.f32 1.0, %v9251_v38  ;;  %v4170_v46 = vadd.f32 1.0, %v9278_v52  ;;  %v9892_v56 = vld [vmem:[#allocation46_spill] sm:$0xff] }
 0x3a4   : > { %v4055_v40 = vmul.f32 0.7978846, %v3991_v3  ;;  %v3993_v49 = vadd.f32 %v3929_v34, %v9353_v13  ;;  %v3866_v61 = vmul.f32 %v3802_v11, %v9371_v57  ;;  %v9387_v25 = vadd.f32 %v9889_v4, %v8685_v24 }
 0x3a5   : > { %v9389_v14 = vpop.eup %6260  ;;  %v4056_v10 = vmul.f32 0.7978846, %v3992_v50  ;;  %4574 = vmatprep.mubr.bf16.mxu0 %v4279_v62  ;;  %v4232_v45 = vmul.f32 %v4168_v39, %v3720_v35  ;;  %v4234_v53 = vmul.f32 %v4170_v46, %v3722_v20  ;;  %v9393_v38 = vadd.f32 %v9890_v36, %v8666_v48 }
 0x3a6   : > { %v9395_v52 = vpop.eup %6262  ;;  %6268 = vtanh.f32 %v4055_v40  ;;  %v4057_v12 = vmul.f32 0.7978846, %v3993_v49  ;;  %v3930_v37 = vmul.f32 0.044715, %v3866_v61  ;;  %v3803_v6 = vmul.f32 %v9387_v25, %v9387_v25 }
 0x3a7   : > { %6270 = vtanh.f32 %v4056_v10  ;;  %v4278_v2 = vpack.c.bf16 %v4234_v53, %v4232_v45  ;;  %v3804_v28 = vmul.f32 %v9393_v38, %v9393_v38  ;;  %v9403_v8 = vadd.f32 %v9891_v22, %v8685_v24  ;;  %v9893_v53 = vld [vmem:[#allocation47_spill] sm:$0xff]  ;;  %v9895_v22 = vld [vmem:[#allocation26_spill] sm:$0xff] }
 0x3a8   : > { %v9405_v63 = vpop.eup %6264  ;;  %6272 = vtanh.f32 %v4057_v12  ;;  %v3994_v31 = vadd.f32 %v3930_v37, %v9371_v57  ;;  %v3867_v59 = vmul.f32 %v3803_v6, %v9387_v25  ;;  %v3725_v33 = vmul.f32 0.5, %v9211_v7  ;;  %v9894_v37 = vld [vmem:[#allocation25_spill] sm:$0xff] }
 0x3a9   : > { %4575 = vmatmul.mubr.bf16.gmra.mrb[36].mxu0 %v4278_v2  ;;  %v3868_v51 = vmul.f32 %v3804_v28, %v9393_v38  ;;  %v3805_v44 = vmul.f32 %v9403_v8, %v9403_v8  ;;  %v4173_v23 = vadd.f32 1.0, %v9309_v19  ;;  %v3727_v21 = vmul.f32 0.5, %v9243_v43 }
 0x3aa   : > { %v3931_v54 = vmul.f32 0.044715, %v3867_v59  ;;  %v4175_v35 = vadd.f32 1.0, %v9341_v42  ;;  %v9418_v55 = vadd.f32 %v9892_v56, %v8666_v48  ;;  %v4058_v3 = vmul.f32 0.7978846, %v3994_v31 }
 0x3ab   : > { %v9420_v5 = vpop.eup %6266  ;;  %v3932_v34 = vmul.f32 0.044715, %v3868_v51  ;;  %v3869_v11 = vmul.f32 %v3805_v44, %v9403_v8  ;;  %v4237_v20 = vmul.f32 %v4173_v23, %v3725_v33  ;;  %v3724_v43 = vmul.f32 0.5, %v9201_v41 }
 0x3ac   : > { %v3995_v7 = vadd.f32 %v3931_v54, %v9387_v25  ;;  %v4239_v50 = vmul.f32 %v4175_v35, %v3727_v21  ;;  %v3806_v19 = vmul.f32 %v9418_v55, %v9418_v55  ;;  %v3726_v39 = vmul.f32 0.5, %v9226_v17 }
 0x3ad   : > { %v3996_v42 = vadd.f32 %v3932_v34, %v9393_v38  ;;  %v3933_v62 = vmul.f32 0.044715, %v3869_v11  ;;  %v4172_v46 = vadd.f32 1.0, %v9299_v16  ;;  %v4174_v4 = vadd.f32 1.0, %v9324_v27 }
 0x3ae   : > { %v4059_v40 = vmul.f32 0.7978846, %v3995_v7  ;;  %v4281_v49 = vpack.c.bf16 %v4239_v50, %v4237_v20  ;;  %v3870_v61 = vmul.f32 %v3806_v19, %v9418_v55  ;;  %6274 = vtanh.f32 %v4058_v3  ;;  %v9896_v50 = vld [vmem:[#allocation27_spill] sm:$0xff] }
 0x3af   : > { %v4060_v10 = vmul.f32 0.7978846, %v3996_v42  ;;  %v3997_v45 = vadd.f32 %v3933_v62, %v9403_v8  ;;  %v9435_v41 = vadd.f32 %v9893_v53, %v8685_v24  ;;  %v4236_v12 = vmul.f32 %v4172_v46, %v3724_v43 }
 0x3b0   : > { %v9437_v36 = vpop.eup %6268  ;;  %4584 = vmatprep.mubr.bf16.mxu0 %v4281_v49  ;;  %v3934_v17 = vmul.f32 0.044715, %v3870_v61  ;;  %v4238_v16 = vmul.f32 %v4174_v4, %v3726_v39  ;;  %v9441_v6 = vadd.f32 %v9894_v37, %v8666_v48  ;;  %6276 = vtanh.f32 %v4059_v40 }
 0x3b1   : > { %v9443_v2 = vpop.eup %6270  ;;  %v4061_v27 = vmul.f32 0.7978846, %v3997_v45  ;;  %v3807_v28 = vmul.f32 %v9435_v41, %v9435_v41  ;;  %v9449_v31 = vadd.f32 %v9895_v22, %v8685_v24  ;;  %6278 = vtanh.f32 %v4060_v10  ;;  %v9897_v45 = vld [vmem:[#allocation28_spill] sm:$0xff] }
 0x3b2   : > { %v9451_v59 = vpop.eup %6272  ;;  %v3998_v51 = vadd.f32 %v3934_v17, %v9418_v55  ;;  %v4280_v44 = vpack.c.bf16 %v4238_v16, %v4236_v12  ;;  %v3808_v33 = vmul.f32 %v9441_v6, %v9441_v6  ;;  %v3729_v21 = vmul.f32 0.5, %v9257_v1 }
 0x3b3   : > { %6280 = vtanh.f32 %v4061_v27  ;;  %v3871_v23 = vmul.f32 %v3807_v28, %v9435_v41  ;;  %v3809_v54 = vmul.f32 %v9449_v31, %v9449_v31  ;;  %v3731_v56 = vmul.f32 0.5, %v9291_v29 }
 0x3b4   : > { %4585 = vmatmul.mubr.bf16.gmra.mrb[40].mxu0 %v4280_v44  ;;  %v3872_v35 = vmul.f32 %v3808_v33, %v9441_v6  ;;  %v4177_v3 = vadd.f32 1.0, %v9355_v9  ;;  %v4179_v34 = vadd.f32 1.0, %v9389_v14  ;;  %v4062_v11 = vmul.f32 0.7978846, %v3998_v51 }
 0x3b5   : > { %v3935_v20 = vmul.f32 0.044715, %v3871_v23  ;;  %v3873_v7 = vmul.f32 %v3809_v54, %v9449_v31  ;;  %v9467_v19 = vadd.f32 %v9896_v50, %v8666_v48  ;;  %v3728_v62 = vmul.f32 0.5, %v9249_v15 }
 0x3b6   : > { %v3936_v43 = vmul.f32 0.044715, %v3872_v35  ;;  %v4241_v42 = vmul.f32 %v4177_v3, %v3729_v21  ;;  %v4243_v1 = vmul.f32 %v4179_v34, %v3731_v56  ;;  %v3730_v14 = vmul.f32 0.5, %v9275_v18 }
 0x3b7   : > { %v3999_v39 = vadd.f32 %v3935_v20, %v9435_v41  ;;  %v3937_v29 = vmul.f32 0.044715, %v3873_v7  ;;  %v3810_v9 = vmul.f32 %v9467_v19, %v9467_v19  ;;  %v4176_v49 = vadd.f32 1.0, %v9347_v0 }
 0x3b8   : > { %v4000_v46 = vadd.f32 %v3936_v43, %v9441_v6  ;;  %v4283_v40 = vpack.c.bf16 %v4243_v1, %v4241_v42  ;;  %v4178_v48 = vadd.f32 1.0, %v9374_v32  ;;  %v6275_v61 = vpop.eup %6274  ;;  %v9481_v53 = vadd.f32 %v9897_v45, %v8685_v24 }
 0x3b9   : > { %v4063_v4 = vmul.f32 0.7978846, %v3999_v39  ;;  %v4001_v10 = vadd.f32 %v3937_v29, %v9449_v31  ;;  %v3874_v15 = vmul.f32 %v3810_v9, %v9467_v19  ;;  %6282 = vtanh.f32 %v4062_v11 }
 0x3ba   : > { %v4064_v17 = vmul.f32 0.7978846, %v4000_v46  ;;  %4594 = vmatprep.mubr.bf16.mxu0 %v4283_v40  ;;  %v4240_v18 = vmul.f32 %v4176_v49, %v3728_v62  ;;  %v4242_v12 = vmul.f32 %v4178_v48, %v3730_v14  ;;  %v6277_v16 = vpop.eup %6276  ;;  %v3811_v32 = vmul.f32 %v9481_v53, %v9481_v53 }
 0x3bb   : > { %6284 = vtanh.f32 %v4063_v4  ;;  %v3938_v0 = vmul.f32 0.044715, %v3874_v15  ;;  %v3733_v37 = vmul.f32 0.5, %v9307_v26  ;;  %v6279_v27 = vpop.eup %6278  ;;  %v4065_v28 = vmul.f32 0.7978846, %v4001_v10 }
 0x3bc   : > { %6286 = vtanh.f32 %v4064_v17  ;;  %v4282_v22 = vpack.c.bf16 %v4242_v12, %v4240_v18  ;;  %v4181_v24 = vadd.f32 1.0, %v9405_v63  ;;  %v3875_v33 = vmul.f32 %v3811_v32, %v9481_v53 }
 0x3bd   : > { %v6281_v51 = vpop.eup %6280  ;;  %v4002_v44 = vadd.f32 %v3938_v0, %v9467_v19  ;;  %v3735_v23 = vmul.f32 0.5, %v9339_v58  ;;  %v4183_v54 = vadd.f32 1.0, %v9437_v36  ;;  %v3732_v35 = vmul.f32 0.5, %v9297_v60 }
 0x3be   : > { %4595 = vmatmul.mubr.bf16.gmra.mrb[44].mxu0 %v4282_v22  ;;  %v4245_v21 = vmul.f32 %v4181_v24, %v3733_v37  ;;  %v3734_v26 = vmul.f32 0.5, %v9322_v30  ;;  %v4180_v56 = vadd.f32 1.0, %v9395_v52  ;;  %v3939_v34 = vmul.f32 0.044715, %v3875_v33 }
 0x3bf   : > { %v4066_v3 = vmul.f32 0.7978846, %v4002_v44  ;;  %v4247_v63 = vmul.f32 %v4183_v54, %v3735_v23  ;;  %v4182_v11 = vadd.f32 1.0, %v9420_v5  ;;  %6288 = vtanh.f32 %v4065_v28 }
 0x3c0   : > { %v4244_v20 = vmul.f32 %v4180_v56, %v3732_v35  ;;  %v3737_v7 = vmul.f32 0.5, %v9353_v13  ;;  %v4185_v58 = vadd.f32 1.0, %v9451_v59  ;;  %v4003_v36 = vadd.f32 %v3939_v34, %v9481_v53  ;;  %v9899_v56 = vld [vmem:[#allocation38_spill] sm:$0xff] }
 0x3c1   : > { %6290 = vtanh.f32 %v4066_v3  ;;  %v4285_v50 = vpack.c.bf16 %v4247_v63, %v4245_v21  ;;  %v4246_v60 = vmul.f32 %v4182_v11, %v3734_v26  ;;  %v3739_v30 = vmul.f32 0.5, %v9387_v25 }
 0x3c2   : > { %v4187_v43 = vadd.f32 1.0, %v6277_v16  ;;  %v3736_v52 = vmul.f32 0.5, %v9345_v47  ;;  %v3738_v42 = vmul.f32 0.5, %v9371_v57  ;;  %v4067_v1 = vmul.f32 0.7978846, %v4003_v36 }
 0x3c3   : > { %4604 = vmatprep.mubr.bf16.mxu0 %v4285_v50  ;;  %v4284_v5 = vpack.c.bf16 %v4246_v60, %v4244_v20  ;;  %v4184_v62 = vadd.f32 1.0, %v9443_v2  ;;  %v4186_v13 = vadd.f32 1.0, %v6275_v61  ;;  %v6283_v39 = vpop.eup %6282  ;;  %v4249_v59 = vmul.f32 %v4185_v58, %v3737_v7 }
 0x3c4   : > { %v4251_v29 = vmul.f32 %v4187_v43, %v3739_v30  ;;  %v4189_v9 = vadd.f32 1.0, %v6281_v51  ;;  %6292 = vtanh.f32 %v4067_v1  ;;  %v3741_v25 = vmul.f32 0.5, %v9403_v8 }
 0x3c5   : > { %v6285_v14 = vpop.eup %6284  ;;  %v4248_v46 = vmul.f32 %v4184_v62, %v3736_v52  ;;  %v4250_v40 = vmul.f32 %v4186_v13, %v3738_v42  ;;  %v3743_v57 = vmul.f32 0.5, %v9435_v41  ;;  %v3740_v4 = vmul.f32 0.5, %v9393_v38 }
 0x3c6   : > { %v6287_v49 = vpop.eup %6286  ;;  %4605 = vmatmul.mubr.bf16.gmra.mrb[48].mxu0 %v4284_v5  ;;  %v4287_v47 = vpack.c.bf16 %v4251_v29, %v4249_v59  ;;  %v4191_v48 = vadd.f32 1.0, %v6285_v14  ;;  %v3742_v61 = vmul.f32 0.5, %v9418_v55  ;;  %v4188_v10 = vadd.f32 1.0, %v6279_v27 }
 0x3c7   : > { %v4286_v2 = vpack.c.bf16 %v4250_v40, %v4248_v46  ;;  %v4190_v15 = vadd.f32 1.0, %v6283_v39  ;;  %v4253_v45 = vmul.f32 %v4189_v9, %v3741_v25  ;;  %v4192_v0 = vadd.f32 1.0, %v6287_v49 }
 0x3c8   : > { %4614 = vmatprep.mubr.bf16.mxu0 %v4287_v47  ;;  %v4255_v17 = vmul.f32 %v4191_v48, %v3743_v57  ;;  %v4252_v18 = vmul.f32 %v4188_v10, %v3740_v4  ;;  %v3744_v41 = vmul.f32 0.5, %v9441_v6  ;;  %v3746_v28 = vmul.f32 0.5, %v9467_v19  ;;  %v4901_v6 = vld [vmem:[#allocation11] sm:$0x3]  ;;  %v9898_v19 = vld [vmem:[#allocation37_spill] sm:$0xff] }
 0x3c9   : > { %v4254_v12 = vmul.f32 %v4190_v15, %v3742_v61  ;;  %v6289_v16 = vpop.eup %6288  ;;  %v3745_v51 = vmul.f32 0.5, %v9449_v31  ;;  %v3747_v44 = vmul.f32 0.5, %v9481_v53  ;;  %v9511_v26 = vrot.slane %v4901_v6, %v9898_v19 }
 0x3ca   : > { %v4289_v8 = vpack.c.bf16 %v4255_v17, %v4253_v45  ;;  %v4193_v22 = vadd.f32 1.0, %v6289_v16  ;;  %v4256_v55 = vmul.f32 %v4192_v0, %v3744_v41  ;;  %v9514_v3 = vrot.slane %v4901_v6, %v9899_v56 }
 0x3cb   : > { %v6291_v32 = vpop.eup %6290  ;;  %v4288_v37 = vpack.c.bf16 %v4254_v12, %v4252_v18 }
 0x3cc   : > { %v4194_v38 = vadd.f32 1.0, %v6291_v32  ;;  %v4257_v54 = vmul.f32 %v4193_v22, %v3745_v51 }
 0x3ce   : > { %4615 = vmatmul.mubr.bf16.gmra.mrb[52].mxu0 %v4286_v2  ;;  %v4258_v27 = vmul.f32 %v4194_v38, %v3746_v28  ;;  %v6293_v24 = vpop.eup %6292 }
 0x3cf   : > { %4624 = vmatprep.mubr.bf16.mxu0 %v4289_v8  ;;  %v4195_v33 = vadd.f32 1.0, %v6293_v24 }
 0x3d0   : > { %v4290_v23 = vpack.c.bf16 %v4258_v27, %v4256_v55 }
 0x3d1   : > { %v4259_v21 = vmul.f32 %v4195_v33, %v3747_v44 }
 0x3d3   : > { %v4291_v35 = vpack.c.bf16 %v4259_v21, %v4257_v54 }
 0x3d6   : > { %4625 = vmatmul.mubr.bf16.gmra.mrb[56].mxu0 %v4288_v37 }
 0x3d7   : > { %4634 = vmatprep.mubr.bf16.mxu0 %v4291_v35 }
 0x3de   : > { %4635 = vmatmul.mubr.bf16.gmra.mrb[60].mxu0 %v4290_v23 }
 0x41c   : > { %v4486_v34 = vpop.f32.mrb[0].mxu0 }
 0x41d   : > { %v4913_v31 = vadd.f32 %v9511_v26, %v4486_v34  ;;  %v4488_v53 = vpop.f32.mrb[1].mxu0 }
 0x41e   : > { %v4914_v63 = vadd.f32 %v9514_v3, %v4488_v53  ;;  %v4490_v11 = vpop.f32.mrb[2].mxu0 }
 0x41f   : > { %4977 = vst [vmem:[%s9520_s29] sm:$0xff] %v4913_v31  ;;  %v4915_v20 = vadd.f32 %v9511_v26, %v4490_v11  ;;  %v4492_v7 = vpop.f32.mrb[3].mxu0 }
 0x420   : > { %4978 = vst [vmem:[%s9520_s29 + $0x8] sm:$0xff] %v4914_v63  ;;  %v4916_v58 = vadd.f32 %v9514_v3, %v4492_v7 }
 0x421   : > { %4979 = vst [vmem:[%s9520_s29 + $0x10] sm:$0xff] %v4915_v20 }
 0x422   : > { %4980 = vst [vmem:[%s9520_s29 + $0x18] sm:$0xff] %v4916_v58 }
 0x429   : > { %v4496_v36 = vpop.f32.mrb[4].mxu0 }
 0x42a   : > { %v4917_v50 = vadd.f32 %v9511_v26, %v4496_v36  ;;  %v4498_v60 = vpop.f32.mrb[5].mxu0 }
 0x42b   : > { %v4918_v30 = vadd.f32 %v9514_v3, %v4498_v60  ;;  %v4500_v43 = vpop.f32.mrb[6].mxu0 }
 0x42c   : > { %4981 = vst [vmem:[%s9520_s29 + $0x20] sm:$0xff] %v4917_v50  ;;  %v4919_v52 = vadd.f32 %v9511_v26, %v4500_v43  ;;  %v4502_v42 = vpop.f32.mrb[7].mxu0 }
 0x42d   : > { %4982 = vst [vmem:[%s9520_s29 + $0x28] sm:$0xff] %v4918_v30  ;;  %v4920_v1 = vadd.f32 %v9514_v3, %v4502_v42 }
 0x42e   : > { %4983 = vst [vmem:[%s9520_s29 + $0x30] sm:$0xff] %v4919_v52 }
 0x42f   : > { %4984 = vst [vmem:[%s9520_s29 + $0x38] sm:$0xff] %v4920_v1 }
 0x433   : > { %v4506_v5 = vpop.f32.mrb[8].mxu0 }
 0x434   : > { %v4921_v62 = vadd.f32 %v9511_v26, %v4506_v5  ;;  %v4508_v13 = vpop.f32.mrb[9].mxu0 }
 0x435   : > { %v4922_v39 = vadd.f32 %v9514_v3, %v4508_v13  ;;  %v4510_v59 = vpop.f32.mrb[10].mxu0 }
 0x436   : > { %4985 = vst [vmem:[%s9520_s29 + $0x40] sm:$0xff] %v4921_v62  ;;  %v4923_v29 = vadd.f32 %v9511_v26, %v4510_v59  ;;  %v4512_v9 = vpop.f32.mrb[11].mxu0 }
 0x437   : > { %4986 = vst [vmem:[%s9520_s29 + $0x48] sm:$0xff] %v4922_v39  ;;  %v4924_v14 = vadd.f32 %v9514_v3, %v4512_v9 }
 0x438   : > { %4987 = vst [vmem:[%s9520_s29 + $0x50] sm:$0xff] %v4923_v29 }
 0x439   : > { %4988 = vst [vmem:[%s9520_s29 + $0x58] sm:$0xff] %v4924_v14 }
 0x43d   : > { %v4516_v46 = vpop.f32.mrb[12].mxu0 }
 0x43e   : > { %v4925_v40 = vadd.f32 %v9511_v26, %v4516_v46  ;;  %v4518_v25 = vpop.f32.mrb[13].mxu0 }
 0x43f   : > { %v4926_v49 = vadd.f32 %v9514_v3, %v4518_v25  ;;  %v4520_v47 = vpop.f32.mrb[14].mxu0 }
 0x440   : > { %4989 = vst [vmem:[%s9520_s29 + $0x60] sm:$0xff] %v4925_v40  ;;  %v4927_v57 = vadd.f32 %v9511_v26, %v4520_v47  ;;  %v4522_v48 = vpop.f32.mrb[15].mxu0 }
 0x441   : > { %4990 = vst [vmem:[%s9520_s29 + $0x68] sm:$0xff] %v4926_v49  ;;  %v4928_v4 = vadd.f32 %v9514_v3, %v4522_v48 }
 0x442   : > { %4991 = vst [vmem:[%s9520_s29 + $0x70] sm:$0xff] %v4927_v57 }
 0x443   : > { %4992 = vst [vmem:[%s9520_s29 + $0x78] sm:$0xff] %v4928_v4 }
 0x448   : > { %v4526_v2 = vpop.f32.mrb[16].mxu0 }
 0x449   : > { %v4929_v61 = vadd.f32 %v9511_v26, %v4526_v2  ;;  %v4528_v10 = vpop.f32.mrb[17].mxu0 }
 0x44a   : > { %v4930_v15 = vadd.f32 %v9514_v3, %v4528_v10  ;;  %v4530_v45 = vpop.f32.mrb[18].mxu0 }
 0x44b   : > { %4993 = vst [vmem:[%s9520_s29 + $0x80] sm:$0xff] %v4929_v61  ;;  %v4931_v17 = vadd.f32 %v9511_v26, %v4530_v45  ;;  %v4532_v18 = vpop.f32.mrb[19].mxu0 }
 0x44c   : > { %4994 = vst [vmem:[%s9520_s29 + $0x88] sm:$0xff] %v4930_v15  ;;  %v4932_v12 = vadd.f32 %v9514_v3, %v4532_v18 }
 0x44d   : > { %4995 = vst [vmem:[%s9520_s29 + $0x90] sm:$0xff] %v4931_v17 }
 0x44e   : > { %4996 = vst [vmem:[%s9520_s29 + $0x98] sm:$0xff] %v4932_v12 }
 0x452   : > { %v4536_v16 = vpop.f32.mrb[20].mxu0 }
 0x453   : > { %v4933_v8 = vadd.f32 %v9511_v26, %v4536_v16  ;;  %v4538_v0 = vpop.f32.mrb[21].mxu0 }
 0x454   : > { %v4934_v32 = vadd.f32 %v9514_v3, %v4538_v0  ;;  %v4540_v37 = vpop.f32.mrb[22].mxu0 }
 0x455   : > { %4997 = vst [vmem:[%s9520_s29 + $0xa0] sm:$0xff] %v4933_v8  ;;  %v4935_v41 = vadd.f32 %v9511_v26, %v4540_v37  ;;  %v4542_v28 = vpop.f32.mrb[23].mxu0 }
 0x456   : > { %4998 = vst [vmem:[%s9520_s29 + $0xa8] sm:$0xff] %v4934_v32  ;;  %v4936_v38 = vadd.f32 %v9514_v3, %v4542_v28 }
 0x457   : > { %4999 = vst [vmem:[%s9520_s29 + $0xb0] sm:$0xff] %v4935_v41 }
 0x458   : > { %5000 = vst [vmem:[%s9520_s29 + $0xb8] sm:$0xff] %v4936_v38 }
 0x45d   : > { %v4546_v22 = vpop.f32.mrb[24].mxu0 }
 0x45e   : > { %v4937_v55 = vadd.f32 %v9511_v26, %v4546_v22  ;;  %v4548_v27 = vpop.f32.mrb[25].mxu0 }
 0x45f   : > { %v4938_v24 = vadd.f32 %v9514_v3, %v4548_v27  ;;  %v4550_v51 = vpop.f32.mrb[26].mxu0 }
 0x460   : > { %5001 = vst [vmem:[%s9520_s29 + $0xc0] sm:$0xff] %v4937_v55  ;;  %v4939_v44 = vadd.f32 %v9511_v26, %v4550_v51  ;;  %v4552_v33 = vpop.f32.mrb[27].mxu0 }
 0x461   : > { %5002 = vst [vmem:[%s9520_s29 + $0xc8] sm:$0xff] %v4938_v24  ;;  %v4940_v23 = vadd.f32 %v9514_v3, %v4552_v33 }
 0x462   : > { %5003 = vst [vmem:[%s9520_s29 + $0xd0] sm:$0xff] %v4939_v44 }
 0x463   : > { %5004 = vst [vmem:[%s9520_s29 + $0xd8] sm:$0xff] %v4940_v23 }
 0x467   : > { %v4556_v54 = vpop.f32.mrb[28].mxu0 }
 0x468   : > { %v4941_v21 = vadd.f32 %v9511_v26, %v4556_v54  ;;  %v4558_v35 = vpop.f32.mrb[29].mxu0 }
 0x469   : > { %v4942_v6 = vadd.f32 %v9514_v3, %v4558_v35  ;;  %v4560_v19 = vpop.f32.mrb[30].mxu0 }
 0x46a   : > { %5005 = vst [vmem:[%s9520_s29 + $0xe0] sm:$0xff] %v4941_v21  ;;  %v4943_v56 = vadd.f32 %v9511_v26, %v4560_v19  ;;  %v4562_v34 = vpop.f32.mrb[31].mxu0 }
 0x46b   : > { %5006 = vst [vmem:[%s9520_s29 + $0xe8] sm:$0xff] %v4942_v6  ;;  %v4944_v31 = vadd.f32 %v9514_v3, %v4562_v34 }
 0x46c   : > { %5007 = vst [vmem:[%s9520_s29 + $0xf0] sm:$0xff] %v4943_v56 }
 0x46d   : > { %5008 = vst [vmem:[%s9520_s29 + $0xf8] sm:$0xff] %v4944_v31 }
 0x472   : > { %v4566_v53 = vpop.f32.mrb[32].mxu0 }
 0x473   : > { %v4945_v63 = vadd.f32 %v9511_v26, %v4566_v53  ;;  %v4568_v11 = vpop.f32.mrb[33].mxu0 }
 0x474   : > { %v4946_v20 = vadd.f32 %v9514_v3, %v4568_v11  ;;  %v4570_v7 = vpop.f32.mrb[34].mxu0 }
 0x475   : > { %5009 = vst [vmem:[%s9520_s29 + $0x100] sm:$0xff] %v4945_v63  ;;  %v4947_v58 = vadd.f32 %v9511_v26, %v4570_v7  ;;  %v4572_v36 = vpop.f32.mrb[35].mxu0 }
 0x476   : > { %5010 = vst [vmem:[%s9520_s29 + $0x108] sm:$0xff] %v4946_v20  ;;  %v4948_v50 = vadd.f32 %v9514_v3, %v4572_v36 }
 0x477   : > { %5011 = vst [vmem:[%s9520_s29 + $0x110] sm:$0xff] %v4947_v58 }
 0x478   : > { %5012 = vst [vmem:[%s9520_s29 + $0x118] sm:$0xff] %v4948_v50 }
 0x47c   : > { %v4576_v60 = vpop.f32.mrb[36].mxu0 }
 0x47d   : > { %v4949_v30 = vadd.f32 %v9511_v26, %v4576_v60  ;;  %v4578_v43 = vpop.f32.mrb[37].mxu0 }
 0x47e   : > { %v4950_v52 = vadd.f32 %v9514_v3, %v4578_v43  ;;  %v4580_v42 = vpop.f32.mrb[38].mxu0 }
 0x47f   : > { %5013 = vst [vmem:[%s9520_s29 + $0x120] sm:$0xff] %v4949_v30  ;;  %v4951_v1 = vadd.f32 %v9511_v26, %v4580_v42  ;;  %v4582_v5 = vpop.f32.mrb[39].mxu0 }
 0x480   : > { %5014 = vst [vmem:[%s9520_s29 + $0x128] sm:$0xff] %v4950_v52  ;;  %v4952_v62 = vadd.f32 %v9514_v3, %v4582_v5 }
 0x481   : > { %5015 = vst [vmem:[%s9520_s29 + $0x130] sm:$0xff] %v4951_v1 }
 0x482   : > { %5016 = vst [vmem:[%s9520_s29 + $0x138] sm:$0xff] %v4952_v62 }
 0x487   : > { %v4586_v13 = vpop.f32.mrb[40].mxu0 }
 0x488   : > { %v4953_v39 = vadd.f32 %v9511_v26, %v4586_v13  ;;  %v4588_v59 = vpop.f32.mrb[41].mxu0 }
 0x489   : > { %v4954_v29 = vadd.f32 %v9514_v3, %v4588_v59  ;;  %v4590_v9 = vpop.f32.mrb[42].mxu0 }
 0x48a   : > { %5017 = vst [vmem:[%s9520_s29 + $0x140] sm:$0xff] %v4953_v39  ;;  %v4955_v14 = vadd.f32 %v9511_v26, %v4590_v9  ;;  %v4592_v46 = vpop.f32.mrb[43].mxu0 }
 0x48b   : > { %5018 = vst [vmem:[%s9520_s29 + $0x148] sm:$0xff] %v4954_v29  ;;  %v4956_v40 = vadd.f32 %v9514_v3, %v4592_v46 }
 0x48c   : > { %5019 = vst [vmem:[%s9520_s29 + $0x150] sm:$0xff] %v4955_v14 }
 0x48d   : > { %5020 = vst [vmem:[%s9520_s29 + $0x158] sm:$0xff] %v4956_v40 }
 0x491   : > { %v4596_v25 = vpop.f32.mrb[44].mxu0 }
 0x492   : > { %v4957_v49 = vadd.f32 %v9511_v26, %v4596_v25  ;;  %v4598_v47 = vpop.f32.mrb[45].mxu0 }
 0x493   : > { %v4958_v57 = vadd.f32 %v9514_v3, %v4598_v47  ;;  %v4600_v48 = vpop.f32.mrb[46].mxu0 }
 0x494   : > { %5021 = vst [vmem:[%s9520_s29 + $0x160] sm:$0xff] %v4957_v49  ;;  %v4959_v4 = vadd.f32 %v9511_v26, %v4600_v48  ;;  %v4602_v2 = vpop.f32.mrb[47].mxu0 }
 0x495   : > { %5022 = vst [vmem:[%s9520_s29 + $0x168] sm:$0xff] %v4958_v57  ;;  %v4960_v61 = vadd.f32 %v9514_v3, %v4602_v2 }
 0x496   : > { %5023 = vst [vmem:[%s9520_s29 + $0x170] sm:$0xff] %v4959_v4 }
 0x497   : > { %5024 = vst [vmem:[%s9520_s29 + $0x178] sm:$0xff] %v4960_v61 }
 0x499   : > { %v4606_v10 = vpop.f32.mrb[48].mxu0 }
 0x49a   : > { %v4961_v15 = vadd.f32 %v9511_v26, %v4606_v10  ;;  %v4608_v45 = vpop.f32.mrb[49].mxu0 }
 0x49b   : > { %v4962_v17 = vadd.f32 %v9514_v3, %v4608_v45  ;;  %v4610_v18 = vpop.f32.mrb[50].mxu0 }
 0x49c   : > { %5025 = vst [vmem:[%s9520_s29 + $0x180] sm:$0xff] %v4961_v15  ;;  %v4963_v12 = vadd.f32 %v9511_v26, %v4610_v18  ;;  %v4612_v16 = vpop.f32.mrb[51].mxu0 }
 0x49d   : > { %5026 = vst [vmem:[%s9520_s29 + $0x188] sm:$0xff] %v4962_v17  ;;  %v4964_v8 = vadd.f32 %v9514_v3, %v4612_v16 }
 0x49e   : > { %5027 = vst [vmem:[%s9520_s29 + $0x190] sm:$0xff] %v4963_v12 }
 0x49f   : > { %5028 = vst [vmem:[%s9520_s29 + $0x198] sm:$0xff] %v4964_v8 }
 0x4a1   : > { %v4616_v0 = vpop.f32.mrb[52].mxu0 }
 0x4a2   : > { %v4965_v32 = vadd.f32 %v9511_v26, %v4616_v0  ;;  %v4618_v37 = vpop.f32.mrb[53].mxu0 }
 0x4a3   : > { %v4966_v41 = vadd.f32 %v9514_v3, %v4618_v37  ;;  %v4620_v28 = vpop.f32.mrb[54].mxu0 }
 0x4a4   : > { %5029 = vst [vmem:[%s9520_s29 + $0x1a0] sm:$0xff] %v4965_v32  ;;  %v4967_v38 = vadd.f32 %v9511_v26, %v4620_v28  ;;  %v4622_v22 = vpop.f32.mrb[55].mxu0 }
 0x4a5   : > { %5030 = vst [vmem:[%s9520_s29 + $0x1a8] sm:$0xff] %v4966_v41  ;;  %v4968_v55 = vadd.f32 %v9514_v3, %v4622_v22 }
 0x4a6   : > { %5031 = vst [vmem:[%s9520_s29 + $0x1b0] sm:$0xff] %v4967_v38 }
 0x4a7   : > { %5032 = vst [vmem:[%s9520_s29 + $0x1b8] sm:$0xff] %v4968_v55 }
 0x4a9   : > { %v4626_v27 = vpop.f32.mrb[56].mxu0 }
 0x4aa   : > { %v4969_v24 = vadd.f32 %v9511_v26, %v4626_v27  ;;  %v4628_v51 = vpop.f32.mrb[57].mxu0 }
 0x4ab   : > { %v4970_v44 = vadd.f32 %v9514_v3, %v4628_v51  ;;  %v4630_v33 = vpop.f32.mrb[58].mxu0 }
 0x4ac   : > { %5033 = vst [vmem:[%s9520_s29 + $0x1c0] sm:$0xff] %v4969_v24  ;;  %v4971_v23 = vadd.f32 %v9511_v26, %v4630_v33  ;;  %v4632_v54 = vpop.f32.mrb[59].mxu0 }
 0x4ad   : > { %5034 = vst [vmem:[%s9520_s29 + $0x1c8] sm:$0xff] %v4970_v44  ;;  %v4972_v21 = vadd.f32 %v9514_v3, %v4632_v54 }
 0x4ae   : > { %5035 = vst [vmem:[%s9520_s29 + $0x1d0] sm:$0xff] %v4971_v23 }
 0x4af   : > { %5036 = vst [vmem:[%s9520_s29 + $0x1d8] sm:$0xff] %v4972_v21 }
 0x4b1   : > { %v4636_v35 = vpop.f32.mrb[60].mxu0  ;;  %5048 = sbr.rel (!%p9900_p10) target bundleno = 1236 (0x4d4), region = 64 }
 0x4b2   : > { %v4973_v6 = vadd.f32 %v9511_v26, %v4636_v35  ;;  %v4638_v19 = vpop.f32.mrb[61].mxu0 }
 0x4b3   : > { %v4974_v56 = vadd.f32 %v9514_v3, %v4638_v19  ;;  %v4640_v34 = vpop.f32.mrb[62].mxu0 }
 0x4b4   : > { %5037 = vst [vmem:[%s9520_s29 + $0x1e0] sm:$0xff] %v4973_v6  ;;  %v4975_v31 = vadd.f32 %v9511_v26, %v4640_v34  ;;  %v4642_v53 = vpop.f32.mrb[63].mxu0 }
 0x4b5   : > { %5038 = vst [vmem:[%s9520_s29 + $0x1e8] sm:$0xff] %v4974_v56  ;;  %v4976_v63 = vadd.f32 %v9514_v3, %v4642_v53 }
 0x4b6   : > { %5039 = vst [vmem:[%s9520_s29 + $0x1f0] sm:$0xff] %v4975_v31 }
 0x4b7   : > { %5040 = vst [vmem:[%s9520_s29 + $0x1f8] sm:$0xff] %v4976_v63 }
 0x4b8   : > { %s9912_s27 = smov (!%p5051_p1, %s5050_s27), 32 }
 0x4b9   : > { %s9652_s24 = sshll.u32 %s9912_s27, 8 }
 0x4ba   : > { %s5056_s11 = ssub.s32 8192, %s9652_s24 }
 0x4bb   : > { %5057 = vsyncadd %s5042_s7, %s5056_s11  ;;  %p5393_p4 = scmp.ne.s32.totalorder %s9652_s24, 0  ;;  %s5405_s30 = sshll.u32 %s6576_s22, 13 }
 0x4bc   : > { %s9662_s25 = scalar_lea.hbm %s9715_s5, %s5405_s30  ;;  %s5063_s15 = sshll.u32 %s9520_s29, 4  ;;  %s9665_s15 = int_to_ptr.vmem [resolvable:$true] %s5063_s15 }
 0x4bd   : > { %s6435_s26 = scalar_lea.vmem %s9665_s15, %s9652_s24  ;;  %s6522_s23 = smov [#allocation12]  }
 0x4be   : > { %p6436_p6 = scmp.ne.s32.totalorder %s9665_s15, %s6435_s26  ;;  %s6439_s8 = sshll.u32 %s6522_s23, 4  ;;  %s6440_s8 = int_to_ptr.vmem [resolvable:$false] %s6439_s8 }
 0x4bf   : > { %s6441_s22 = scalar_lea.vmem %s6440_s8, 16384  ;;  %p6442_p11 = scmp.lt.s32.totalorder %s9665_s15, %s6440_s8 }
 0x4c0   : > { %p6437_p3 = pnand %p6436_p6, %p5393_p4  ;;  %p6443_p13 = scmp.lt.s32.totalorder %s6441_s22, %s6435_s26 }
 0x4c2   : > { %p6438_p5 = pneg %p6437_p3  ;;  %p6444_p12 = por %p6443_p13, %p6442_p11 }
 0x4c4   : > { %p6445_p0 = pnand %p6444_p12, %p6438_p5 }
 0x4c6   : > { %6448 = shalt.err (!%p6445_p0)
}
 0x4c7   : > { %s6449_s9 = scalar_lea.hbm %s9662_s25, %s9652_s24  ;;  %s6453_s17 = scalar_lea.hbm %s9715_s5, 46848 }
 0x4c8   : > { %p6450_p2 = scmp.ne.s32.totalorder %s9662_s25, %s6449_s9  ;;  %p6454_p9 = scmp.lt.u32.totalorder %s9662_s25, %s9715_s5 }
 0x4c9   : > { %p6455_p10 = scmp.lt.u32.totalorder %s6453_s17, %s6449_s9  ;;  %p6457_p6 = scmp.lt.u32.totalorder %s6449_s9, %s9662_s25 }
 0x4ca   : > { %p6451_p7 = pnand %p6450_p2, %p5393_p4 }
 0x4cb   : > { %p6456_p1 = por %p6455_p10, %p6454_p9 }
 0x4cc   : > { %p6452_p8 = pneg %p6451_p7 }
 0x4cd   : > { %p6458_p3 = por %p6457_p6, %p6456_p1 }
 0x4cf   : > { %p6459_p5 = pnand %p6458_p3, %p6452_p8 }
 0x4d1   : > { %6462 = shalt.err (!%p6459_p5)
}
 0x4d2   : > { %s6523_s13 = smov 256   ;;  %s6524_s29 = smov 16  }
 0x4d3   : > { %5069 = dma.vmem_to_hbm [thread:$0]  (%p5393_p4), %s9665_s15, %s9652_s24, %s9662_s25, %s5042_s7, %s6523_s13, %s6523_s13, %s6524_s29  }
 0x4d4 PF: > { %s9901_s1 = sld [smem:[#allocation17_spill]]  ;;  %s9902_s27 = sld [smem:[#allocation20_spill]] }
 0x4d5   : > { %p5577_p11 = scmp.ge.s32.totalorder %s6509_s21, 2 }
 0x4da   : > { %s5078_s11 = sand.u32 1, %s9901_s1   ;;  %p9903_p13 = scmp.ne.s32.totalorder %s9902_s27, 0 }
 0x4db   : > { %s5079_s30 = scalar_lea.sflag [#allocation5], %s5078_s11 }
 0x4dc   : > { %p5566_p12 = pnand %p5577_p11, %p9903_p13 }
 0x4de   : > { %6492 = dma.done.wait (!%p5566_p12), %s5079_s30, 8192  }
 0x4df   : > { %6494 = vsyncadd (!%p5566_p12), %s5079_s30, 4294959104  ;;  %s9904_s21 = sld [smem:[#allocation18_spill]]  ;;  %s9905_s14 = sld [smem:[#allocation19_spill]] }
 0x4e0   : > { %s9906_s18 = smov %s6501_s19  ;;  %s9907_s19 = smov %s6505_s20 }
 0x4e5   : > { %p20_p0 = scmp.ge.s32.totalorder %s9904_s21, 8   ;;  %s9908_s20 = smov %s9905_s14 }
 0x4e7   :  { %22 = sbr.rel (!%p20_p0) target bundleno = 9 (0x9), region = 101 }
 0x4ee   :  { %5084 = vsyncpa [#allocation4], 1 }
 0x4ef   :  { %5086 = vsyncpa [#allocation4 + $0x1], 1 }
 0x4f0   :  { %5087 = vsyncpa [#allocation7], 1 }
 0x4f1   :  { %5088 = vsyncpa [#allocation10], 1 }
 0x4f2   :  { %5089 = vsyncpa [#allocation5], 1 }
 0x4f3   :  { %5091 = vsyncpa [#allocation5 + $0x1], 1 }

</bundles_post_ra>
